<compile_context>
chip_gen: v7x
topology: tpu7x:2x2x1
jax: 0.10.0
libtpu: 0.0.40
codegen_flags: <defaults>
</compile_context>

<pallas_src>
import jax
import jax.numpy as jnp
from jax.experimental import pallas as pl
from jax.experimental.pallas import tpu as pltpu


# ----------------------------- kernels -------------------------------------

def _mlp_resident_kernel(x_ref, w_fc_ref, w_proj_ref, o_ref):
    """Weights fully resident in VMEM; one fused step per (tm, C) row tile."""
    h = jnp.dot(x_ref[...], w_fc_ref[...], preferred_element_type=jnp.float32)
    h = jnp.maximum(h, 0.0)
    h = h * h
    o_ref[...] = jnp.dot(h.astype(w_proj_ref.dtype), w_proj_ref[...],
                         preferred_element_type=jnp.float32).astype(o_ref.dtype)


def _mlp_stream_kernel_f32out(x_ref, w_fc_ref, w_proj_ref, o_ref):
    """Streamed hidden slabs; accumulate directly into the resident f32 output."""
    k = pl.program_id(1)

    @pl.when(k == 0)
    def _init():
        o_ref[...] = jnp.zeros_like(o_ref)

    h = jnp.dot(x_ref[...], w_fc_ref[...], preferred_element_type=jnp.float32)
    h = jnp.maximum(h, 0.0)
    h = h * h
    o_ref[...] += jnp.dot(h.astype(w_proj_ref.dtype), w_proj_ref[...],
                          preferred_element_type=jnp.float32)


def _mlp_stream_kernel_acc(x_ref, w_fc_ref, w_proj_ref, o_ref, acc_ref):
    """Streamed hidden slabs with an f32 scratch accumulator (non-f32 output)."""
    k = pl.program_id(1)

    @pl.when(k == 0)
    def _init():
        acc_ref[...] = jnp.zeros_like(acc_ref)

    h = jnp.dot(x_ref[...], w_fc_ref[...], preferred_element_type=jnp.float32)
    h = jnp.maximum(h, 0.0)
    h = h * h
    acc_ref[...] += jnp.dot(h.astype(w_proj_ref.dtype), w_proj_ref[...],
                            preferred_element_type=jnp.float32)

    @pl.when(k == pl.num_programs(1) - 1)
    def _store():
        o_ref[...] = acc_ref[...].astype(o_ref.dtype)


# ----------------------------- helpers -------------------------------------

def _nbytes(shape, dtype):
    n = 1
    for s in shape:
        n *= s
    return n * jnp.dtype(dtype).itemsize


def _hw_info():
    """(usable VMEM per core in bytes, has >1 TensorCore per chip)."""
    vmem_cap = 64 << 20                       # conservative default (v7x per-TC)
    try:
        info = pltpu.get_tpu_info()
        vmem_cap = int(getattr(info, "vmem_capacity_bytes", vmem_cap))
    except Exception:
        pass
    multi_tc = False
    try:
        kind = jax.devices()[0].device_kind.lower()
        multi_tc = "v7" in kind               # v7x: 2 TensorCores per chip
    except Exception:
        pass
    return vmem_cap, multi_tc


def _pick_tile(dim, candidates, fits, prefer_multi_step=False):
    """Largest candidate dividing `dim` whose footprint fits.

    With prefer_multi_step (multi-TensorCore parts), prefer a tile that leaves
    an even number (>= 2) of steps so both cores stay busy.
    """
    divs = [c for c in candidates if c <= dim and dim % c == 0 and fits(c)]
    if not divs:
        divs = [c for c in candidates if c <= dim and dim % c == 0]
    if not divs:
        return dim  # full-dimension escape hatch of the (8,128) rule
    if prefer_multi_step:
        even = [c for c in divs if (dim // c) >= 2 and (dim // c) % 2 == 0]
        if even:
            return even[0]
        multi = [c for c in divs if dim // c >= 2]
        if multi:
            return multi[0]
    return divs[0]


# ----------------------------- entry point ----------------------------------

def mlp_pallas(x, w_fc, w_proj, *, tm=None, tn=None):
    """x: (B, T, C) or (M, C). w_fc: (C, 4C). w_proj: (4C, C)."""
    orig_shape = x.shape
    C = orig_shape[-1]
    H = w_fc.shape[1]
    assert w_fc.shape == (C, H) and w_proj.shape == (H, C)

    x2d = x.reshape(-1, C)
    M = x2d.shape[0]
    out_dtype = x.dtype

    xi = jnp.dtype(x.dtype).itemsize
    wi = jnp.dtype(w_fc.dtype).itemsize
    oi = jnp.dtype(out_dtype).itemsize

    vmem_cap, multi_tc = _hw_info()
    safe_cap = min(100 << 20, int(0.75 * vmem_cap))   # ~48 MiB v7x, ~96 MiB v5e/v6e

    w_bytes = _nbytes((C, H), w_fc.dtype) + _nbytes((H, C), w_proj.dtype)

    # bf16 min tile is (16,128): never propose tm=8 for sub-32-bit inputs.
    min_tm = 8 if xi >= 4 else 16
    tm_candidates = tuple(c for c in (1024, 512, 256, 128, 64, 32, 16, 8)
                          if c >= min_tm)

    # ---- Path A: both weight matrices fully resident in VMEM ---------------
    def fits_resident(tm_):
        fp = (2 * tm_ * C * xi          # double-buffered x row tiles
              + 2 * tm_ * C * oi        # double-buffered output tiles
              + 2 * w_bytes             # weights (budget 2x for safety)
              + tm_ * H * 4             # f32 hidden intermediate h
              + tm_ * H * wi)           # cast copy fed to the proj matmul
        return fp <= int(0.9 * safe_cap)

    chosen = None
    if tn is None and 2 * w_bytes <= int(0.6 * safe_cap):
        tm_a = tm if tm is not None else _pick_tile(
            M, tm_candidates, fits_resident, prefer_multi_step=multi_tc)
        if M % tm_a == 0 and fits_resident(tm_a):
            chosen = ("resident", tm_a, H)

    # ---- Path B: stream the hidden dimension in tn-wide slabs ---------------
    if chosen is None:
        def fits_stream(tm_, tn_):
            acc_bytes = 0 if out_dtype == jnp.float32 else tm_ * C * 4
            fp = (2 * tm_ * C * xi
                  + 2 * (C * tn_ * wi + tn_ * C * wi)   # double-buffered slabs
                  + 2 * tm_ * C * oi
                  + acc_bytes
                  + tm_ * tn_ * 4                       # f32 intermediate h
                  + tm_ * tn_ * wi)                     # cast copy
            return fp <= int(0.9 * safe_cap)

        tn_b = tn if tn is not None else _pick_tile(H, (512, 256, 128),
                                                    lambda t: True)
        tm_b = tm if tm is not None else _pick_tile(
            M, tm_candidates, lambda t: fits_stream(t, tn_b),
            prefer_multi_step=multi_tc)
        chosen = ("stream", tm_b, tn_b)

    mode, tm_, tn_ = chosen
    assert M % tm_ == 0 and H % tn_ == 0

    flops = 4 * M * C * H  # two matmuls of 2*M*C*H FLOPs each

    if mode == "resident":
        fp = (2 * tm_ * C * xi + 2 * tm_ * C * oi + 2 * w_bytes
              + tm_ * H * 4 + tm_ * H * wi)
        vmem_limit = int(min(safe_cap, max(32 << 20, int(1.25 * fp))))
        cost = pl.CostEstimate(flops=flops, transcendentals=0,
                               bytes_accessed=int(M * C * xi + M * C * oi
                                                  + w_bytes))
        out = pl.pallas_call(
            _mlp_resident_kernel,
            out_shape=jax.ShapeDtypeStruct((M, C), out_dtype),
            grid_spec=pltpu.PrefetchScalarGridSpec(
                num_scalar_prefetch=0,
                grid=(M // tm_,),
                in_specs=[
                    pl.BlockSpec((tm_, C), lambda i: (i, 0)),   # x row tile
                    pl.BlockSpec((C, H), lambda i: (0, 0)),     # W_fc (resident)
                    pl.BlockSpec((H, C), lambda i: (0, 0)),     # W_proj (resident)
                ],
                out_specs=pl.BlockSpec((tm_, C), lambda i: (i, 0)),
            ),
            compiler_params=pltpu.CompilerParams(
                dimension_semantics=("parallel",),
                vmem_limit_bytes=vmem_limit,
            ),
            cost_estimate=cost,
        )(x2d, w_fc, w_proj)
        return out.reshape(orig_shape)

    # Streaming path.
    f32_out = out_dtype == jnp.float32
    acc_bytes = 0 if f32_out else tm_ * C * 4
    fp = (2 * tm_ * C * xi + 2 * (C * tn_ * wi + tn_ * C * wi)
          + 2 * tm_ * C * oi + acc_bytes + tm_ * tn_ * 4 + tm_ * tn_ * wi)
    vmem_limit = int(min(safe_cap, max(32 << 20, int(1.25 * fp))))
    cost = pl.CostEstimate(flops=flops, transcendentals=0,
                           bytes_accessed=int(M * C * xi + M * C * oi
                                              + w_bytes * (M // tm_)))

    kernel = _mlp_stream_kernel_f32out if f32_out else _mlp_stream_kernel_acc
    scratch = [] if f32_out else [pltpu.VMEM((tm_, C), jnp.float32)]

    out = pl.pallas_call(
        kernel,
        out_shape=jax.ShapeDtypeStruct((M, C), out_dtype),
        grid_spec=pltpu.PrefetchScalarGridSpec(
            num_scalar_prefetch=0,
            grid=(M // tm_, H // tn_),                   # reduction axis last
            in_specs=[
                pl.BlockSpec((tm_, C), lambda i, k: (i, 0)),   # x row tile
                pl.BlockSpec((C, tn_), lambda i, k: (0, k)),   # W_fc column slab
                pl.BlockSpec((tn_, C), lambda i, k: (k, 0)),   # W_proj row slab
            ],
            out_specs=pl.BlockSpec((tm_, C), lambda i, k: (i, 0)),
            scratch_shapes=scratch,
        ),
        compiler_params=pltpu.CompilerParams(
            dimension_semantics=("parallel", "arbitrary"),
            vmem_limit_bytes=vmem_limit,
        ),
        cost_estimate=cost,
    )(x2d, w_fc, w_proj)
    return out.reshape(orig_shape)


if __name__ == "__main__":
    # Small-but-aligned config: M=B*T=256, C=256, hidden H=1024.
    # (C multiple of 128 keeps the output BlockSpec lane-dense.)
    B, T, n_embd = 2, 128, 256
    C, H = n_embd, 4 * n_embd

    key = jax.random.PRNGKey(0)
    kx, kfc, kproj = jax.random.split(key, 3)

    x = jax.random.normal(kx, (B, T, C), dtype=jnp.float32)
    bound_fc = 1.0 / (C ** 0.5)
    w_fc = jax.random.uniform(kfc, (C, H), jnp.float32, -bound_fc, bound_fc)

    # Reference (plain JAX) with a NON-zero proj weight so the check is not
    # vacuous (the module zero-inits c_proj, which would make any output pass).
    bound_pj = 1.0 / (H ** 0.5)
    w_proj_nz = jax.random.uniform(kproj, (H, C), jnp.float32,
                                   -bound_pj, bound_pj)
    h_ref = jnp.maximum(x.reshape(-1, C) @ w_fc, 0.0) ** 2
    y_ref = (h_ref @ w_proj_nz).reshape(B, T, C)
    y_scale = float(jnp.max(jnp.abs(y_ref))) + 1e-6

    # --- Test 1: f32, resident-weights fast path ---
    y = jax.block_until_ready(mlp_pallas(x, w_fc, w_proj_nz))
    assert y.shape == (B, T, C)
    err = float(jnp.max(jnp.abs(y - y_ref)))
    assert err < 2e-2 * y_scale, f"f32 resident mismatch (err={err})"

    # --- Test 2: module-faithful zero-initialized c_proj weight ---
    y0 = jax.block_until_ready(
        mlp_pallas(x, w_fc, jnp.zeros((H, C), jnp.float32)))
    assert float(jnp.max(jnp.abs(y0))) == 0.0, "zero-init c_proj must give zeros"

    # --- Test 3: bf16 weights/activations, resident path (f32 MXU acc) ---
    yb = jax.block_until_ready(
        mlp_pallas(x.astype(jnp.bfloat16),
                   w_fc.astype(jnp.bfloat16),
                   w_proj_nz.astype(jnp.bfloat16)))
    err_b = float(jnp.max(jnp.abs(yb.astype(jnp.float32) - y_ref)))
    assert err_b < 5e-2 * y_scale, f"bf16 resident mismatch (err={err_b})"

    # --- Test 4: f32 streaming path (forced via tn) ---
    ys = jax.block_until_ready(mlp_pallas(x, w_fc, w_proj_nz, tn=256))
    err_s = float(jnp.max(jnp.abs(ys - y_ref)))
    assert err_s < 2e-2 * y_scale, f"f32 streaming mismatch (err={err_s})"

    # --- Test 5: bf16 streaming path with f32 scratch accumulator ---
    ysb = jax.block_until_ready(
        mlp_pallas(x.astype(jnp.bfloat16),
                   w_fc.astype(jnp.bfloat16),
                   w_proj_nz.astype(jnp.bfloat16), tn=256))
    err_sb = float(jnp.max(jnp.abs(ysb.astype(jnp.float32) - y_ref)))
    assert err_sb < 5e-2 * y_scale, f"bf16 streaming mismatch (err={err_sb})"

    print("KERNEL_OK")
</pallas_src>

<mosaic_0001>
module attributes {stable_mosaic.version = 11 : i64} {
  func.func @_mlp_resident_kernel(%arg0: i32, %arg1: memref<256x256xf32, #tpu.memory_space<vmem>>, %arg2: memref<256x1024xf32, #tpu.memory_space<vmem>>, %arg3: memref<1024x256xf32, #tpu.memory_space<vmem>>, %arg4: memref<256x256xf32, #tpu.memory_space<vmem>>) attributes {dimension_semantics = [#tpu.dimension_semantics<parallel>], iteration_bounds = array<i64: 1>, scalar_prefetch = 0 : i64, scratch_operands = 0 : i64, tpu.core_type = #tpu.core_type<tc>, window_params = [{transform_indices = @transform_0, window_bounds = array<i64: 256, 256>}, {pipeline_mode = #tpu.pipeline_mode<synchronous>, transform_indices = @transform_1, window_bounds = array<i64: 256, 1024>}, {pipeline_mode = #tpu.pipeline_mode<synchronous>, transform_indices = @transform_2, window_bounds = array<i64: 1024, 256>}, {transform_indices = @transform_3, window_bounds = array<i64: 256, 256>}]} {
    %c0 = arith.constant 0 : index
    %c0_0 = arith.constant 0 : index
    %0 = vector.load %arg1[%c0, %c0_0] : memref<256x256xf32, #tpu.memory_space<vmem>>, vector<256x256xf32>
    %c0_1 = arith.constant 0 : index
    %c0_2 = arith.constant 0 : index
    %1 = vector.load %arg2[%c0_1, %c0_2] : memref<256x1024xf32, #tpu.memory_space<vmem>>, vector<256x1024xf32>
    %cst = arith.constant dense<0.000000e+00> : vector<256x1024xf32>
    %2 = tpu.matmul %0, %1, %cst {dimension_numbers = #tpu.dot_dimension_numbers<[1], [0], [0], [1], [0, 0, 1, 1], [], []>} : vector<256x256xf32>, vector<256x1024xf32>, vector<256x1024xf32> -> vector<256x1024xf32>
    %cst_3 = arith.constant 0.000000e+00 : f32
    %3 = vector.broadcast %cst_3 : f32 to vector<256x1024xf32>
    %4 = arith.maximumf %2, %3 : vector<256x1024xf32>
    %5 = arith.mulf %4, %4 : vector<256x1024xf32>
    %c0_4 = arith.constant 0 : index
    %c0_5 = arith.constant 0 : index
    %6 = vector.load %arg3[%c0_4, %c0_5] : memref<1024x256xf32, #tpu.memory_space<vmem>>, vector<1024x256xf32>
    %cst_6 = arith.constant dense<0.000000e+00> : vector<256x256xf32>
    %7 = tpu.matmul %5, %6, %cst_6 {dimension_numbers = #tpu.dot_dimension_numbers<[1], [0], [0], [1], [0, 0, 1, 1], [], []>} : vector<256x1024xf32>, vector<1024x256xf32>, vector<256x256xf32> -> vector<256x256xf32>
    %c0_7 = arith.constant 0 : index
    %c0_8 = arith.constant 0 : index
    %8 = vector.load %arg4[%c0_7, %c0_8] : memref<256x256xf32, #tpu.memory_space<vmem>>, vector<256x256xf32>
    tpu.vector_store %arg4[%c0_7, %c0_8], %7 {strides = array<i32>} : memref<256x256xf32, #tpu.memory_space<vmem>>, vector<256x256xf32>,
    return
  }
  func.func @transform_0(%arg0: i32) -> (i32, i32) {
    %c0_i32 = arith.constant 0 : i32
    %c0_i32_0 = arith.constant 0 : i32
    return %arg0, %c0_i32 : i32, i32
  }
  func.func @transform_1(%arg0: i32) -> (i32, i32) {
    %c0_i32 = arith.constant 0 : i32
    %c0_i32_0 = arith.constant 0 : i32
    %c0_i32_1 = arith.constant 0 : i32
    return %c0_i32, %c0_i32_0 : i32, i32
  }
  func.func @transform_2(%arg0: i32) -> (i32, i32) {
    %c0_i32 = arith.constant 0 : i32
    %c0_i32_0 = arith.constant 0 : i32
    %c0_i32_1 = arith.constant 0 : i32
    return %c0_i32, %c0_i32_0 : i32, i32
  }
  func.func @transform_3(%arg0: i32) -> (i32, i32) {
    %c0_i32 = arith.constant 0 : i32
    %c0_i32_0 = arith.constant 0 : i32
    return %arg0, %c0_i32 : i32, i32
  }
}

</mosaic_0001>

<bundles_post_ra>
// kernel: tpu_custom_call.1
= control target key start
LH: loop header
LB: loop body
LE: loop exit
PB: predicated region body
PF: predicated region fallthrough
CT: control target
= control target key end

     0   :  { %8 = vsyncpa [#allocation3], 0  ;;  %s4704_s0 = inlined_call_operand.hbm [shape: f32[256,256], index: 0, kind: input, shape index: {}]   ;;  %s4705_s1 = inlined_call_operand.hbm [shape: f32[256,1024], index: 1, kind: input, shape index: {}]   ;;  %s4706_s2 = inlined_call_operand.hbm [shape: f32[1024,256], index: 2, kind: input, shape index: {}]   ;;  %s4707_s3 = inlined_call_operand.hbm [shape: f32[256,256], index: 3, kind: output, shape index: {}]  }
   0x1   :  { %9 = vsyncpa [#allocation6], 0 }
   0x2   :  { %10 = vsyncpa [#allocation4], 0  ;;  %s4167_s12 = smov [#allocation5]   ;;  %s4073_s16 = scalar_lea.hbm %s4705_s1, 32768 }
   0x3   :  { %s28_s13 = sshll.u32 %s4167_s12, 4  ;;  %p4074_p0 = scmp.ne.s32.totalorder %s4705_s1, %s4073_s16  ;;  %s29_s13 = int_to_ptr.vmem [resolvable:$true] %s28_s13 }
   0x4   :  { %p4077_p1 = scmp.lt.u32.totalorder %s4073_s16, %s4705_s1 }
   0x6   :  { %p4079_p2 = pnand %p4077_p1, %p4074_p0 }
   0x8   :  { %4082 = shalt.err (!%p4079_p2)
}
   0x9   :  { %s4083_s21 = scalar_lea.vmem %s29_s13, 32768  ;;  %p4088_p4 = scmp.lt.s32.totalorder %s29_s13, %s29_s13 }
   0xa   :  { %p4084_p3 = scmp.ne.s32.totalorder %s29_s13, %s4083_s21  ;;  %p4089_p5 = scmp.lt.s32.totalorder %s4083_s21, %s4083_s21 }
   0xc   :  { %p4090_p6 = por %p4089_p5, %p4088_p4 }
   0xe   :  { %p4091_p7 = pnand %p4090_p6, %p4084_p3 }
  0x10   :  { %4094 = shalt.err (!%p4091_p7)
}
  0x11   :  { %s4168_s22 = smov 1024   ;;  %s4169_s23 = smov 64  }
  0x12   :  { %34 = dma.hbm_to_vmem [thread:$0]  %s4705_s1, 32768, %s29_s13, [#allocation6], %s4168_s22, %s4168_s22, %s4169_s23  }
  0x13   :  { %s4170_s26 = smov [#allocation2]   ;;  %s4095_s30 = scalar_lea.hbm %s4704_s0, 8192 }
  0x14   :  { %s16_s27 = sshll.u32 %s4170_s26, 4  ;;  %p4096_p8 = scmp.ne.s32.totalorder %s4704_s0, %s4095_s30  ;;  %s17_s27 = int_to_ptr.vmem [resolvable:$true] %s16_s27 }
  0x15   :  { %p4099_p9 = scmp.lt.u32.totalorder %s4095_s30, %s4704_s0 }
  0x17   :  { %p4101_p10 = pnand %p4099_p9, %p4096_p8 }
  0x19   :  { %4104 = shalt.err (!%p4101_p10)
}
  0x1a   :  { %s4105_s8 = scalar_lea.vmem %s17_s27, 8192  ;;  %p4110_p12 = scmp.lt.s32.totalorder %s17_s27, %s17_s27 }
  0x1b   :  { %p4106_p11 = scmp.ne.s32.totalorder %s17_s27, %s4105_s8  ;;  %p4111_p13 = scmp.lt.s32.totalorder %s4105_s8, %s4105_s8 }
  0x1d   :  { %p4112_p0 = por %p4111_p13, %p4110_p12 }
  0x1f   :  { %p4113_p1 = pnand %p4112_p0, %p4106_p11 }
  0x21   :  { %4116 = shalt.err (!%p4113_p1)
}
  0x22   :  { %s4171_s1 = smov 256   ;;  %s4172_s9 = smov 16  }
  0x23   :  { %22 = dma.hbm_to_vmem [thread:$0]  %s4704_s0, 8192, %s17_s27, [#allocation3], %s4171_s1, %s4171_s1, %s4172_s9  }
  0x24   :  { %s4173_s12 = smov [#allocation7]   ;;  %s4117_s16 = scalar_lea.hbm %s4706_s2, 32768 }
  0x25   :  { %s40_s13 = sshll.u32 %s4173_s12, 4  ;;  %p4118_p2 = scmp.ne.s32.totalorder %s4706_s2, %s4117_s16  ;;  %s41_s13 = int_to_ptr.vmem [resolvable:$true] %s40_s13 }
  0x26   :  { %p4121_p3 = scmp.lt.u32.totalorder %s4117_s16, %s4706_s2 }
  0x28   :  { %p4123_p4 = pnand %p4121_p3, %p4118_p2 }
  0x2a   :  { %4126 = shalt.err (!%p4123_p4)
}
  0x2b   :  { %s4127_s21 = scalar_lea.vmem %s41_s13, 32768  ;;  %p4132_p6 = scmp.lt.s32.totalorder %s41_s13, %s41_s13 }
  0x2c   :  { %p4128_p5 = scmp.ne.s32.totalorder %s41_s13, %s4127_s21  ;;  %p4133_p7 = scmp.lt.s32.totalorder %s4127_s21, %s4127_s21 }
  0x2e   :  { %p4134_p8 = por %p4133_p7, %p4132_p6 }
  0x30   :  { %p4135_p9 = pnand %p4134_p8, %p4128_p5 }
  0x32   :  { %4138 = shalt.err (!%p4135_p9)
}
  0x33   :  { %46 = dma.hbm_to_vmem [thread:$0]  %s4706_s2, 32768, %s41_s13, [#allocation6], %s4171_s1, %s4171_s1, %s4172_s9  }
  0x34   :  { %4161 = dma.done.wait [#allocation3], 8192  }
  0x35   :  { %4162 = vsyncadd [#allocation3], 4294959104 }
  0x36   :  { %4163 = dma.done.wait [#allocation6], 65536  }
  0x37   :  { %4164 = vsyncadd [#allocation6], 4294901760  ;;  %v121_v0 = vld [vmem:[#allocation5 + $0x8] sm:$0xff]  ;;  %v120_v2 = vld [vmem:[#allocation5] sm:$0xff]  ;;  %s4174_s2 = smov [#allocation8]  }
  0x38   :  { %v129_v1 = vld [vmem:[#allocation5 + $0x48] sm:$0xff]  ;;  %v128_v4 = vld [vmem:[#allocation5 + $0x40] sm:$0xff]  ;;  %s3269_s23 = sshll.u32 %s4174_s2, 4  ;;  %s3270_s23 = int_to_ptr.vmem [resolvable:$true] %s3269_s23 }
  0x39   :  { %v3282_v3 = vpack.c.bf16 %v129_v1, %v121_v0  ;;  %v137_v5 = vld [vmem:[#allocation5 + $0x88] sm:$0xff]  ;;  %v3284_v7 = vpack.c.bf16 %v128_v4, %v120_v2  ;;  %v136_v9 = vld [vmem:[#allocation5 + $0x80] sm:$0xff]  ;;  %s4139_s24 = scalar_lea.vmem %s3270_s23, 8192  ;;  %p4144_p11 = scmp.lt.s32.totalorder %s3270_s23, %s3270_s23 }
  0x3a   :  { %v145_v6 = vld [vmem:[#allocation5 + $0xc8] sm:$0xff]  ;;  %v144_v10 = vld [vmem:[#allocation5 + $0xc0] sm:$0xff]  ;;  %p4140_p10 = scmp.ne.s32.totalorder %s3270_s23, %s4139_s24  ;;  %p4145_p12 = scmp.lt.s32.totalorder %s4139_s24, %s4139_s24 }
  0x3b   :  { %v3286_v8 = vpack.c.bf16 %v145_v6, %v137_v5  ;;  %v153_v11 = vld [vmem:[#allocation5 + $0x108] sm:$0xff]  ;;  %3283 = vmatprep.subr.bf16.mxu1 %v3282_v3  ;;  %v3288_v13 = vpack.c.bf16 %v144_v10, %v136_v9  ;;  %v152_v15 = vld [vmem:[#allocation5 + $0x100] sm:$0xff] }
  0x3c   :  { %v161_v12 = vld [vmem:[#allocation5 + $0x148] sm:$0xff]  ;;  %3285 = vmatpush1.bf16.msra.mxu1 %v3284_v7  ;;  %v160_v16 = vld [vmem:[#allocation5 + $0x140] sm:$0xff]  ;;  %p4146_p13 = por %p4145_p12, %p4144_p11 }
  0x3d   :  { %3287 = vmatprep.subr.bf16.mxu1 %v3286_v8  ;;  %v3290_v14 = vpack.c.bf16 %v161_v12, %v153_v11  ;;  %v169_v17 = vld [vmem:[#allocation5 + $0x188] sm:$0xff]  ;;  %v3292_v19 = vpack.c.bf16 %v160_v16, %v152_v15  ;;  %v168_v21 = vld [vmem:[#allocation5 + $0x180] sm:$0xff] }
  0x3e   :  { %v177_v18 = vld [vmem:[#allocation5 + $0x1c8] sm:$0xff]  ;;  %v176_v22 = vld [vmem:[#allocation5 + $0x1c0] sm:$0xff]  ;;  %p4147_p0 = pnand %p4146_p13, %p4140_p10 }
  0x3f   :  { %v3294_v20 = vpack.c.bf16 %v177_v18, %v169_v17  ;;  %v185_v23 = vld [vmem:[#allocation5 + $0x208] sm:$0xff]  ;;  %v3296_v25 = vpack.c.bf16 %v176_v22, %v168_v21  ;;  %v184_v27 = vld [vmem:[#allocation5 + $0x200] sm:$0xff] }
  0x40   :  { %3289 = vmatpush1.bf16.msra.mxu1 %v3288_v13  ;;  %v193_v24 = vld [vmem:[#allocation5 + $0x248] sm:$0xff]  ;;  %v192_v28 = vld [vmem:[#allocation5 + $0x240] sm:$0xff] }
  0x41   :  { %3291 = vmatprep.subr.bf16.mxu1 %v3290_v14  ;;  %v3298_v26 = vpack.c.bf16 %v193_v24, %v185_v23  ;;  %v201_v29 = vld [vmem:[#allocation5 + $0x288] sm:$0xff]  ;;  %v3300_v31 = vpack.c.bf16 %v192_v28, %v184_v27  ;;  %v200_v33 = vld [vmem:[#allocation5 + $0x280] sm:$0xff] }
  0x42   :  { %v209_v30 = vld [vmem:[#allocation5 + $0x2c8] sm:$0xff]  ;;  %v208_v34 = vld [vmem:[#allocation5 + $0x2c0] sm:$0xff] }
  0x43   :  { %v3302_v32 = vpack.c.bf16 %v209_v30, %v201_v29  ;;  %v217_v35 = vld [vmem:[#allocation5 + $0x308] sm:$0xff]  ;;  %v3304_v37 = vpack.c.bf16 %v208_v34, %v200_v33  ;;  %v216_v39 = vld [vmem:[#allocation5 + $0x300] sm:$0xff]  ;;  %v131_v33 = vld [vmem:[#allocation5 + $0x58] sm:$0xff] }
  0x44   :  { %3293 = vmatpush1.bf16.msra.mxu1 %v3292_v19  ;;  %v225_v36 = vld [vmem:[#allocation5 + $0x348] sm:$0xff]  ;;  %v224_v40 = vld [vmem:[#allocation5 + $0x340] sm:$0xff] }
  0x45   :  { %3295 = vmatprep.subr.bf16.mxu1 %v3294_v20  ;;  %v3306_v38 = vpack.c.bf16 %v225_v36, %v217_v35  ;;  %v4237_v41 = vld [vmem:[#allocation2 + $0x8] sm:$0xff]  ;;  %v3308_v44 = vpack.c.bf16 %v224_v40, %v216_v39  ;;  %v232_v46 = vld [vmem:[#allocation5 + $0x380] sm:$0xff]  ;;  %v122_v36 = vld [vmem:[#allocation5 + $0x10] sm:$0xff] }
  0x46   :  { %v233_v42 = vld [vmem:[#allocation5 + $0x388] sm:$0xff]  ;;  %440 = vmatprep.mubr.f32.mxu1 %v4237_v41  ;;  %v240_v47 = vld [vmem:[#allocation5 + $0x3c0] sm:$0xff]  ;;  %v147_v39 = vld [vmem:[#allocation5 + $0xd8] sm:$0xff] }
  0x47   :  { %v241_v43 = vld [vmem:[#allocation5 + $0x3c8] sm:$0xff]  ;;  %v3312_v50 = vpack.c.bf16 %v240_v47, %v232_v46  ;;  %v248_v52 = vld [vmem:[#allocation5 + $0x400] sm:$0xff]  ;;  %v146_v46 = vld [vmem:[#allocation5 + $0xd0] sm:$0xff] }
  0x48   :  { %3297 = vmatpush1.bf16.msra.mxu1 %v3296_v25  ;;  %v3310_v45 = vpack.c.bf16 %v241_v43, %v233_v42  ;;  %v249_v48 = vld [vmem:[#allocation5 + $0x408] sm:$0xff]  ;;  %v256_v53 = vld [vmem:[#allocation5 + $0x440] sm:$0xff]  ;;  %v4242_v43 = vld [vmem:[#allocation2 + $0x18] sm:$0xff] }
  0x49   :  { %3299 = vmatprep.subr.bf16.mxu1 %v3298_v26  ;;  %v257_v49 = vld [vmem:[#allocation5 + $0x448] sm:$0xff]  ;;  %v3316_v56 = vpack.c.bf16 %v256_v53, %v248_v52  ;;  %v264_v58 = vld [vmem:[#allocation5 + $0x480] sm:$0xff]  ;;  %v155_v47 = vld [vmem:[#allocation5 + $0x118] sm:$0xff] }
  0x4a   :  { %v3314_v51 = vpack.c.bf16 %v257_v49, %v249_v48  ;;  %v265_v54 = vld [vmem:[#allocation5 + $0x488] sm:$0xff]  ;;  %v272_v59 = vld [vmem:[#allocation5 + $0x4c0] sm:$0xff]  ;;  %v163_v48 = vld [vmem:[#allocation5 + $0x158] sm:$0xff] }
  0x4b   :  { %v273_v55 = vld [vmem:[#allocation5 + $0x4c8] sm:$0xff]  ;;  %v3320_v62 = vpack.c.bf16 %v272_v59, %v264_v58  ;;  %v280_v0 = vld [vmem:[#allocation5 + $0x500] sm:$0xff]  ;;  %v4246_v49 = vld [vmem:[#allocation2 + $0x10] sm:$0xff]  ;;  %v3354_v52 = vpack.c.bf16 %v163_v48, %v155_v47 }
  0x4c   :  { %3301 = vmatpush1.bf16.msra.mxu1 %v3300_v31  ;;  %v3318_v57 = vpack.c.bf16 %v273_v55, %v265_v54  ;;  %v281_v60 = vld [vmem:[#allocation5 + $0x508] sm:$0xff]  ;;  %v288_v1 = vld [vmem:[#allocation5 + $0x540] sm:$0xff]  ;;  %v154_v53 = vld [vmem:[#allocation5 + $0x110] sm:$0xff] }
  0x4d   :  { %3303 = vmatprep.subr.bf16.mxu1 %v3302_v32  ;;  %v289_v61 = vld [vmem:[#allocation5 + $0x548] sm:$0xff]  ;;  %v3324_v4 = vpack.c.bf16 %v288_v1, %v280_v0  ;;  %v296_v6 = vld [vmem:[#allocation5 + $0x580] sm:$0xff]  ;;  %v123_v32 = vld [vmem:[#allocation5 + $0x18] sm:$0xff] }
  0x4e   :  { %v3322_v63 = vpack.c.bf16 %v289_v61, %v281_v60  ;;  %v297_v2 = vld [vmem:[#allocation5 + $0x588] sm:$0xff]  ;;  %v304_v7 = vld [vmem:[#allocation5 + $0x5c0] sm:$0xff]  ;;  %v3346_v35 = vpack.c.bf16 %v131_v33, %v123_v32  ;;  %v162_v54 = vld [vmem:[#allocation5 + $0x150] sm:$0xff] }
  0x4f   :  { %v305_v3 = vld [vmem:[#allocation5 + $0x5c8] sm:$0xff]  ;;  %v3328_v10 = vpack.c.bf16 %v304_v7, %v296_v6  ;;  %v312_v12 = vld [vmem:[#allocation5 + $0x600] sm:$0xff]  ;;  %v171_v55 = vld [vmem:[#allocation5 + $0x198] sm:$0xff]  ;;  %v3356_v58 = vpack.c.bf16 %v162_v54, %v154_v53 }
  0x50   :  { %3305 = vmatpush1.bf16.msra.mxu1 %v3304_v37  ;;  %v3326_v5 = vpack.c.bf16 %v305_v3, %v297_v2  ;;  %v313_v8 = vld [vmem:[#allocation5 + $0x608] sm:$0xff]  ;;  %v320_v13 = vld [vmem:[#allocation5 + $0x640] sm:$0xff]  ;;  %v130_v37 = vld [vmem:[#allocation5 + $0x50] sm:$0xff] }
  0x51   :  { %3307 = vmatprep.subr.bf16.mxu1 %v3306_v38  ;;  %v321_v9 = vld [vmem:[#allocation5 + $0x648] sm:$0xff]  ;;  %v3332_v16 = vpack.c.bf16 %v320_v13, %v312_v12  ;;  %v328_v18 = vld [vmem:[#allocation5 + $0x680] sm:$0xff]  ;;  %v139_v38 = vld [vmem:[#allocation5 + $0x98] sm:$0xff]  ;;  %v3348_v42 = vpack.c.bf16 %v130_v37, %v122_v36 }
  0x52   :  { %v3330_v11 = vpack.c.bf16 %v321_v9, %v313_v8  ;;  %v329_v14 = vld [vmem:[#allocation5 + $0x688] sm:$0xff]  ;;  %v336_v19 = vld [vmem:[#allocation5 + $0x6c0] sm:$0xff]  ;;  %v4254_v59 = vld [vmem:[#allocation2 + $0x38] sm:$0xff] }
  0x53   :  { %v337_v15 = vld [vmem:[#allocation5 + $0x6c8] sm:$0xff]  ;;  %v3336_v22 = vpack.c.bf16 %v336_v19, %v328_v18  ;;  %v344_v24 = vld [vmem:[#allocation5 + $0x700] sm:$0xff]  ;;  %v170_v61 = vld [vmem:[#allocation5 + $0x190] sm:$0xff] }
  0x54   :  { %3309 = vmatpush1.bf16.msra.mxu1 %v3308_v44  ;;  %v3334_v17 = vpack.c.bf16 %v337_v15, %v329_v14  ;;  %v345_v20 = vld [vmem:[#allocation5 + $0x708] sm:$0xff]  ;;  %v352_v25 = vld [vmem:[#allocation5 + $0x740] sm:$0xff]  ;;  %v3350_v44 = vpack.c.bf16 %v147_v39, %v139_v38  ;;  %v195_v0 = vld [vmem:[#allocation5 + $0x258] sm:$0xff] }
  0x55   :  { %3311 = vmatprep.subr.bf16.mxu1 %v3310_v45  ;;  %v353_v21 = vld [vmem:[#allocation5 + $0x748] sm:$0xff]  ;;  %v3340_v28 = vpack.c.bf16 %v352_v25, %v344_v24  ;;  %v360_v30 = vld [vmem:[#allocation5 + $0x780] sm:$0xff]  ;;  %v138_v45 = vld [vmem:[#allocation5 + $0x90] sm:$0xff] }
  0x56   :  { %v3338_v23 = vpack.c.bf16 %v353_v21, %v345_v20  ;;  %v361_v26 = vld [vmem:[#allocation5 + $0x788] sm:$0xff]  ;;  %v368_v31 = vld [vmem:[#allocation5 + $0x7c0] sm:$0xff]  ;;  %v4258_v1 = vld [vmem:[#allocation2 + $0x30] sm:$0xff] }
  0x57   :  { %v369_v27 = vld [vmem:[#allocation5 + $0x7c8] sm:$0xff]  ;;  %v3344_v34 = vpack.c.bf16 %v368_v31, %v360_v30  ;;  %v4240_v40 = vld [vmem:[#allocation2] sm:$0xff]  ;;  %v194_v6 = vld [vmem:[#allocation5 + $0x250] sm:$0xff] }
  0x58   :  { %3313 = vmatpush1.bf16.msra.mxu1 %v3312_v50  ;;  %v3342_v29 = vpack.c.bf16 %v369_v27, %v361_v26  ;;  %v3352_v50 = vpack.c.bf16 %v146_v46, %v138_v45  ;;  %v4260_v3 = vld [vmem:[#allocation2 + $0x48] sm:$0xff]  ;;  %v203_v7 = vld [vmem:[#allocation5 + $0x298] sm:$0xff]  ;;  %v4264_v9 = vld [vmem:[#allocation2 + $0x40] sm:$0xff] }
  0x59   :  { %3315 = vmatprep.subr.bf16.mxu1 %v3314_v51  ;;  %v4248_v51 = vld [vmem:[#allocation2 + $0x28] sm:$0xff]  ;;  %v211_v8 = vld [vmem:[#allocation5 + $0x2d8] sm:$0xff]  ;;  %v202_v13 = vld [vmem:[#allocation5 + $0x290] sm:$0xff] }
  0x5a   :  { %v3366_v12 = vpack.c.bf16 %v211_v8, %v203_v7  ;;  %v210_v14 = vld [vmem:[#allocation5 + $0x2d0] sm:$0xff]  ;;  %v219_v15 = vld [vmem:[#allocation5 + $0x318] sm:$0xff]  ;;  %v4272_v19 = vld [vmem:[#allocation2 + $0x68] sm:$0xff] }
  0x5b   :  { %v3368_v18 = vpack.c.bf16 %v210_v14, %v202_v13  ;;  %v218_v21 = vld [vmem:[#allocation5 + $0x310] sm:$0xff]  ;;  %v243_v24 = vld [vmem:[#allocation5 + $0x3d8] sm:$0xff]  ;;  %v4276_v25 = vld [vmem:[#allocation2 + $0x60] sm:$0xff] }
  0x5c   :  { %3317 = vmatpush1.bf16.msra.mxu1 %v3316_v56  ;;  %v179_v56 = vld [vmem:[#allocation5 + $0x1d8] sm:$0xff]  ;;  %v242_v30 = vld [vmem:[#allocation5 + $0x3d0] sm:$0xff]  ;;  %v1917_v33 = vld [vmem:[#allocation7 + $0x8] sm:$0xff] }
  0x5d   :  { %3319 = vmatprep.subr.bf16.mxu1 %v3318_v57  ;;  %v4252_v57 = vld [vmem:[#allocation2 + $0x20] sm:$0xff]  ;;  %v3358_v60 = vpack.c.bf16 %v179_v56, %v171_v55  ;;  %v4278_v26 = vld [vmem:[#allocation2 + $0x78] sm:$0xff]  ;;  %v4284_v37 = vld [vmem:[#allocation2 + $0x88] sm:$0xff] }
  0x5e   :  { %v251_v31 = vld [vmem:[#allocation5 + $0x418] sm:$0xff]  ;;  %v1916_v39 = vld [vmem:[#allocation7] sm:$0xff]  ;;  %v250_v45 = vld [vmem:[#allocation5 + $0x410] sm:$0xff] }
  0x5f   :  { %v259_v32 = vld [vmem:[#allocation5 + $0x458] sm:$0xff]  ;;  %v258_v46 = vld [vmem:[#allocation5 + $0x450] sm:$0xff]  ;;  %v1920_v55 = vld [vmem:[#allocation7 + $0x20] sm:$0xff] }
  0x60   :  { %3321 = vmatpush1.bf16.msra.mxu1 %v3320_v62  ;;  %v178_v62 = vld [vmem:[#allocation5 + $0x1d0] sm:$0xff]  ;;  %v267_v47 = vld [vmem:[#allocation5 + $0x498] sm:$0xff]  ;;  %v1924_v14 = vld [vmem:[#allocation7 + $0x40] sm:$0xff] }
  0x61   :  { %3323 = vmatprep.subr.bf16.mxu1 %v3322_v63  ;;  %v187_v63 = vld [vmem:[#allocation5 + $0x218] sm:$0xff]  ;;  %v3360_v2 = vpack.c.bf16 %v178_v62, %v170_v61  ;;  %v1922_v56 = vld [vmem:[#allocation7 + $0x30] sm:$0xff]  ;;  %v3380_v61 = vpack.c.bf16 %v258_v46, %v250_v45  ;;  %v1933_v45 = vld [vmem:[#allocation7 + $0x88] sm:$0xff] }
  0x62   :  { %v1923_v53 = vld [vmem:[#allocation7 + $0x38] sm:$0xff]  ;;  %v3544_v62 = vpack.c.bf16 %v1922_v56, %v1920_v55  ;;  %v4293_v8 = vld [vmem:[#allocation2 + $0x90] sm:$0xff] }
  0x63   :  { %v1927_v7 = vld [vmem:[#allocation7 + $0x58] sm:$0xff]  ;;  %v314_v56 = vld [vmem:[#allocation5 + $0x610] sm:$0xff] }
  0x64   :  { %3325 = vmatpush1.bf16.msra.mxu1 %v3324_v4  ;;  %v3362_v4 = vpack.c.bf16 %v195_v0, %v187_v63  ;;  %v266_v0 = vld [vmem:[#allocation5 + $0x490] sm:$0xff]  ;;  %v1935_v46 = vld [vmem:[#allocation7 + $0x98] sm:$0xff] }
  0x65   :  { %3327 = vmatprep.subr.bf16.mxu1 %v3326_v5  ;;  %v186_v5 = vld [vmem:[#allocation5 + $0x210] sm:$0xff] }
  0x68   :  { %3329 = vmatpush1.bf16.msra.mxu1 %v3328_v10  ;;  %v3364_v10 = vpack.c.bf16 %v194_v6, %v186_v5  ;;  %v291_v5 = vld [vmem:[#allocation5 + $0x558] sm:$0xff]  ;;  %v1925_v6 = vld [vmem:[#allocation7 + $0x48] sm:$0xff] }
  0x69   :  { %3331 = vmatprep.subr.bf16.mxu1 %v3330_v11  ;;  %v4266_v11 = vld [vmem:[#allocation2 + $0x58] sm:$0xff] }
  0x6c   :  { %3333 = vmatpush1.bf16.msra.mxu1 %v3332_v16  ;;  %v227_v16 = vld [vmem:[#allocation5 + $0x358] sm:$0xff] }
  0x6d   :  { %3335 = vmatprep.subr.bf16.mxu1 %v3334_v17  ;;  %v4270_v17 = vld [vmem:[#allocation2 + $0x50] sm:$0xff]  ;;  %v3370_v20 = vpack.c.bf16 %v227_v16, %v219_v15 }
  0x6e   :  { %v1926_v15 = vld [vmem:[#allocation7 + $0x50] sm:$0xff] }
  0x70   :  { %3337 = vmatpush1.bf16.msra.mxu1 %v3336_v22  ;;  %v226_v22 = vld [vmem:[#allocation5 + $0x350] sm:$0xff] }
  0x71   :  { %3339 = vmatprep.subr.bf16.mxu1 %v3338_v23  ;;  %v235_v23 = vld [vmem:[#allocation5 + $0x398] sm:$0xff]  ;;  %v3372_v27 = vpack.c.bf16 %v226_v22, %v218_v21  ;;  %v3548_v22 = vpack.c.bf16 %v1926_v15, %v1924_v14 }
  0x72   :  { %v299_v21 = vld [vmem:[#allocation5 + $0x598] sm:$0xff] }
  0x74   :  { %3341 = vmatpush1.bf16.msra.mxu1 %v3340_v28  ;;  %v3374_v28 = vpack.c.bf16 %v243_v24, %v235_v23  ;;  %v307_v23 = vld [vmem:[#allocation5 + $0x5d8] sm:$0xff]  ;;  %v1929_v24 = vld [vmem:[#allocation7 + $0x68] sm:$0xff] }
  0x75   :  { %3343 = vmatprep.subr.bf16.mxu1 %v3342_v29  ;;  %v234_v29 = vld [vmem:[#allocation5 + $0x390] sm:$0xff] }
  0x76   :  { %v3376_v38 = vpack.c.bf16 %v242_v30, %v234_v29  ;;  %v1928_v29 = vld [vmem:[#allocation7 + $0x60] sm:$0xff]  ;;  %v1930_v30 = vld [vmem:[#allocation7 + $0x70] sm:$0xff] }
  0x78   :  { %3345 = vmatpush1.bf16.msra.mxu1 %v3344_v34  ;;  %v1919_v34 = vld [vmem:[#allocation7 + $0x18] sm:$0xff] }
  0x79   :  { %3347 = vmatprep.subr.bf16.mxu1 %v3346_v35  ;;  %v4281_v35 = vld [vmem:[#allocation2 + $0x70] sm:$0xff]  ;;  %v3538_v36 = vpack.c.bf16 %v1919_v34, %v1917_v33  ;;  %v3552_v34 = vpack.c.bf16 %v1930_v30, %v1928_v29  ;;  %v4320_v29 = vld [vmem:[#allocation2 + $0xe8] sm:$0xff] }
  0x7b   :  { %441 = vmatmul.mubr.f32.vlgmr.msra.gmra.mrb[0].mxu1 %v4240_v40  ;;  %3539 = vmatprep.subr.bf16.mxu0 %v3538_v36  ;;  %v3390_v36 = vpack.c.bf16 %v307_v23, %v299_v21  ;;  %v347_v21 = vld [vmem:[#allocation5 + $0x718] sm:$0xff]  ;;  %v1941_v23 = vld [vmem:[#allocation7 + $0xc8] sm:$0xff] }
  0x7c   :  { %3349 = vmatpush1.bf16.msra.mxu1 %v3348_v42  ;;  %446 = vmatprep.mubr.f32.mxu1 %v4242_v43  ;;  %v1918_v42 = vld [vmem:[#allocation7 + $0x10] sm:$0xff] }
  0x7d   :  { %3351 = vmatprep.subr.bf16.mxu1 %v3350_v44  ;;  %v3378_v44 = vpack.c.bf16 %v259_v32, %v251_v31  ;;  %v3540_v48 = vpack.c.bf16 %v1918_v42, %v1916_v39  ;;  %v4300_v31 = vld [vmem:[#allocation2 + $0xa0] sm:$0xff]  ;;  %v4302_v32 = vld [vmem:[#allocation2 + $0xb8] sm:$0xff]  ;;  %v306_v39 = vld [vmem:[#allocation5 + $0x5d0] sm:$0xff] }
  0x7e   :  { %v315_v42 = vld [vmem:[#allocation5 + $0x618] sm:$0xff] }
  0x7f   :  { %447 = vmatmul.mubr.f32.gmra.mrb[2].mxu1 %v4246_v49  ;;  %3541 = vmatpush1.bf16.msra.mxu0 %v3540_v48  ;;  %v3554_v48 = vpack.c.bf16 %v1935_v46, %v1933_v45  ;;  %v371_v45 = vld [vmem:[#allocation5 + $0x7d8] sm:$0xff]  ;;  %v1945_v46 = vld [vmem:[#allocation7 + $0xe8] sm:$0xff] }
  0x80   :  { %452 = vmatprep.mubr.f32.mxu1 %v4248_v51  ;;  %3353 = vmatpush1.bf16.msra.mxu1 %v3352_v50  ;;  %v275_v50 = vld [vmem:[#allocation5 + $0x4d8] sm:$0xff] }
  0x81   :  { %3355 = vmatprep.subr.bf16.mxu1 %v3354_v52  ;;  %v1921_v52 = vld [vmem:[#allocation7 + $0x28] sm:$0xff]  ;;  %v3382_v63 = vpack.c.bf16 %v275_v50, %v267_v47  ;;  %v4305_v47 = vld [vmem:[#allocation2 + $0xb0] sm:$0xff] }
  0x82   :  { %v3542_v54 = vpack.c.bf16 %v1923_v53, %v1921_v52  ;;  %v4308_v50 = vld [vmem:[#allocation2 + $0xc8] sm:$0xff]  ;;  %v1932_v53 = vld [vmem:[#allocation7 + $0x80] sm:$0xff] }
  0x83   :  { %453 = vmatmul.mubr.f32.gmra.mrb[4].mxu1 %v4252_v57 }
  0x84   :  { %458 = vmatprep.mubr.f32.mxu1 %v4254_v59  ;;  %3357 = vmatpush1.bf16.msra.mxu1 %v3356_v58  ;;  %v4288_v58 = vld [vmem:[#allocation2 + $0x80] sm:$0xff] }
  0x85   :  { %3359 = vmatprep.subr.bf16.mxu1 %v3358_v60  ;;  %v4290_v60 = vld [vmem:[#allocation2 + $0x98] sm:$0xff]  ;;  %3543 = vmatprep.subr.bf16.mxu0 %v3542_v54  ;;  %v1934_v54 = vld [vmem:[#allocation7 + $0x90] sm:$0xff] }
  0x86   :  { %3545 = vmatpush1.bf16.msra.mxu0 %v3544_v62  ;;  %v331_v62 = vld [vmem:[#allocation5 + $0x698] sm:$0xff] }
  0x87   :  { %459 = vmatmul.mubr.f32.gmra.mrb[6].mxu1 %v4258_v1 }
  0x88   :  { %464 = vmatprep.mubr.f32.mxu1 %v4260_v3  ;;  %3361 = vmatpush1.bf16.msra.mxu1 %v3360_v2  ;;  %v274_v2 = vld [vmem:[#allocation5 + $0x4d0] sm:$0xff] }
  0x89   :  { %3363 = vmatprep.subr.bf16.mxu1 %v3362_v4  ;;  %v283_v4 = vld [vmem:[#allocation5 + $0x518] sm:$0xff]  ;;  %v3384_v13 = vpack.c.bf16 %v274_v2, %v266_v0  ;;  %v1937_v2 = vld [vmem:[#allocation7 + $0xa8] sm:$0xff] }
  0x8a   :  { %v3386_v16 = vpack.c.bf16 %v291_v5, %v283_v4  ;;  %v339_v0 = vld [vmem:[#allocation5 + $0x6d8] sm:$0xff] }
  0x8b   :  { %465 = vmatmul.mubr.f32.gmra.mrb[8].mxu1 %v4264_v9  ;;  %v1939_v4 = vld [vmem:[#allocation7 + $0xb8] sm:$0xff] }
  0x8c   :  { %470 = vmatprep.mubr.f32.mxu1 %v4266_v11  ;;  %3365 = vmatpush1.bf16.msra.mxu1 %v3364_v10  ;;  %v3546_v10 = vpack.c.bf16 %v1927_v7, %v1925_v6  ;;  %v3558_v5 = vpack.c.bf16 %v1939_v4, %v1937_v2  ;;  %v1936_v6 = vld [vmem:[#allocation7 + $0xa0] sm:$0xff]  ;;  %v1938_v7 = vld [vmem:[#allocation7 + $0xb0] sm:$0xff]  ;;  %v125_v4 = vld [vmem:[#allocation5 + $0x28] sm:$0xff] }
  0x8d   :  { %3367 = vmatprep.subr.bf16.mxu1 %v3366_v12  ;;  %v4296_v12 = vld [vmem:[#allocation2 + $0xa8] sm:$0xff]  ;;  %v3560_v15 = vpack.c.bf16 %v1938_v7, %v1936_v6  ;;  %v370_v2 = vld [vmem:[#allocation5 + $0x7d0] sm:$0xff]  ;;  %v1951_v7 = vld [vmem:[#allocation7 + $0x118] sm:$0xff] }
  0x8e   :  { %3547 = vmatprep.subr.bf16.mxu0 %v3546_v10  ;;  %v4312_v10 = vld [vmem:[#allocation2 + $0xc0] sm:$0xff]  ;;  %v1949_v6 = vld [vmem:[#allocation7 + $0x108] sm:$0xff] }
  0x8f   :  { %471 = vmatmul.mubr.f32.gmra.mrb[10].mxu1 %v4270_v17  ;;  %3549 = vmatpush1.bf16.msra.mxu0 %v3548_v22  ;;  %v355_v22 = vld [vmem:[#allocation5 + $0x758] sm:$0xff] }
  0x90   :  { %476 = vmatprep.mubr.f32.mxu1 %v4272_v19  ;;  %3369 = vmatpush1.bf16.msra.mxu1 %v3368_v18  ;;  %v282_v18 = vld [vmem:[#allocation5 + $0x510] sm:$0xff] }
  0x91   :  { %3371 = vmatprep.subr.bf16.mxu1 %v3370_v20  ;;  %v290_v20 = vld [vmem:[#allocation5 + $0x550] sm:$0xff] }
  0x92   :  { %v3388_v33 = vpack.c.bf16 %v290_v20, %v282_v18  ;;  %v330_v18 = vld [vmem:[#allocation5 + $0x690] sm:$0xff] }
  0x93   :  { %477 = vmatmul.mubr.f32.gmra.mrb[12].mxu1 %v4276_v25  ;;  %v338_v20 = vld [vmem:[#allocation5 + $0x6d0] sm:$0xff] }
  0x94   :  { %482 = vmatprep.mubr.f32.mxu1 %v4278_v26  ;;  %3373 = vmatpush1.bf16.msra.mxu1 %v3372_v27  ;;  %v1931_v27 = vld [vmem:[#allocation7 + $0x78] sm:$0xff]  ;;  %v3400_v30 = vpack.c.bf16 %v338_v20, %v330_v18  ;;  %v1948_v18 = vld [vmem:[#allocation7 + $0x100] sm:$0xff]  ;;  %v1950_v20 = vld [vmem:[#allocation7 + $0x110] sm:$0xff] }
  0x95   :  { %3375 = vmatprep.subr.bf16.mxu1 %v3374_v28  ;;  %v3550_v28 = vpack.c.bf16 %v1931_v27, %v1929_v24  ;;  %v1943_v24 = vld [vmem:[#allocation7 + $0xd8] sm:$0xff]  ;;  %v4317_v27 = vld [vmem:[#allocation2 + $0xd0] sm:$0xff] }
  0x97   :  { %483 = vmatmul.mubr.f32.gmra.mrb[14].mxu1 %v4281_v35  ;;  %3551 = vmatprep.subr.bf16.mxu0 %v3550_v28  ;;  %v3562_v28 = vpack.c.bf16 %v1943_v24, %v1941_v23  ;;  %v3572_v23 = vpack.c.bf16 %v1950_v20, %v1948_v18  ;;  %v1953_v24 = vld [vmem:[#allocation7 + $0x128] sm:$0xff]  ;;  %v4354_v18 = vld [vmem:[#allocation2 + $0x130] sm:$0xff]  ;;  %v1964_v20 = vld [vmem:[#allocation7 + $0x180] sm:$0xff] }
  0x98   :  { %488 = vmatprep.mubr.f32.mxu1 %v4284_v37  ;;  %3377 = vmatpush1.bf16.msra.mxu1 %v3376_v38  ;;  %v298_v38 = vld [vmem:[#allocation5 + $0x590] sm:$0xff] }
  0x99   :  { %3379 = vmatprep.subr.bf16.mxu1 %v3378_v44  ;;  %v323_v44 = vld [vmem:[#allocation5 + $0x658] sm:$0xff]  ;;  %3553 = vmatpush1.bf16.msra.mxu0 %v3552_v34  ;;  %v3392_v52 = vpack.c.bf16 %v306_v39, %v298_v38  ;;  %v1942_v34 = vld [vmem:[#allocation7 + $0xd0] sm:$0xff] }
  0x9a   :  { %v3394_v55 = vpack.c.bf16 %v323_v44, %v315_v42  ;;  %3555 = vmatprep.subr.bf16.mxu0 %v3554_v48  ;;  %v346_v38 = vld [vmem:[#allocation5 + $0x710] sm:$0xff]  ;;  %v363_v42 = vld [vmem:[#allocation5 + $0x798] sm:$0xff] }
  0x9b   :  { %489 = vmatmul.mubr.f32.gmra.mrb[16].mxu1 %v4288_v58  ;;  %v354_v39 = vld [vmem:[#allocation5 + $0x750] sm:$0xff]  ;;  %v1947_v48 = vld [vmem:[#allocation7 + $0xf8] sm:$0xff] }
  0x9c   :  { %494 = vmatprep.mubr.f32.mxu1 %v4290_v60  ;;  %3381 = vmatpush1.bf16.msra.mxu1 %v3380_v61  ;;  %v322_v61 = vld [vmem:[#allocation5 + $0x650] sm:$0xff] }
  0x9d   :  { %3383 = vmatprep.subr.bf16.mxu1 %v3382_v63  ;;  %v3556_v63 = vpack.c.bf16 %v1934_v54, %v1932_v53  ;;  %v3396_v14 = vpack.c.bf16 %v322_v61, %v314_v56  ;;  %v1944_v53 = vld [vmem:[#allocation7 + $0xe0] sm:$0xff]  ;;  %v1946_v54 = vld [vmem:[#allocation7 + $0xf0] sm:$0xff]  ;;  %v4326_v56 = vld [vmem:[#allocation2 + $0xf8] sm:$0xff]  ;;  %v3404_v61 = vpack.c.bf16 %v354_v39, %v346_v38 }
  0x9e   :  { %v4338_v39 = vld [vmem:[#allocation2 + $0x118] sm:$0xff] }
  0x9f   :  { %495 = vmatmul.mubr.f32.gmra.mrb[18].mxu1 %v4293_v8  ;;  %3557 = vmatpush1.bf16.msra.mxu0 %v3556_v63  ;;  %v3406_v63 = vpack.c.bf16 %v371_v45, %v363_v42  ;;  %v1957_v42 = vld [vmem:[#allocation7 + $0x148] sm:$0xff] }
  0xa0   :  { %500 = vmatprep.mubr.f32.mxu1 %v4296_v12  ;;  %3385 = vmatpush1.bf16.msra.mxu1 %v3384_v13  ;;  %v4314_v13 = vld [vmem:[#allocation2 + $0xd8] sm:$0xff] }
  0xa1   :  { %3387 = vmatprep.subr.bf16.mxu1 %v3386_v16  ;;  %v3398_v16 = vpack.c.bf16 %v339_v0, %v331_v62  ;;  %3559 = vmatprep.subr.bf16.mxu0 %v3558_v5  ;;  %v3568_v62 = vpack.c.bf16 %v1946_v54, %v1944_v53  ;;  %v362_v0 = vld [vmem:[#allocation5 + $0x790] sm:$0xff]  ;;  %v133_v5 = vld [vmem:[#allocation5 + $0x68] sm:$0xff] }
  0xa2   :  { %v4344_v53 = vld [vmem:[#allocation2 + $0x128] sm:$0xff] }
  0xa3   :  { %501 = vmatmul.mubr.f32.gmra.mrb[20].mxu1 %v4300_v31  ;;  %3561 = vmatpush1.bf16.msra.mxu0 %v3560_v15  ;;  %v4330_v15 = vld [vmem:[#allocation2 + $0xf0] sm:$0xff] }
  0xa4   :  { %506 = vmatprep.mubr.f32.mxu1 %v4302_v32  ;;  %3389 = vmatpush1.bf16.msra.mxu1 %v3388_v33  ;;  %v1940_v33 = vld [vmem:[#allocation7 + $0xc0] sm:$0xff] }
  0xa5   :  { %3391 = vmatprep.subr.bf16.mxu1 %v3390_v36  ;;  %v3402_v36 = vpack.c.bf16 %v355_v22, %v347_v21  ;;  %3563 = vmatprep.subr.bf16.mxu0 %v3562_v28  ;;  %v3564_v44 = vpack.c.bf16 %v1942_v34, %v1940_v33  ;;  %v4332_v21 = vld [vmem:[#allocation2 + $0x108] sm:$0xff]  ;;  %v3410_v22 = vpack.c.bf16 %v133_v5, %v125_v4  ;;  %v1955_v28 = vld [vmem:[#allocation7 + $0x138] sm:$0xff]  ;;  %v1952_v33 = vld [vmem:[#allocation7 + $0x120] sm:$0xff] }
  0xa6   :  { %v1954_v34 = vld [vmem:[#allocation7 + $0x130] sm:$0xff]  ;;  %v4348_v4 = vld [vmem:[#allocation2 + $0x120] sm:$0xff] }
  0xa7   :  { %507 = vmatmul.mubr.f32.gmra.mrb[22].mxu1 %v4305_v47  ;;  %3565 = vmatpush1.bf16.msra.mxu0 %v3564_v44  ;;  %v3576_v38 = vpack.c.bf16 %v1954_v34, %v1952_v33  ;;  %v1959_v44 = vld [vmem:[#allocation7 + $0x158] sm:$0xff]  ;;  %v1968_v34 = vld [vmem:[#allocation7 + $0x1a0] sm:$0xff] }
  0xa8   :  { %512 = vmatprep.mubr.f32.mxu1 %v4308_v50  ;;  %3393 = vmatpush1.bf16.msra.mxu1 %v3392_v52  ;;  %v3566_v52 = vpack.c.bf16 %v1947_v48, %v1945_v46  ;;  %v3578_v45 = vpack.c.bf16 %v1959_v44, %v1957_v42  ;;  %v4342_v46 = vld [vmem:[#allocation2 + $0x110] sm:$0xff]  ;;  %v1956_v48 = vld [vmem:[#allocation7 + $0x140] sm:$0xff] }
  0xa9   :  { %3395 = vmatprep.subr.bf16.mxu1 %v3394_v55  ;;  %v4324_v55 = vld [vmem:[#allocation2 + $0xe0] sm:$0xff] }
  0xaa   :  { %3567 = vmatprep.subr.bf16.mxu0 %v3566_v52  ;;  %v1958_v52 = vld [vmem:[#allocation7 + $0x150] sm:$0xff]  ;;  %v4360_v42 = vld [vmem:[#allocation2 + $0x140] sm:$0xff] }
  0xab   :  { %513 = vmatmul.mubr.f32.gmra.mrb[24].mxu1 %v4312_v10  ;;  %3569 = vmatpush1.bf16.msra.mxu0 %v3568_v62  ;;  %v3580_v54 = vpack.c.bf16 %v1958_v52, %v1956_v48  ;;  %v1963_v62 = vld [vmem:[#allocation7 + $0x178] sm:$0xff]  ;;  %v1973_v48 = vld [vmem:[#allocation7 + $0x1c8] sm:$0xff] }
  0xac   :  { %518 = vmatprep.mubr.f32.mxu1 %v4314_v13  ;;  %3397 = vmatpush1.bf16.msra.mxu1 %v3396_v14  ;;  %v3570_v14 = vpack.c.bf16 %v1951_v7, %v1949_v6  ;;  %v4350_v6 = vld [vmem:[#allocation2 + $0x138] sm:$0xff]  ;;  %v1965_v7 = vld [vmem:[#allocation7 + $0x188] sm:$0xff] }
  0xad   :  { %3399 = vmatprep.subr.bf16.mxu1 %v3398_v16  ;;  %v3408_v16 = vpack.c.bf16 %v370_v2, %v362_v0  ;;  %v1960_v0 = vld [vmem:[#allocation7 + $0x160] sm:$0xff]  ;;  %v1962_v2 = vld [vmem:[#allocation7 + $0x170] sm:$0xff]  ;;  %v1975_v52 = vld [vmem:[#allocation7 + $0x1d8] sm:$0xff] }
  0xae   :  { %3571 = vmatprep.subr.bf16.mxu0 %v3570_v14  ;;  %v3584_v5 = vpack.c.bf16 %v1962_v2, %v1960_v0  ;;  %v1967_v14 = vld [vmem:[#allocation7 + $0x198] sm:$0xff]  ;;  %v4368_v0 = vld [vmem:[#allocation2 + $0x168] sm:$0xff] }
  0xaf   :  { %519 = vmatmul.mubr.f32.gmra.mrb[26].mxu1 %v4317_v27  ;;  %3573 = vmatpush1.bf16.msra.mxu0 %v3572_v23  ;;  %v4356_v23 = vld [vmem:[#allocation2 + $0x148] sm:$0xff] }
  0xb0   :  { %524 = vmatprep.mubr.f32.mxu1 %v4320_v29  ;;  %3401 = vmatpush1.bf16.msra.mxu1 %v3400_v30  ;;  %v3574_v30 = vpack.c.bf16 %v1955_v28, %v1953_v24  ;;  %v1969_v28 = vld [vmem:[#allocation7 + $0x1a8] sm:$0xff] }
  0xb1   :  { %3403 = vmatprep.subr.bf16.mxu1 %v3402_v36  ;;  %v4336_v36 = vld [vmem:[#allocation2 + $0x100] sm:$0xff] }
  0xb2   :  { %3575 = vmatprep.subr.bf16.mxu0 %v3574_v30  ;;  %v1971_v30 = vld [vmem:[#allocation7 + $0x1b8] sm:$0xff] }
  0xb3   :  { %525 = vmatmul.mubr.f32.gmra.mrb[28].mxu1 %v4324_v55  ;;  %3577 = vmatpush1.bf16.msra.mxu0 %v3576_v38  ;;  %v3590_v33 = vpack.c.bf16 %v1971_v30, %v1969_v28  ;;  %v1970_v38 = vld [vmem:[#allocation7 + $0x1b0] sm:$0xff]  ;;  %v4374_v28 = vld [vmem:[#allocation2 + $0x178] sm:$0xff] }
  0xb4   :  { %530 = vmatprep.mubr.f32.mxu1 %v4326_v56  ;;  %3405 = vmatpush1.bf16.msra.mxu1 %v3404_v61  ;;  %v1961_v61 = vld [vmem:[#allocation7 + $0x168] sm:$0xff]  ;;  %v3592_v44 = vpack.c.bf16 %v1970_v38, %v1968_v34  ;;  %v4378_v30 = vld [vmem:[#allocation2 + $0x170] sm:$0xff]  ;;  %v1983_v38 = vld [vmem:[#allocation7 + $0x218] sm:$0xff] }
  0xb5   :  { %3407 = vmatprep.subr.bf16.mxu1 %v3406_v63  ;;  %3579 = vmatprep.subr.bf16.mxu0 %v3578_v45  ;;  %v3582_v63 = vpack.c.bf16 %v1963_v62, %v1961_v61  ;;  %v4362_v45 = vld [vmem:[#allocation2 + $0x158] sm:$0xff]  ;;  %v4366_v61 = vld [vmem:[#allocation2 + $0x150] sm:$0xff]  ;;  %v1972_v62 = vld [vmem:[#allocation7 + $0x1c0] sm:$0xff] }
  0xb6   :  { %v1981_v34 = vld [vmem:[#allocation7 + $0x208] sm:$0xff] }
  0xb7   :  { %531 = vmatmul.mubr.f32.gmra.mrb[30].mxu1 %v4330_v15  ;;  %3581 = vmatpush1.bf16.msra.mxu0 %v3580_v54  ;;  %v3594_v54 = vpack.c.bf16 %v1975_v52, %v1973_v48  ;;  %v3602_v48 = vpack.c.bf16 %v1983_v38, %v1981_v34  ;;  %v4386_v52 = vld [vmem:[#allocation2 + $0x198] sm:$0xff]  ;;  %v4420_v34 = vld [vmem:[#allocation2 + $0x1e0] sm:$0xff] }
  0xb8   :  { %536 = vmatprep.mubr.f32.mxu1 %v4332_v21  ;;  %3409 = vmatpush1.bf16.msra.mxu1 %v3408_v16  ;;  %v3586_v16 = vpack.c.bf16 %v1967_v14, %v1965_v7  ;;  %v1979_v7 = vld [vmem:[#allocation7 + $0x1f8] sm:$0xff]  ;;  %4734 = vst [vmem:[#allocation14_spill] sm:$0xff] %v4386_v52  ;;  %4745 = vst [vmem:[#allocation25_spill] sm:$0xff] %v4420_v34 }
  0xb9   :  { %3411 = vmatprep.subr.bf16.mxu1 %v3410_v22  ;;  %3583 = vmatprep.subr.bf16.mxu0 %v3582_v63  ;;  %v1966_v22 = vld [vmem:[#allocation7 + $0x190] sm:$0xff]  ;;  %v4422_v38 = vld [vmem:[#allocation2 + $0x1f8] sm:$0xff] }
  0xba   :  { %v3588_v24 = vpack.c.bf16 %v1966_v22, %v1964_v20  ;;  %v1974_v63 = vld [vmem:[#allocation7 + $0x1d0] sm:$0xff]  ;;  %v4372_v22 = vld [vmem:[#allocation2 + $0x160] sm:$0xff]  ;;  %4746 = vst [vmem:[#allocation26_spill] sm:$0xff] %v4422_v38 }
  0xbb   :  { %537 = vmatmul.mubr.f32.gmra.mrb[32].mxu1 %v4336_v36  ;;  %3585 = vmatpush1.bf16.msra.mxu0 %v3584_v5  ;;  %v3596_v2 = vpack.c.bf16 %v1974_v63, %v1972_v62  ;;  %v1977_v5 = vld [vmem:[#allocation7 + $0x1e8] sm:$0xff]  ;;  %v1978_v20 = vld [vmem:[#allocation7 + $0x1f0] sm:$0xff]  ;;  %v4396_v63 = vld [vmem:[#allocation2 + $0x1a0] sm:$0xff] }
  0xbc   :  { %542 = vmatprep.mubr.f32.mxu1 %v4338_v39  ;;  %3587 = vmatprep.subr.bf16.mxu0 %v3586_v16  ;;  %v3598_v14 = vpack.c.bf16 %v1979_v7, %v1977_v5  ;;  %v1976_v16 = vld [vmem:[#allocation7 + $0x1e0] sm:$0xff]  ;;  %v4392_v62 = vld [vmem:[#allocation2 + $0x1a8] sm:$0xff]  ;;  %4737 = vst [vmem:[#allocation17_spill] sm:$0xff] %v4396_v63  ;;  %v4402_v5 = vld [vmem:[#allocation2 + $0x1b0] sm:$0xff] }
  0xbd   :  { %4736 = vst [vmem:[#allocation16_spill] sm:$0xff] %v4392_v62  ;;  %4739 = vst [vmem:[#allocation19_spill] sm:$0xff] %v4402_v5  ;;  %v4404_v7 = vld [vmem:[#allocation2 + $0x1c8] sm:$0xff] }
  0xbe   :  { %4740 = vst [vmem:[#allocation20_spill] sm:$0xff] %v4404_v7 }
  0xbf   :  { %543 = vmatmul.mubr.f32.gmra.mrb[34].mxu1 %v4342_v46  ;;  %3589 = vmatpush1.bf16.msra.mxu0 %v3588_v24  ;;  %v3600_v24 = vpack.c.bf16 %v1978_v20, %v1976_v16  ;;  %v4410_v16 = vld [vmem:[#allocation2 + $0x1d8] sm:$0xff]  ;;  %v4414_v20 = vld [vmem:[#allocation2 + $0x1d0] sm:$0xff] }
  0xc0   :  { %548 = vmatprep.mubr.f32.mxu1 %v4344_v53  ;;  %3591 = vmatprep.subr.bf16.mxu0 %v3590_v33  ;;  %v4380_v33 = vld [vmem:[#allocation2 + $0x188] sm:$0xff]  ;;  %4742 = vst [vmem:[#allocation22_spill] sm:$0xff] %v4410_v16  ;;  %4743 = vst [vmem:[#allocation23_spill] sm:$0xff] %v4414_v20 }
  0xc1   :  { %4732 = vst [vmem:[#allocation12_spill] sm:$0xff] %v4380_v33 }
  0xc3   :  { %549 = vmatmul.mubr.f32.gmra.mrb[36].mxu1 %v4348_v4  ;;  %3593 = vmatpush1.bf16.msra.mxu0 %v3592_v44  ;;  %v4384_v44 = vld [vmem:[#allocation2 + $0x180] sm:$0xff] }
  0xc4   :  { %554 = vmatprep.mubr.f32.mxu1 %v4350_v6  ;;  %3595 = vmatprep.subr.bf16.mxu0 %v3594_v54  ;;  %4733 = vst [vmem:[#allocation13_spill] sm:$0xff] %v4384_v44  ;;  %v4390_v54 = vld [vmem:[#allocation2 + $0x190] sm:$0xff] }
  0xc5   :  { %4735 = vst [vmem:[#allocation15_spill] sm:$0xff] %v4390_v54 }
  0xc7   :  { %555 = vmatmul.mubr.f32.gmra.mrb[38].mxu1 %v4354_v18  ;;  %3597 = vmatpush1.bf16.msra.mxu0 %v3596_v2  ;;  %v4398_v2 = vld [vmem:[#allocation2 + $0x1b8] sm:$0xff] }
  0xc8   :  { %560 = vmatprep.mubr.f32.mxu1 %v4356_v23  ;;  %3599 = vmatprep.subr.bf16.mxu0 %v3598_v14  ;;  %4738 = vst [vmem:[#allocation18_spill] sm:$0xff] %v4398_v2  ;;  %v4408_v14 = vld [vmem:[#allocation2 + $0x1c0] sm:$0xff] }
  0xc9   :  { %4741 = vst [vmem:[#allocation21_spill] sm:$0xff] %v4408_v14 }
  0xcb   :  { %561 = vmatmul.mubr.f32.gmra.mrb[40].mxu1 %v4360_v42  ;;  %3601 = vmatpush1.bf16.msra.mxu0 %v3600_v24  ;;  %v4416_v24 = vld [vmem:[#allocation2 + $0x1e8] sm:$0xff] }
  0xcc   :  { %566 = vmatprep.mubr.f32.mxu1 %v4362_v45  ;;  %3603 = vmatprep.subr.bf16.mxu0 %v3602_v48  ;;  %4744 = vst [vmem:[#allocation24_spill] sm:$0xff] %v4416_v24  ;;  %v4426_v48 = vld [vmem:[#allocation2 + $0x1f0] sm:$0xff] }
  0xcd   :  { %4747 = vst [vmem:[#allocation27_spill] sm:$0xff] %v4426_v48 }
  0xcf   :  { %567 = vmatmul.mubr.f32.gmra.mrb[42].mxu1 %v4366_v61 }
  0xd0   :  { %572 = vmatprep.mubr.f32.mxu1 %v4368_v0 }
  0xd3   :  { %573 = vmatmul.mubr.f32.gmra.mrb[44].mxu1 %v4372_v22 }
  0xd4   :  { %578 = vmatprep.mubr.f32.mxu1 %v4374_v28 }
  0xd7   :  { %579 = vmatmul.mubr.f32.gmra.mrb[46].mxu1 %v4378_v30 }
  0xd8   :  { %584 = vmatprep.mubr.f32.mxu1 %v4380_v33  ;;  %v173_v33 = vld [vmem:[#allocation5 + $0x1a8] sm:$0xff] }
  0xdb   :  { %585 = vmatmul.mubr.f32.gmra.mrb[48].mxu1 %v4384_v44  ;;  %v164_v44 = vld [vmem:[#allocation5 + $0x160] sm:$0xff] }
  0xdc   :  { %590 = vmatprep.mubr.f32.mxu1 %v4386_v52  ;;  %v156_v52 = vld [vmem:[#allocation5 + $0x120] sm:$0xff] }
  0xdf   :  { %591 = vmatmul.mubr.f32.gmra.mrb[50].mxu1 %v4390_v54  ;;  %v165_v54 = vld [vmem:[#allocation5 + $0x168] sm:$0xff] }
  0xe0   :  { %596 = vmatprep.mubr.f32.mxu1 %v4392_v62  ;;  %v157_v62 = vld [vmem:[#allocation5 + $0x128] sm:$0xff] }
  0xe3   :  { %597 = vmatmul.mubr.f32.gmra.mrb[52].mxu1 %v4396_v63  ;;  %v148_v63 = vld [vmem:[#allocation5 + $0xe0] sm:$0xff] }
  0xe4   :  { %602 = vmatprep.mubr.f32.mxu1 %v4398_v2  ;;  %v140_v2 = vld [vmem:[#allocation5 + $0xa0] sm:$0xff] }
  0xe7   :  { %603 = vmatmul.mubr.f32.gmra.mrb[54].mxu1 %v4402_v5  ;;  %v149_v5 = vld [vmem:[#allocation5 + $0xe8] sm:$0xff] }
  0xe8   :  { %608 = vmatprep.mubr.f32.mxu1 %v4404_v7  ;;  %v141_v7 = vld [vmem:[#allocation5 + $0xa8] sm:$0xff] }
  0xeb   :  { %609 = vmatmul.mubr.f32.gmra.mrb[56].mxu1 %v4408_v14  ;;  %v124_v14 = vld [vmem:[#allocation5 + $0x20] sm:$0xff] }
  0xec   :  { %614 = vmatprep.mubr.f32.mxu1 %v4410_v16  ;;  %v132_v16 = vld [vmem:[#allocation5 + $0x60] sm:$0xff] }
  0xef   :  { %615 = vmatmul.mubr.f32.gmra.mrb[58].mxu1 %v4414_v20  ;;  %v3412_v20 = vpack.c.bf16 %v132_v16, %v124_v14  ;;  %v189_v14 = vld [vmem:[#allocation5 + $0x228] sm:$0xff] }
  0xf0   :  { %620 = vmatprep.mubr.f32.mxu1 %v4416_v24  ;;  %v3414_v24 = vpack.c.bf16 %v149_v5, %v141_v7  ;;  %v172_v7 = vld [vmem:[#allocation5 + $0x1a0] sm:$0xff]  ;;  %v197_v16 = vld [vmem:[#allocation5 + $0x268] sm:$0xff] }
  0xf3   :  { %621 = vmatmul.mubr.f32.gmra.mrb[60].mxu1 %v4420_v34  ;;  %v3418_v34 = vpack.c.bf16 %v165_v54, %v157_v62  ;;  %v3426_v54 = vpack.c.bf16 %v197_v16, %v189_v14  ;;  %v188_v62 = vld [vmem:[#allocation5 + $0x220] sm:$0xff] }
  0xf4   :  { %626 = vmatprep.mubr.f32.mxu1 %v4422_v38  ;;  %v3416_v38 = vpack.c.bf16 %v148_v63, %v140_v2  ;;  %v205_v63 = vld [vmem:[#allocation5 + $0x2a8] sm:$0xff]  ;;  %v252_v16 = vld [vmem:[#allocation5 + $0x420] sm:$0xff] }
  0xf5   :  { %v221_v2 = vld [vmem:[#allocation5 + $0x328] sm:$0xff] }
  0xf7   :  { %627 = vmatmul.mubr.f32.gmra.mrb[62].mxu1 %v4426_v48  ;;  %v181_v48 = vld [vmem:[#allocation5 + $0x1e8] sm:$0xff] }
  0xf8   :  { %697 = vmatprep.mubr.f32.mxu1 %v4237_v41  ;;  %v3420_v41 = vpack.c.bf16 %v164_v44, %v156_v52  ;;  %v3422_v5 = vpack.c.bf16 %v181_v48, %v173_v33  ;;  %v204_v52 = vld [vmem:[#allocation5 + $0x2a0] sm:$0xff] }
  0xfb   :  { %698 = vmatmul.mubr.f32.vlgmr.msra.gmra.mrb[64].mxu1 %v4240_v40  ;;  %v180_v40 = vld [vmem:[#allocation5 + $0x1e0] sm:$0xff] }
  0xfc   :  { %3413 = vmatpush1.bf16.msra.mxu1 %v3412_v20  ;;  %703 = vmatprep.mubr.f32.mxu1 %v4242_v43  ;;  %v3424_v43 = vpack.c.bf16 %v180_v40, %v172_v7  ;;  %v253_v7 = vld [vmem:[#allocation5 + $0x428] sm:$0xff] }
  0xfd   :  { %3415 = vmatprep.subr.bf16.mxu1 %v3414_v24 }
  0xff   :  { %704 = vmatmul.mubr.f32.gmra.mrb[66].mxu1 %v4246_v49  ;;  %v196_v49 = vld [vmem:[#allocation5 + $0x260] sm:$0xff] }
 0x100   :  { %709 = vmatprep.mubr.f32.mxu1 %v4248_v51  ;;  %3417 = vmatpush1.bf16.msra.mxu1 %v3416_v38  ;;  %v213_v51 = vld [vmem:[#allocation5 + $0x2e8] sm:$0xff]  ;;  %v3428_v33 = vpack.c.bf16 %v196_v49, %v188_v62  ;;  %v268_v49 = vld [vmem:[#allocation5 + $0x4a0] sm:$0xff] }
 0x101   :  { %3419 = vmatprep.subr.bf16.mxu1 %v3418_v34  ;;  %v3430_v44 = vpack.c.bf16 %v213_v51, %v205_v63  ;;  %v220_v34 = vld [vmem:[#allocation5 + $0x320] sm:$0xff]  ;;  %v237_v38 = vld [vmem:[#allocation5 + $0x3a8] sm:$0xff] }
 0x102   :  { %v285_v63 = vld [vmem:[#allocation5 + $0x528] sm:$0xff] }
 0x103   :  { %710 = vmatmul.mubr.f32.gmra.mrb[68].mxu1 %v4252_v57  ;;  %v212_v57 = vld [vmem:[#allocation5 + $0x2e0] sm:$0xff] }
 0x104   :  { %715 = vmatprep.mubr.f32.mxu1 %v4254_v59  ;;  %3421 = vmatpush1.bf16.msra.mxu1 %v3420_v41  ;;  %v229_v59 = vld [vmem:[#allocation5 + $0x368] sm:$0xff]  ;;  %v3432_v20 = vpack.c.bf16 %v212_v57, %v204_v52 }
 0x105   :  { %3423 = vmatprep.subr.bf16.mxu1 %v3422_v5  ;;  %v3434_v24 = vpack.c.bf16 %v229_v59, %v221_v2  ;;  %v236_v5 = vld [vmem:[#allocation5 + $0x3a0] sm:$0xff]  ;;  %v301_v52 = vld [vmem:[#allocation5 + $0x5a8] sm:$0xff] }
 0x106   :  { %v300_v59 = vld [vmem:[#allocation5 + $0x5a0] sm:$0xff] }
 0x107   :  { %716 = vmatmul.mubr.f32.gmra.mrb[70].mxu1 %v4258_v1  ;;  %v228_v1 = vld [vmem:[#allocation5 + $0x360] sm:$0xff] }
 0x108   :  { %721 = vmatprep.mubr.f32.mxu1 %v4260_v3  ;;  %3425 = vmatpush1.bf16.msra.mxu1 %v3424_v43  ;;  %v245_v3 = vld [vmem:[#allocation5 + $0x3e8] sm:$0xff]  ;;  %v3436_v48 = vpack.c.bf16 %v228_v1, %v220_v34  ;;  %v316_v1 = vld [vmem:[#allocation5 + $0x620] sm:$0xff] }
 0x109   :  { %3427 = vmatprep.subr.bf16.mxu1 %v3426_v54  ;;  %v3438_v41 = vpack.c.bf16 %v245_v3, %v237_v38  ;;  %v269_v43 = vld [vmem:[#allocation5 + $0x4a8] sm:$0xff] }
 0x10a   :  { %v333_v38 = vld [vmem:[#allocation5 + $0x6a8] sm:$0xff] }
 0x10b   :  { %722 = vmatmul.mubr.f32.gmra.mrb[72].mxu1 %v4264_v9  ;;  %v244_v9 = vld [vmem:[#allocation5 + $0x3e0] sm:$0xff] }
 0x10c   :  { %727 = vmatprep.mubr.f32.mxu1 %v4266_v11  ;;  %3429 = vmatpush1.bf16.msra.mxu1 %v3428_v33  ;;  %v261_v11 = vld [vmem:[#allocation5 + $0x468] sm:$0xff]  ;;  %v3440_v40 = vpack.c.bf16 %v244_v9, %v236_v5 }
 0x10d   :  { %3431 = vmatprep.subr.bf16.mxu1 %v3430_v44  ;;  %v3442_v14 = vpack.c.bf16 %v261_v11, %v253_v7  ;;  %v284_v44 = vld [vmem:[#allocation5 + $0x520] sm:$0xff]  ;;  %v349_v5 = vld [vmem:[#allocation5 + $0x728] sm:$0xff] }
 0x10e   :  { %v348_v11 = vld [vmem:[#allocation5 + $0x720] sm:$0xff] }
 0x10f   :  { %728 = vmatmul.mubr.f32.gmra.mrb[74].mxu1 %v4270_v17  ;;  %v260_v17 = vld [vmem:[#allocation5 + $0x460] sm:$0xff] }
 0x110   :  { %733 = vmatprep.mubr.f32.mxu1 %v4272_v19  ;;  %3433 = vmatpush1.bf16.msra.mxu1 %v3432_v20  ;;  %v277_v19 = vld [vmem:[#allocation5 + $0x4e8] sm:$0xff]  ;;  %v3444_v54 = vpack.c.bf16 %v260_v17, %v252_v16  ;;  %v364_v17 = vld [vmem:[#allocation5 + $0x7a0] sm:$0xff] }
 0x111   :  { %3435 = vmatprep.subr.bf16.mxu1 %v3434_v24  ;;  %v3446_v62 = vpack.c.bf16 %v277_v19, %v269_v43  ;;  %v317_v20 = vld [vmem:[#allocation5 + $0x628] sm:$0xff]  ;;  %v127_v43 = vld [vmem:[#allocation5 + $0x38] sm:$0xff] }
 0x113   :  { %734 = vmatmul.mubr.f32.gmra.mrb[76].mxu1 %v4276_v25  ;;  %v276_v25 = vld [vmem:[#allocation5 + $0x4e0] sm:$0xff] }
 0x114   :  { %739 = vmatprep.mubr.f32.mxu1 %v4278_v26  ;;  %3437 = vmatpush1.bf16.msra.mxu1 %v3436_v48  ;;  %v293_v26 = vld [vmem:[#allocation5 + $0x568] sm:$0xff]  ;;  %v3448_v51 = vpack.c.bf16 %v276_v25, %v268_v49 }
 0x115   :  { %3439 = vmatprep.subr.bf16.mxu1 %v3438_v41  ;;  %v3450_v33 = vpack.c.bf16 %v293_v26, %v285_v63  ;;  %v332_v41 = vld [vmem:[#allocation5 + $0x6a0] sm:$0xff] }
 0x117   :  { %740 = vmatmul.mubr.f32.gmra.mrb[78].mxu1 %v4281_v35  ;;  %v292_v35 = vld [vmem:[#allocation5 + $0x560] sm:$0xff] }
 0x118   :  { %745 = vmatprep.mubr.f32.mxu1 %v4284_v37  ;;  %3441 = vmatpush1.bf16.msra.mxu1 %v3440_v40  ;;  %v309_v37 = vld [vmem:[#allocation5 + $0x5e8] sm:$0xff]  ;;  %v3452_v57 = vpack.c.bf16 %v292_v35, %v284_v44  ;;  %v1988_v35 = vld [vmem:[#allocation7 + $0x240] sm:$0xff] }
 0x119   :  { %3443 = vmatprep.subr.bf16.mxu1 %v3442_v14  ;;  %v3454_v2 = vpack.c.bf16 %v309_v37, %v301_v52  ;;  %v365_v40 = vld [vmem:[#allocation5 + $0x7a8] sm:$0xff]  ;;  %v1990_v52 = vld [vmem:[#allocation7 + $0x250] sm:$0xff] }
 0x11b   :  { %746 = vmatmul.mubr.f32.gmra.mrb[80].mxu1 %v4288_v58  ;;  %v308_v58 = vld [vmem:[#allocation5 + $0x5e0] sm:$0xff] }
 0x11c   :  { %751 = vmatprep.mubr.f32.mxu1 %v4290_v60  ;;  %3445 = vmatpush1.bf16.msra.mxu1 %v3444_v54  ;;  %v325_v60 = vld [vmem:[#allocation5 + $0x668] sm:$0xff]  ;;  %v3456_v24 = vpack.c.bf16 %v308_v58, %v300_v59 }
 0x11d   :  { %3447 = vmatprep.subr.bf16.mxu1 %v3446_v62  ;;  %v3458_v34 = vpack.c.bf16 %v325_v60, %v317_v20  ;;  %v1986_v62 = vld [vmem:[#allocation7 + $0x230] sm:$0xff]  ;;  %v3612_v20 = vpack.c.bf16 %v1990_v52, %v1988_v35 }
 0x11f   :  { %752 = vmatmul.mubr.f32.gmra.mrb[82].mxu1 %v4293_v8  ;;  %v324_v8 = vld [vmem:[#allocation5 + $0x660] sm:$0xff] }
 0x120   :  { %757 = vmatprep.mubr.f32.mxu1 %v4296_v12  ;;  %3449 = vmatpush1.bf16.msra.mxu1 %v3448_v51  ;;  %v341_v12 = vld [vmem:[#allocation5 + $0x6e8] sm:$0xff]  ;;  %v3460_v3 = vpack.c.bf16 %v324_v8, %v316_v1  ;;  %v1992_v8 = vld [vmem:[#allocation7 + $0x260] sm:$0xff] }
 0x121   :  { %3451 = vmatprep.subr.bf16.mxu1 %v3450_v33  ;;  %v3462_v48 = vpack.c.bf16 %v341_v12, %v333_v38  ;;  %v4749_v1 = vld [vmem:[#allocation13_spill] sm:$0xff]  ;;  %v1994_v38 = vld [vmem:[#allocation7 + $0x270] sm:$0xff] }
 0x123   :  { %758 = vmatmul.mubr.f32.gmra.mrb[84].mxu1 %v4300_v31  ;;  %v340_v31 = vld [vmem:[#allocation5 + $0x6e0] sm:$0xff] }
 0x124   :  { %763 = vmatprep.mubr.f32.mxu1 %v4302_v32  ;;  %3453 = vmatpush1.bf16.msra.mxu1 %v3452_v57  ;;  %v357_v32 = vld [vmem:[#allocation5 + $0x768] sm:$0xff]  ;;  %v3464_v9 = vpack.c.bf16 %v340_v31, %v332_v41  ;;  %v4748_v57 = vld [vmem:[#allocation12_spill] sm:$0xff]  ;;  %v1999_v41 = vld [vmem:[#allocation7 + $0x298] sm:$0xff] }
 0x125   :  { %3455 = vmatprep.subr.bf16.mxu1 %v3454_v2  ;;  %v3466_v7 = vpack.c.bf16 %v357_v32, %v349_v5  ;;  %v1995_v2 = vld [vmem:[#allocation7 + $0x278] sm:$0xff]  ;;  %v3616_v32 = vpack.c.bf16 %v1994_v38, %v1992_v8 }
 0x127   :  { %764 = vmatmul.mubr.f32.gmra.mrb[86].mxu1 %v4305_v47  ;;  %v356_v47 = vld [vmem:[#allocation5 + $0x760] sm:$0xff] }
 0x128   :  { %769 = vmatprep.mubr.f32.mxu1 %v4308_v50  ;;  %3457 = vmatpush1.bf16.msra.mxu1 %v3456_v24  ;;  %v373_v50 = vld [vmem:[#allocation5 + $0x7e8] sm:$0xff]  ;;  %v3468_v14 = vpack.c.bf16 %v356_v47, %v348_v11  ;;  %v4751_v47 = vld [vmem:[#allocation15_spill] sm:$0xff] }
 0x129   :  { %3459 = vmatprep.subr.bf16.mxu1 %v3458_v34  ;;  %v3470_v16 = vpack.c.bf16 %v373_v50, %v365_v40  ;;  %v1996_v50 = vld [vmem:[#allocation7 + $0x280] sm:$0xff] }
 0x12b   :  { %770 = vmatmul.mubr.f32.gmra.mrb[88].mxu1 %v4312_v10  ;;  %v372_v10 = vld [vmem:[#allocation5 + $0x7e0] sm:$0xff] }
 0x12c   :  { %775 = vmatprep.mubr.f32.mxu1 %v4314_v13  ;;  %3461 = vmatpush1.bf16.msra.mxu1 %v3460_v3  ;;  %v135_v13 = vld [vmem:[#allocation5 + $0x78] sm:$0xff]  ;;  %v3472_v19 = vpack.c.bf16 %v372_v10, %v364_v17  ;;  %v4750_v3 = vld [vmem:[#allocation14_spill] sm:$0xff]  ;;  %v4752_v17 = vld [vmem:[#allocation16_spill] sm:$0xff] }
 0x12d   :  { %3463 = vmatprep.subr.bf16.mxu1 %v3462_v48  ;;  %v3474_v54 = vpack.c.bf16 %v135_v13, %v127_v43  ;;  %v1997_v48 = vld [vmem:[#allocation7 + $0x288] sm:$0xff]  ;;  %v2003_v43 = vld [vmem:[#allocation7 + $0x2b8] sm:$0xff] }
 0x12e   :  { %v3618_v40 = vpack.c.bf16 %v1999_v41, %v1997_v48  ;;  %v2001_v10 = vld [vmem:[#allocation7 + $0x2a8] sm:$0xff]  ;;  %v4759_v48 = vld [vmem:[#allocation23_spill] sm:$0xff] }
 0x12f   :  { %776 = vmatmul.mubr.f32.gmra.mrb[90].mxu1 %v4317_v27 }
 0x130   :  { %781 = vmatprep.mubr.f32.mxu1 %v4320_v29  ;;  %3465 = vmatpush1.bf16.msra.mxu1 %v3464_v9 }
 0x131   :  { %3467 = vmatprep.subr.bf16.mxu1 %v3466_v7 }
 0x133   :  { %782 = vmatmul.mubr.f32.gmra.mrb[92].mxu1 %v4324_v55 }
 0x134   :  { %787 = vmatprep.mubr.f32.mxu1 %v4326_v56  ;;  %3469 = vmatpush1.bf16.msra.mxu1 %v3468_v14  ;;  %v1980_v56 = vld [vmem:[#allocation7 + $0x200] sm:$0xff]  ;;  %v1998_v14 = vld [vmem:[#allocation7 + $0x290] sm:$0xff] }
 0x135   :  { %3471 = vmatprep.subr.bf16.mxu1 %v3470_v16 }
 0x137   :  { %788 = vmatmul.mubr.f32.gmra.mrb[94].mxu1 %v4330_v15  ;;  %v1982_v15 = vld [vmem:[#allocation7 + $0x210] sm:$0xff] }
 0x138   :  { %793 = vmatprep.mubr.f32.mxu1 %v4332_v21  ;;  %3473 = vmatpush1.bf16.msra.mxu1 %v3472_v19 }
 0x139   :  { %3475 = vmatprep.subr.bf16.mxu1 %v3474_v54  ;;  %v3620_v54 = vpack.c.bf16 %v1998_v14, %v1996_v50 }
 0x13b   :  { %794 = vmatmul.mubr.f32.gmra.mrb[96].mxu1 %v4336_v36  ;;  %v1985_v36 = vld [vmem:[#allocation7 + $0x228] sm:$0xff] }
 0x13c   :  { %799 = vmatprep.mubr.f32.mxu1 %v4338_v39  ;;  %v1987_v39 = vld [vmem:[#allocation7 + $0x238] sm:$0xff] }
 0x13f   :  { %800 = vmatmul.mubr.f32.gmra.mrb[98].mxu1 %v4342_v46 }
 0x140   :  { %805 = vmatprep.mubr.f32.mxu1 %v4344_v53 }
 0x143   :  { %806 = vmatmul.mubr.f32.gmra.mrb[100].mxu1 %v4348_v4  ;;  %v3604_v4 = vpack.c.bf16 %v1982_v15, %v1980_v56  ;;  %v4753_v56 = vld [vmem:[#allocation17_spill] sm:$0xff]  ;;  %v3622_v15 = vpack.c.bf16 %v2003_v43, %v2001_v10 }
 0x144   :  { %811 = vmatprep.mubr.f32.mxu1 %v4350_v6  ;;  %v4761_v10 = vld [vmem:[#allocation25_spill] sm:$0xff] }
 0x147   :  { %812 = vmatmul.mubr.f32.gmra.mrb[102].mxu1 %v4354_v18 }
 0x148   :  { %817 = vmatprep.mubr.f32.mxu1 %v4356_v23 }
 0x14b   :  { %818 = vmatmul.mubr.f32.gmra.mrb[104].mxu1 %v4360_v42  ;;  %v3606_v42 = vpack.c.bf16 %v1987_v39, %v1985_v36  ;;  %v2002_v36 = vld [vmem:[#allocation7 + $0x2b0] sm:$0xff] }
 0x14c   :  { %823 = vmatprep.mubr.f32.mxu1 %v4362_v45  ;;  %v1984_v45 = vld [vmem:[#allocation7 + $0x220] sm:$0xff] }
 0x14d   :  { %v3608_v26 = vpack.c.bf16 %v1986_v62, %v1984_v45 }
 0x14e   :  { %v442_v27 = vpop.f32.mrb[0].mxu1 }
 0x14f   :  { %v1404_v29 = vmax.f32 %v442_v27, 0.0  ;;  %v444_v55 = vpop.f32.mrb[1].mxu1  ;;  %824 = vmatmul.mubr.f32.gmra.mrb[106].mxu1 %v4366_v61  ;;  %v1989_v61 = vld [vmem:[#allocation7 + $0x248] sm:$0xff] }
 0x150   :  { %829 = vmatprep.mubr.f32.mxu1 %v4368_v0  ;;  %v1405_v21 = vmax.f32 %v444_v55, 0.0  ;;  %v1991_v0 = vld [vmem:[#allocation7 + $0x258] sm:$0xff] }
 0x151   :  { %v1660_v6 = vmul.f32 %v1404_v29, %v1404_v29 }
 0x152   :  { %v448_v46 = vpop.f32.mrb[2].mxu1  ;;  %v1661_v53 = vmul.f32 %v1405_v21, %v1405_v21  ;;  %v2000_v21 = vld [vmem:[#allocation7 + $0x2a0] sm:$0xff] }
 0x153   :  { %v1412_v18 = vmax.f32 %v448_v46, 0.0  ;;  %v450_v23 = vpop.f32.mrb[3].mxu1  ;;  %830 = vmatmul.mubr.f32.gmra.mrb[108].mxu1 %v4372_v22  ;;  %v3610_v22 = vpack.c.bf16 %v1991_v0, %v1989_v61  ;;  %v4754_v46 = vld [vmem:[#allocation18_spill] sm:$0xff]  ;;  %v2004_v0 = vld [vmem:[#allocation7 + $0x2c0] sm:$0xff] }
 0x154   :  { %v1413_v49 = vmax.f32 %v450_v23, 0.0  ;;  %2236 = vmatprep.mubr.f32.mxu0 %v1661_v53  ;;  %835 = vmatprep.mubr.f32.mxu1 %v4374_v28  ;;  %v1993_v28 = vld [vmem:[#allocation7 + $0x268] sm:$0xff]  ;;  %v3624_v23 = vpack.c.bf16 %v2002_v36, %v2000_v21 }
 0x155   :  { %2237 = vmatmul.mubr.f32.vlgmr.msra.gmra.mrb[0].mxu0 %v1660_v6  ;;  %v1668_v51 = vmul.f32 %v1412_v18, %v1412_v18  ;;  %v2005_v53 = vld [vmem:[#allocation7 + $0x2c8] sm:$0xff] }
 0x156   :  { %v1669_v25 = vmul.f32 %v1413_v49, %v1413_v49  ;;  %v454_v63 = vpop.f32.mrb[4].mxu1  ;;  %3605 = vmatpush1.bf16.msra.mxu0 %v3604_v4  ;;  %v2007_v4 = vld [vmem:[#allocation7 + $0x2d8] sm:$0xff] }
 0x157   :  { %v1420_v33 = vmax.f32 %v454_v63, 0.0  ;;  %v456_v44 = vpop.f32.mrb[5].mxu1  ;;  %836 = vmatmul.mubr.f32.gmra.mrb[110].mxu1 %v4378_v30  ;;  %3607 = vmatprep.subr.bf16.mxu0 %v3606_v42  ;;  %v3614_v30 = vpack.c.bf16 %v1995_v2, %v1993_v28  ;;  %v4755_v49 = vld [vmem:[#allocation19_spill] sm:$0xff]  ;;  %v3626_v61 = vpack.c.bf16 %v2007_v4, %v2005_v53  ;;  %v4757_v28 = vld [vmem:[#allocation21_spill] sm:$0xff] }
 0x158   :  { %v1421_v37 = vmax.f32 %v456_v44, 0.0  ;;  %2242 = vmatprep.mubr.f32.mxu0 %v1669_v25  ;;  %841 = vmatprep.mubr.f32.mxu1 %v4748_v57  ;;  %v2006_v25 = vld [vmem:[#allocation7 + $0x2d0] sm:$0xff] }
 0x159   :  { %2243 = vmatmul.mubr.f32.gmra.mrb[2].mxu0 %v1668_v51  ;;  %v1676_v60 = vmul.f32 %v1420_v33, %v1420_v33  ;;  %v2009_v51 = vld [vmem:[#allocation7 + $0x2e8] sm:$0xff]  ;;  %v2011_v33 = vld [vmem:[#allocation7 + $0x2f8] sm:$0xff]  ;;  %v3628_v35 = vpack.c.bf16 %v2006_v25, %v2004_v0 }
 0x15a   :  { %v1677_v59 = vmul.f32 %v1421_v37, %v1421_v37  ;;  %v460_v58 = vpop.f32.mrb[6].mxu1  ;;  %3609 = vmatpush1.bf16.msra.mxu0 %v3608_v26  ;;  %v4756_v26 = vld [vmem:[#allocation20_spill] sm:$0xff]  ;;  %v3630_v2 = vpack.c.bf16 %v2011_v33, %v2009_v51  ;;  %v2025_v25 = vld [vmem:[#allocation7 + $0x368] sm:$0xff] }
 0x15b   :  { %v1428_v24 = vmax.f32 %v460_v58, 0.0  ;;  %v462_v34 = vpop.f32.mrb[7].mxu1  ;;  %842 = vmatmul.mubr.f32.gmra.mrb[112].mxu1 %v4749_v1  ;;  %3611 = vmatprep.subr.bf16.mxu0 %v3610_v22  ;;  %v2010_v58 = vld [vmem:[#allocation7 + $0x2f0] sm:$0xff] }
 0x15c   :  { %v1429_v12 = vmax.f32 %v462_v34, 0.0  ;;  %2248 = vmatprep.mubr.f32.mxu0 %v1677_v59  ;;  %847 = vmatprep.mubr.f32.mxu1 %v4750_v3  ;;  %v2008_v59 = vld [vmem:[#allocation7 + $0x2e0] sm:$0xff]  ;;  %v2015_v34 = vld [vmem:[#allocation7 + $0x318] sm:$0xff] }
 0x15d   :  { %2249 = vmatmul.mubr.f32.gmra.mrb[4].mxu0 %v1676_v60  ;;  %v1684_v9 = vmul.f32 %v1428_v24, %v1428_v24  ;;  %v4758_v60 = vld [vmem:[#allocation22_spill] sm:$0xff]  ;;  %v2013_v24 = vld [vmem:[#allocation7 + $0x308] sm:$0xff]  ;;  %v3632_v8 = vpack.c.bf16 %v2010_v58, %v2008_v59  ;;  %v167_v59 = vld [vmem:[#allocation5 + $0x178] sm:$0xff] }
 0x15e   :  { %v1685_v31 = vmul.f32 %v1429_v12, %v1429_v12  ;;  %v466_v5 = vpop.f32.mrb[8].mxu1  ;;  %3613 = vmatpush1.bf16.msra.mxu0 %v3612_v20  ;;  %v3634_v41 = vpack.c.bf16 %v2015_v34, %v2013_v24  ;;  %v2029_v34 = vld [vmem:[#allocation7 + $0x388] sm:$0xff] }
 0x15f   :  { %v1436_v7 = vmax.f32 %v466_v5, 0.0  ;;  %v468_v11 = vpop.f32.mrb[9].mxu1  ;;  %848 = vmatmul.mubr.f32.gmra.mrb[114].mxu1 %v4751_v47  ;;  %3615 = vmatprep.subr.bf16.mxu0 %v3614_v30  ;;  %v2014_v5 = vld [vmem:[#allocation7 + $0x310] sm:$0xff] }
 0x160   :  { %v1437_v16 = vmax.f32 %v468_v11, 0.0  ;;  %2254 = vmatprep.mubr.f32.mxu0 %v1685_v31  ;;  %853 = vmatprep.mubr.f32.mxu1 %v4752_v17  ;;  %v2012_v31 = vld [vmem:[#allocation7 + $0x300] sm:$0xff]  ;;  %v2019_v11 = vld [vmem:[#allocation7 + $0x338] sm:$0xff] }
 0x161   :  { %2255 = vmatmul.mubr.f32.gmra.mrb[6].mxu0 %v1684_v9  ;;  %v1692_v27 = vmul.f32 %v1436_v7, %v1436_v7  ;;  %v4760_v9 = vld [vmem:[#allocation24_spill] sm:$0xff]  ;;  %v2017_v7 = vld [vmem:[#allocation7 + $0x328] sm:$0xff]  ;;  %v3636_v50 = vpack.c.bf16 %v2014_v5, %v2012_v31  ;;  %v175_v31 = vld [vmem:[#allocation5 + $0x1b8] sm:$0xff] }
 0x162   :  { %v1693_v13 = vmul.f32 %v1437_v16, %v1437_v16  ;;  %v472_v19 = vpop.f32.mrb[10].mxu1  ;;  %3617 = vmatpush1.bf16.msra.mxu0 %v3616_v32  ;;  %v3638_v43 = vpack.c.bf16 %v2019_v11, %v2017_v7  ;;  %v3997_v11 = vld [vmem:[#allocation2 + $0x10] sm:$0xff] }
 0x163   :  { %v1444_v29 = vmax.f32 %v472_v19, 0.0  ;;  %v474_v55 = vpop.f32.mrb[11].mxu1  ;;  %854 = vmatmul.mubr.f32.gmra.mrb[116].mxu1 %v4753_v56  ;;  %3619 = vmatprep.subr.bf16.mxu0 %v3618_v40  ;;  %v2018_v19 = vld [vmem:[#allocation7 + $0x330] sm:$0xff] }
 0x164   :  { %v1445_v39 = vmax.f32 %v474_v55, 0.0  ;;  %2260 = vmatprep.mubr.f32.mxu0 %v1693_v13  ;;  %859 = vmatprep.mubr.f32.mxu1 %v4754_v46  ;;  %v2016_v13 = vld [vmem:[#allocation7 + $0x320] sm:$0xff]  ;;  %v2023_v55 = vld [vmem:[#allocation7 + $0x358] sm:$0xff]  ;;  %v126_v56 = vld [vmem:[#allocation5 + $0x30] sm:$0xff] }
 0x165   :  { %2261 = vmatmul.mubr.f32.gmra.mrb[8].mxu0 %v1692_v27  ;;  %v1700_v42 = vmul.f32 %v1444_v29, %v1444_v29  ;;  %v4762_v27 = vld [vmem:[#allocation26_spill] sm:$0xff]  ;;  %v2021_v29 = vld [vmem:[#allocation7 + $0x348] sm:$0xff]  ;;  %v3640_v46 = vpack.c.bf16 %v2018_v19, %v2016_v13 }
 0x166   :  { %v1701_v6 = vmul.f32 %v1445_v39, %v1445_v39  ;;  %v478_v18 = vpop.f32.mrb[12].mxu1  ;;  %3621 = vmatpush1.bf16.msra.mxu0 %v3620_v54  ;;  %v143_v39 = vld [vmem:[#allocation5 + $0xb8] sm:$0xff] }
 0x167   :  { %v1452_v45 = vmax.f32 %v478_v18, 0.0  ;;  %v480_v62 = vpop.f32.mrb[13].mxu1  ;;  %860 = vmatmul.mubr.f32.gmra.mrb[118].mxu1 %v4755_v49  ;;  %3623 = vmatprep.subr.bf16.mxu0 %v3622_v15  ;;  %v134_v15 = vld [vmem:[#allocation5 + $0x70] sm:$0xff]  ;;  %v4763_v18 = vld [vmem:[#allocation27_spill] sm:$0xff] }
 0x168   :  { %v1453_v63 = vmax.f32 %v480_v62, 0.0  ;;  %2266 = vmatprep.mubr.f32.mxu0 %v1701_v6  ;;  %865 = vmatprep.mubr.f32.mxu1 %v4756_v26  ;;  %v2022_v62 = vld [vmem:[#allocation7 + $0x350] sm:$0xff]  ;;  %v3476_v0 = vpack.c.bf16 %v134_v15, %v126_v56  ;;  %v191_v56 = vld [vmem:[#allocation5 + $0x238] sm:$0xff] }
 0x169   :  { %2267 = vmatmul.mubr.f32.gmra.mrb[10].mxu0 %v1700_v42  ;;  %v1708_v52 = vmul.f32 %v1452_v45, %v1452_v45  ;;  %v3642_v42 = vpack.c.bf16 %v2023_v55, %v2021_v29  ;;  %v2020_v45 = vld [vmem:[#allocation7 + $0x340] sm:$0xff]  ;;  %v174_v29 = vld [vmem:[#allocation5 + $0x1b0] sm:$0xff] }
 0x16a   :  { %v1709_v44 = vmul.f32 %v1453_v63, %v1453_v63  ;;  %v484_v22 = vpop.f32.mrb[14].mxu1  ;;  %3625 = vmatpush1.bf16.msra.mxu0 %v3624_v23  ;;  %v151_v23 = vld [vmem:[#allocation5 + $0xf8] sm:$0xff]  ;;  %v182_v55 = vld [vmem:[#allocation5 + $0x1f0] sm:$0xff] }
 0x16b   :  { %v1460_v37 = vmax.f32 %v484_v22, 0.0  ;;  %v486_v57 = vpop.f32.mrb[15].mxu1  ;;  %866 = vmatmul.mubr.f32.gmra.mrb[120].mxu1 %v4757_v28  ;;  %3627 = vmatprep.subr.bf16.mxu0 %v3626_v61  ;;  %v3994_v61 = vld [vmem:[#allocation2 + $0x8] sm:$0xff]  ;;  %v2027_v63 = vld [vmem:[#allocation7 + $0x378] sm:$0xff]  ;;  %v3478_v33 = vpack.c.bf16 %v151_v23, %v143_v39  ;;  %v150_v22 = vld [vmem:[#allocation5 + $0xf0] sm:$0xff] }
 0x16c   :  { %v1461_v20 = vmax.f32 %v486_v57, 0.0  ;;  %2272 = vmatprep.mubr.f32.mxu0 %v1709_v44  ;;  %871 = vmatprep.mubr.f32.mxu1 %v4758_v60  ;;  %v142_v44 = vld [vmem:[#allocation5 + $0xb0] sm:$0xff]  ;;  %v3646_v58 = vpack.c.bf16 %v2027_v63, %v2025_v25 }
 0x16d   :  { %2273 = vmatmul.mubr.f32.gmra.mrb[12].mxu0 %v1708_v52  ;;  %v1716_v38 = vmul.f32 %v1460_v37, %v1460_v37  ;;  %v3644_v52 = vpack.c.bf16 %v2022_v62, %v2020_v45  ;;  %v2026_v60 = vld [vmem:[#allocation7 + $0x370] sm:$0xff]  ;;  %v2037_v45 = vld [vmem:[#allocation7 + $0x3c8] sm:$0xff]  ;;  %v2039_v62 = vld [vmem:[#allocation7 + $0x3d8] sm:$0xff] }
 0x16e   :  { %v1717_v1 = vmul.f32 %v1461_v20, %v1461_v20  ;;  %v490_v30 = vpop.f32.mrb[16].mxu1  ;;  %3629 = vmatpush1.bf16.msra.mxu0 %v3628_v35  ;;  %v159_v35 = vld [vmem:[#allocation5 + $0x138] sm:$0xff]  ;;  %v2024_v20 = vld [vmem:[#allocation7 + $0x360] sm:$0xff]  ;;  %v190_v63 = vld [vmem:[#allocation5 + $0x230] sm:$0xff] }
 0x16f   :  { %v1468_v12 = vmax.f32 %v490_v30, 0.0  ;;  %v492_v3 = vpop.f32.mrb[17].mxu1  ;;  %872 = vmatmul.mubr.f32.gmra.mrb[122].mxu1 %v4759_v48  ;;  %3631 = vmatprep.subr.bf16.mxu0 %v3630_v2  ;;  %v3995_v2 = vld [vmem:[#allocation2] sm:$0xff]  ;;  %v3996_v30 = vld [vmem:[#allocation2 + $0x18] sm:$0xff]  ;;  %v158_v48 = vld [vmem:[#allocation5 + $0x130] sm:$0xff]  ;;  %v3648_v5 = vpack.c.bf16 %v2026_v60, %v2024_v20 }
 0x170   :  { %v1469_v32 = vmax.f32 %v492_v3, 0.0  ;;  %2278 = vmatprep.mubr.f32.mxu0 %v1717_v1  ;;  %877 = vmatprep.mubr.f32.mxu1 %v4760_v9  ;;  %v2031_v1 = vld [vmem:[#allocation7 + $0x398] sm:$0xff]  ;;  %v3482_v3 = vpack.c.bf16 %v167_v59, %v159_v35  ;;  %v2041_v20 = vld [vmem:[#allocation7 + $0x3e8] sm:$0xff] }
 0x171   :  { %2279 = vmatmul.mubr.f32.gmra.mrb[14].mxu0 %v1716_v38  ;;  %v1724_v14 = vmul.f32 %v1468_v12, %v1468_v12  ;;  %v2043_v60 = vld [vmem:[#allocation7 + $0x3f8] sm:$0xff] }
 0x172   :  { %v1725_v47 = vmul.f32 %v1469_v32, %v1469_v32  ;;  %v496_v40 = vpop.f32.mrb[18].mxu1  ;;  %3633 = vmatpush1.bf16.msra.mxu0 %v3632_v8  ;;  %v3480_v8 = vpack.c.bf16 %v150_v22, %v142_v44 }
 0x173   :  { %v1476_v16 = vmax.f32 %v496_v40, 0.0  ;;  %v498_v17 = vpop.f32.mrb[19].mxu1  ;;  %878 = vmatmul.mubr.f32.gmra.mrb[124].mxu1 %v4761_v10  ;;  %3635 = vmatprep.subr.bf16.mxu0 %v3634_v41  ;;  %v166_v41 = vld [vmem:[#allocation5 + $0x170] sm:$0xff]  ;;  %v3650_v40 = vpack.c.bf16 %v2031_v1, %v2029_v34  ;;  %v2033_v10 = vld [vmem:[#allocation7 + $0x3a8] sm:$0xff] }
 0x174   :  { %v1477_v54 = vmax.f32 %v498_v17, 0.0  ;;  %2284 = vmatprep.mubr.f32.mxu0 %v1725_v47  ;;  %883 = vmatprep.mubr.f32.mxu1 %v4762_v27  ;;  %v183_v47 = vld [vmem:[#allocation5 + $0x1f8] sm:$0xff]  ;;  %v3998_v17 = vld [vmem:[#allocation2 + $0x28] sm:$0xff]  ;;  %v3484_v13 = vpack.c.bf16 %v166_v41, %v158_v48 }
 0x175   :  { %2285 = vmatmul.mubr.f32.gmra.mrb[16].mxu0 %v1724_v14  ;;  %v1732_v53 = vmul.f32 %v1476_v16, %v1476_v16  ;;  %v2030_v14 = vld [vmem:[#allocation7 + $0x390] sm:$0xff]  ;;  %v3486_v27 = vpack.c.bf16 %v183_v47, %v175_v31 }
 0x176   :  { %v1733_v21 = vmul.f32 %v1477_v54, %v1477_v54  ;;  %v502_v36 = vpop.f32.mrb[20].mxu1  ;;  %3637 = vmatpush1.bf16.msra.mxu0 %v3636_v50  ;;  %v2028_v50 = vld [vmem:[#allocation7 + $0x380] sm:$0xff] }
 0x177   :  { %v1484_v4 = vmax.f32 %v502_v36, 0.0  ;;  %v504_v6 = vpop.f32.mrb[21].mxu1  ;;  %884 = vmatmul.mubr.f32.gmra.mrb[126].mxu1 %v4763_v18  ;;  %3639 = vmatprep.subr.bf16.mxu0 %v3638_v43  ;;  %v2035_v43 = vld [vmem:[#allocation7 + $0x3b8] sm:$0xff]  ;;  %v3652_v15 = vpack.c.bf16 %v2030_v14, %v2028_v50  ;;  %v2034_v18 = vld [vmem:[#allocation7 + $0x3b0] sm:$0xff]  ;;  %v2045_v50 = vld [vmem:[#allocation7 + $0x408] sm:$0xff] }
 0x178   :  { %v1485_v49 = vmax.f32 %v504_v6, 0.0  ;;  %2290 = vmatprep.mubr.f32.mxu0 %v1733_v21  ;;  %954 = vmatprep.mubr.f32.mxu1 %v3994_v61  ;;  %v2032_v6 = vld [vmem:[#allocation7 + $0x3a0] sm:$0xff]  ;;  %v2047_v14 = vld [vmem:[#allocation7 + $0x418] sm:$0xff] }
 0x179   :  { %2291 = vmatmul.mubr.f32.gmra.mrb[18].mxu0 %v1732_v53  ;;  %v1740_v37 = vmul.f32 %v1484_v4, %v1484_v4  ;;  %v199_v53 = vld [vmem:[#allocation5 + $0x278] sm:$0xff]  ;;  %v3654_v4 = vpack.c.bf16 %v2035_v43, %v2033_v10 }
 0x17a   :  { %v1741_v26 = vmul.f32 %v1485_v49, %v1485_v49  ;;  %v508_v51 = vpop.f32.mrb[22].mxu1  ;;  %3641 = vmatpush1.bf16.msra.mxu0 %v3640_v46  ;;  %v3999_v46 = vld [vmem:[#allocation2 + $0x20] sm:$0xff]  ;;  %v3488_v49 = vpack.c.bf16 %v182_v55, %v174_v29  ;;  %v3490_v25 = vpack.c.bf16 %v199_v53, %v191_v56  ;;  %v4005_v56 = vld [vmem:[#allocation2 + $0x50] sm:$0xff] }
 0x17b   :  { %v1492_v57 = vmax.f32 %v508_v51, 0.0  ;;  %v510_v28 = vpop.f32.mrb[23].mxu1  ;;  %955 = vmatmul.mubr.f32.vlgmr.msra.gmra.mrb[128].mxu1 %v3995_v2  ;;  %3643 = vmatprep.subr.bf16.mxu0 %v3642_v42  ;;  %v4000_v42 = vld [vmem:[#allocation2 + $0x38] sm:$0xff]  ;;  %v2038_v2 = vld [vmem:[#allocation7 + $0x3d0] sm:$0xff] }
 0x17c   :  { %v1493_v24 = vmax.f32 %v510_v28, 0.0  ;;  %3477 = vmatpush1.bf16.msra.mxu1 %v3476_v0  ;;  %2296 = vmatprep.mubr.f32.mxu0 %v1741_v26  ;;  %v198_v26 = vld [vmem:[#allocation5 + $0x270] sm:$0xff]  ;;  %v207_v51 = vld [vmem:[#allocation5 + $0x2b8] sm:$0xff]  ;;  %v2036_v28 = vld [vmem:[#allocation7 + $0x3c0] sm:$0xff] }
 0x17d   :  { %2297 = vmatmul.mubr.f32.gmra.mrb[20].mxu0 %v1740_v37  ;;  %960 = vmatprep.mubr.f32.mxu1 %v3996_v30  ;;  %v1748_v32 = vmul.f32 %v1492_v57, %v1492_v57  ;;  %v215_v37 = vld [vmem:[#allocation5 + $0x2f8] sm:$0xff]  ;;  %v3658_v57 = vpack.c.bf16 %v2039_v62, %v2037_v45 }
 0x17e   :  { %v1749_v38 = vmul.f32 %v1493_v24, %v1493_v24  ;;  %v514_v12 = vpop.f32.mrb[24].mxu1  ;;  %3479 = vmatprep.subr.bf16.mxu1 %v3478_v33  ;;  %3645 = vmatpush1.bf16.msra.mxu0 %v3644_v52  ;;  %v3656_v33 = vpack.c.bf16 %v2034_v18, %v2032_v6  ;;  %v4001_v52 = vld [vmem:[#allocation2 + $0x30] sm:$0xff]  ;;  %v3492_v24 = vpack.c.bf16 %v198_v26, %v190_v63  ;;  %v4008_v26 = vld [vmem:[#allocation2 + $0x78] sm:$0xff] }
 0x17f   :  { %v1500_v9 = vmax.f32 %v514_v12, 0.0  ;;  %v516_v7 = vpop.f32.mrb[25].mxu1  ;;  %961 = vmatmul.mubr.f32.gmra.mrb[130].mxu1 %v3997_v11  ;;  %3647 = vmatprep.subr.bf16.mxu0 %v3646_v58  ;;  %v4002_v58 = vld [vmem:[#allocation2 + $0x48] sm:$0xff]  ;;  %v3494_v30 = vpack.c.bf16 %v215_v37, %v207_v51  ;;  %v223_v12 = vld [vmem:[#allocation5 + $0x338] sm:$0xff]  ;;  %v2042_v11 = vld [vmem:[#allocation7 + $0x3f0] sm:$0xff] }
 0x180   :  { %v1501_v16 = vmax.f32 %v516_v7, 0.0  ;;  %2302 = vmatprep.mubr.f32.mxu0 %v1749_v38  ;;  %966 = vmatprep.mubr.f32.mxu1 %v3998_v17  ;;  %v214_v38 = vld [vmem:[#allocation5 + $0x2f0] sm:$0xff]  ;;  %v2040_v7 = vld [vmem:[#allocation7 + $0x3e0] sm:$0xff] }
 0x181   :  { %2303 = vmatmul.mubr.f32.gmra.mrb[22].mxu0 %v1748_v32  ;;  %3481 = vmatpush1.bf16.msra.mxu1 %v3480_v8  ;;  %v1756_v21 = vmul.f32 %v1500_v9, %v1500_v9  ;;  %v206_v8 = vld [vmem:[#allocation5 + $0x2b0] sm:$0xff]  ;;  %v231_v32 = vld [vmem:[#allocation5 + $0x378] sm:$0xff]  ;;  %v3662_v9 = vpack.c.bf16 %v2043_v60, %v2041_v20  ;;  %v4496_v60 = vld [vmem:[#allocation2 + $0x88] sm:$0xff] }
 0x182   :  { %v1757_v19 = vmul.f32 %v1501_v16, %v1501_v16  ;;  %v520_v54 = vpop.f32.mrb[26].mxu1  ;;  %3483 = vmatprep.subr.bf16.mxu1 %v3482_v3  ;;  %3649 = vmatpush1.bf16.msra.mxu0 %v3648_v5  ;;  %v3660_v3 = vpack.c.bf16 %v2038_v2, %v2036_v28  ;;  %v4003_v5 = vld [vmem:[#allocation2 + $0x40] sm:$0xff]  ;;  %v3496_v16 = vpack.c.bf16 %v214_v38, %v206_v8  ;;  %v4493_v2 = vld [vmem:[#allocation2 + $0x70] sm:$0xff] }
 0x183   :  { %v1508_v36 = vmax.f32 %v520_v54, 0.0  ;;  %v522_v39 = vpop.f32.mrb[27].mxu1  ;;  %967 = vmatmul.mubr.f32.gmra.mrb[132].mxu1 %v3999_v46  ;;  %3651 = vmatprep.subr.bf16.mxu0 %v3650_v40  ;;  %v4004_v40 = vld [vmem:[#allocation2 + $0x58] sm:$0xff]  ;;  %v3498_v43 = vpack.c.bf16 %v231_v32, %v223_v12  ;;  %v3664_v54 = vpack.c.bf16 %v2042_v11, %v2040_v7  ;;  %v4006_v46 = vld [vmem:[#allocation2 + $0x68] sm:$0xff]  ;;  %v270_v8 = vld [vmem:[#allocation5 + $0x4b0] sm:$0xff] }
 0x184   :  { %v1509_v23 = vmax.f32 %v522_v39, 0.0  ;;  %2308 = vmatprep.mubr.f32.mxu0 %v1757_v19  ;;  %972 = vmatprep.mubr.f32.mxu1 %v4000_v42  ;;  %v230_v19 = vld [vmem:[#allocation5 + $0x370] sm:$0xff] }
 0x185   :  { %2309 = vmatmul.mubr.f32.gmra.mrb[24].mxu0 %v1756_v21  ;;  %3485 = vmatpush1.bf16.msra.mxu1 %v3484_v13  ;;  %v1764_v44 = vmul.f32 %v1508_v36, %v1508_v36  ;;  %v222_v13 = vld [vmem:[#allocation5 + $0x330] sm:$0xff]  ;;  %v247_v21 = vld [vmem:[#allocation5 + $0x3f8] sm:$0xff]  ;;  %v3666_v36 = vpack.c.bf16 %v2047_v14, %v2045_v50 }
 0x186   :  { %v1765_v61 = vmul.f32 %v1509_v23, %v1509_v23  ;;  %v526_v0 = vpop.f32.mrb[28].mxu1  ;;  %3487 = vmatprep.subr.bf16.mxu1 %v3486_v27  ;;  %3653 = vmatpush1.bf16.msra.mxu0 %v3652_v15  ;;  %v239_v15 = vld [vmem:[#allocation5 + $0x3b8] sm:$0xff]  ;;  %v3500_v53 = vpack.c.bf16 %v230_v19, %v222_v13  ;;  %v238_v23 = vld [vmem:[#allocation5 + $0x3b0] sm:$0xff] }
 0x187   :  { %v1516_v22 = vmax.f32 %v526_v0, 0.0  ;;  %v528_v35 = vpop.f32.mrb[29].mxu1  ;;  %973 = vmatmul.mubr.f32.gmra.mrb[134].mxu1 %v4001_v52  ;;  %3655 = vmatprep.subr.bf16.mxu0 %v3654_v4  ;;  %v3502_v18 = vpack.c.bf16 %v247_v21, %v239_v15  ;;  %v246_v42 = vld [vmem:[#allocation5 + $0x3f0] sm:$0xff]  ;;  %v255_v0 = vld [vmem:[#allocation5 + $0x438] sm:$0xff] }
 0x188   :  { %v1517_v59 = vmax.f32 %v528_v35, 0.0  ;;  %2314 = vmatprep.mubr.f32.mxu0 %v1765_v61  ;;  %978 = vmatprep.mubr.f32.mxu1 %v4002_v58  ;;  %v4007_v61 = vld [vmem:[#allocation2 + $0x60] sm:$0xff]  ;;  %v3504_v51 = vpack.c.bf16 %v246_v42, %v238_v23  ;;  %v254_v35 = vld [vmem:[#allocation5 + $0x430] sm:$0xff]  ;;  %v279_v58 = vld [vmem:[#allocation5 + $0x4f8] sm:$0xff] }
 0x189   :  { %2315 = vmatmul.mubr.f32.gmra.mrb[26].mxu0 %v1764_v44  ;;  %3489 = vmatpush1.bf16.msra.mxu1 %v3488_v49  ;;  %v1772_v48 = vmul.f32 %v1516_v22, %v1516_v22  ;;  %v262_v52 = vld [vmem:[#allocation5 + $0x470] sm:$0xff]  ;;  %v303_v13 = vld [vmem:[#allocation5 + $0x5b8] sm:$0xff] }
 0x18a   :  { %v1773_v34 = vmul.f32 %v1517_v59, %v1517_v59  ;;  %v532_v1 = vpop.f32.mrb[30].mxu1  ;;  %3491 = vmatprep.subr.bf16.mxu1 %v3490_v25  ;;  %3657 = vmatpush1.bf16.msra.mxu0 %v3656_v33  ;;  %v263_v25 = vld [vmem:[#allocation5 + $0x478] sm:$0xff]  ;;  %v278_v38 = vld [vmem:[#allocation5 + $0x4f0] sm:$0xff] }
 0x18b   :  { %v1524_v41 = vmax.f32 %v532_v1, 0.0  ;;  %v534_v31 = vpop.f32.mrb[31].mxu1  ;;  %979 = vmatmul.mubr.f32.gmra.mrb[136].mxu1 %v4003_v5  ;;  %3659 = vmatprep.subr.bf16.mxu0 %v3658_v57  ;;  %v3506_v22 = vpack.c.bf16 %v263_v25, %v255_v0  ;;  %v271_v59 = vld [vmem:[#allocation5 + $0x4b8] sm:$0xff]  ;;  %v3512_v7 = vpack.c.bf16 %v278_v38, %v270_v8  ;;  %v286_v50 = vld [vmem:[#allocation5 + $0x530] sm:$0xff] }
 0x18c   :  { %v1525_v47 = vmax.f32 %v534_v31, 0.0  ;;  %2320 = vmatprep.mubr.f32.mxu0 %v1773_v34  ;;  %984 = vmatprep.mubr.f32.mxu1 %v4004_v40  ;;  %v287_v31 = vld [vmem:[#allocation5 + $0x538] sm:$0xff]  ;;  %v294_v14 = vld [vmem:[#allocation5 + $0x570] sm:$0xff] }
 0x18d   :  { %2321 = vmatmul.mubr.f32.gmra.mrb[28].mxu0 %v1772_v48  ;;  %3493 = vmatpush1.bf16.msra.mxu1 %v3492_v24  ;;  %v1780_v27 = vmul.f32 %v1524_v41, %v1524_v41  ;;  %v3508_v24 = vpack.c.bf16 %v262_v52, %v254_v35  ;;  %v4499_v41 = vld [vmem:[#allocation2 + $0x80] sm:$0xff]  ;;  %v295_v5 = vld [vmem:[#allocation5 + $0x578] sm:$0xff]  ;;  %v302_v21 = vld [vmem:[#allocation5 + $0x5b0] sm:$0xff] }
 0x18e   :  { %v1781_v17 = vmul.f32 %v1525_v47, %v1525_v47  ;;  %v538_v10 = vpop.f32.mrb[32].mxu1  ;;  %3495 = vmatprep.subr.bf16.mxu1 %v3494_v30  ;;  %3661 = vmatpush1.bf16.msra.mxu0 %v3660_v3  ;;  %v3510_v30 = vpack.c.bf16 %v279_v58, %v271_v59  ;;  %v3514_v40 = vpack.c.bf16 %v295_v5, %v287_v31  ;;  %v311_v19 = vld [vmem:[#allocation5 + $0x5f8] sm:$0xff]  ;;  %v318_v0 = vld [vmem:[#allocation5 + $0x630] sm:$0xff]  ;;  %v4520_v52 = vld [vmem:[#allocation2 + $0xc8] sm:$0xff] }
 0x18f   :  { %v1532_v29 = vmax.f32 %v538_v10, 0.0  ;;  %v540_v55 = vpop.f32.mrb[33].mxu1  ;;  %985 = vmatmul.mubr.f32.gmra.mrb[138].mxu1 %v4005_v56  ;;  %3663 = vmatprep.subr.bf16.mxu0 %v3662_v9  ;;  %v4502_v9 = vld [vmem:[#allocation2 + $0x98] sm:$0xff]  ;;  %v3518_v15 = vpack.c.bf16 %v311_v19, %v303_v13  ;;  %v326_v25 = vld [vmem:[#allocation5 + $0x670] sm:$0xff]  ;;  %v4532_v13 = vld [vmem:[#allocation2 + $0xe8] sm:$0xff] }
 0x190   :  { %v1533_v39 = vmax.f32 %v540_v55, 0.0  ;;  %2326 = vmatprep.mubr.f32.mxu0 %v1781_v17  ;;  %990 = vmatprep.mubr.f32.mxu1 %v4006_v46  ;;  %v4514_v42 = vld [vmem:[#allocation2 + $0xb8] sm:$0xff]  ;;  %v334_v58 = vld [vmem:[#allocation5 + $0x6b0] sm:$0xff] }
 0x191   :  { %2327 = vmatmul.mubr.f32.gmra.mrb[30].mxu0 %v1780_v27  ;;  %3497 = vmatpush1.bf16.msra.mxu1 %v3496_v16  ;;  %v1788_v45 = vmul.f32 %v1532_v29, %v1532_v29  ;;  %v4508_v27 = vld [vmem:[#allocation2 + $0xa8] sm:$0xff]  ;;  %v3516_v29 = vpack.c.bf16 %v294_v14, %v286_v50  ;;  %v351_v8 = vld [vmem:[#allocation5 + $0x738] sm:$0xff]  ;;  %v4529_v14 = vld [vmem:[#allocation2 + $0xd0] sm:$0xff] }
 0x192   :  { %v1789_v4 = vmul.f32 %v1533_v39, %v1533_v39  ;;  %v544_v6 = vpop.f32.mrb[34].mxu1  ;;  %3499 = vmatprep.subr.bf16.mxu1 %v3498_v43  ;;  %3665 = vmatpush1.bf16.msra.mxu0 %v3664_v54  ;;  %v4505_v43 = vld [vmem:[#allocation2 + $0x90] sm:$0xff]  ;;  %v359_v38 = vld [vmem:[#allocation5 + $0x778] sm:$0xff] }
 0x193   :  { %v1540_v62 = vmax.f32 %v544_v6, 0.0  ;;  %v546_v49 = vpop.f32.mrb[35].mxu1  ;;  %991 = vmatmul.mubr.f32.gmra.mrb[140].mxu1 %v4007_v61  ;;  %3667 = vmatprep.subr.bf16.mxu0 %v3666_v36  ;;  %v310_v36 = vld [vmem:[#allocation5 + $0x5f0] sm:$0xff]  ;;  %v319_v6 = vld [vmem:[#allocation5 + $0x638] sm:$0xff] }
 0x194   :  { %v1541_v63 = vmax.f32 %v546_v49, 0.0  ;;  %2332 = vmatprep.mubr.f32.mxu0 %v1789_v4  ;;  %996 = vmatprep.mubr.f32.mxu1 %v4008_v26  ;;  %v4511_v4 = vld [vmem:[#allocation2 + $0xa0] sm:$0xff] }
 0x195   :  { %2333 = vmatmul.mubr.f32.gmra.mrb[32].mxu0 %v1788_v45  ;;  %3501 = vmatpush1.bf16.msra.mxu1 %v3500_v53  ;;  %v1796_v37 = vmul.f32 %v1540_v62, %v1540_v62  ;;  %v3520_v45 = vpack.c.bf16 %v310_v36, %v302_v21 }
 0x196   :  { %v1797_v33 = vmul.f32 %v1541_v63, %v1541_v63  ;;  %v550_v44 = vpop.f32.mrb[36].mxu1  ;;  %3503 = vmatprep.subr.bf16.mxu1 %v3502_v18  ;;  %v327_v18 = vld [vmem:[#allocation5 + $0x678] sm:$0xff] }
 0x197   :  { %v1548_v57 = vmax.f32 %v550_v44, 0.0  ;;  %v552_v28 = vpop.f32.mrb[37].mxu1  ;;  %997 = vmatmul.mubr.f32.gmra.mrb[142].mxu1 %v4493_v2  ;;  %v3522_v61 = vpack.c.bf16 %v327_v18, %v319_v6  ;;  %v335_v44 = vld [vmem:[#allocation5 + $0x6b8] sm:$0xff] }
 0x198   :  { %v1549_v20 = vmax.f32 %v552_v28, 0.0  ;;  %2338 = vmatprep.mubr.f32.mxu0 %v1797_v33  ;;  %1002 = vmatprep.mubr.f32.mxu1 %v4496_v60  ;;  %v4517_v33 = vld [vmem:[#allocation2 + $0xb0] sm:$0xff]  ;;  %v4538_v6 = vld [vmem:[#allocation2 + $0xf8] sm:$0xff] }
 0x199   :  { %2339 = vmatmul.mubr.f32.gmra.mrb[34].mxu0 %v1796_v37  ;;  %3505 = vmatpush1.bf16.msra.mxu1 %v3504_v51  ;;  %v1804_v12 = vmul.f32 %v1548_v57, %v1548_v57  ;;  %v3524_v37 = vpack.c.bf16 %v326_v25, %v318_v0  ;;  %v4541_v0 = vld [vmem:[#allocation2 + $0xf0] sm:$0xff] }
 0x19a   :  { %v1805_v34 = vmul.f32 %v1549_v20, %v1549_v20  ;;  %v556_v1 = vpop.f32.mrb[38].mxu1  ;;  %3507 = vmatprep.subr.bf16.mxu1 %v3506_v22  ;;  %v343_v22 = vld [vmem:[#allocation5 + $0x6f8] sm:$0xff]  ;;  %v342_v20 = vld [vmem:[#allocation5 + $0x6f0] sm:$0xff] }
 0x19b   :  { %v1556_v3 = vmax.f32 %v556_v1, 0.0  ;;  %v558_v48 = vpop.f32.mrb[39].mxu1  ;;  %1003 = vmatmul.mubr.f32.gmra.mrb[144].mxu1 %v4499_v41  ;;  %v3526_v59 = vpack.c.bf16 %v343_v22, %v335_v44 }
 0x19c   :  { %v1557_v32 = vmax.f32 %v558_v48, 0.0  ;;  %2344 = vmatprep.mubr.f32.mxu0 %v1805_v34  ;;  %1008 = vmatprep.mubr.f32.mxu1 %v4502_v9  ;;  %v3528_v48 = vpack.c.bf16 %v342_v20, %v334_v58 }
 0x19d   :  { %2345 = vmatmul.mubr.f32.gmra.mrb[36].mxu0 %v1804_v12  ;;  %3509 = vmatpush1.bf16.msra.mxu1 %v3508_v24  ;;  %v1812_v16 = vmul.f32 %v1556_v3, %v1556_v3  ;;  %v4526_v3 = vld [vmem:[#allocation2 + $0xd8] sm:$0xff] }
 0x19e   :  { %v1813_v11 = vmul.f32 %v1557_v32, %v1557_v32  ;;  %v562_v47 = vpop.f32.mrb[40].mxu1  ;;  %3511 = vmatprep.subr.bf16.mxu1 %v3510_v30  ;;  %v4523_v30 = vld [vmem:[#allocation2 + $0xc0] sm:$0xff]  ;;  %v3530_v32 = vpack.c.bf16 %v359_v38, %v351_v8  ;;  %v4556_v38 = vld [vmem:[#allocation2 + $0x128] sm:$0xff] }
 0x19f   :  { %v1564_v17 = vmax.f32 %v562_v47, 0.0  ;;  %v564_v10 = vpop.f32.mrb[41].mxu1  ;;  %1009 = vmatmul.mubr.f32.gmra.mrb[146].mxu1 %v4505_v43 }
 0x1a0   :  { %v1565_v54 = vmax.f32 %v564_v10, 0.0  ;;  %2350 = vmatprep.mubr.f32.mxu0 %v1813_v11  ;;  %1014 = vmatprep.mubr.f32.mxu1 %v4508_v27  ;;  %v358_v11 = vld [vmem:[#allocation5 + $0x770] sm:$0xff] }
 0x1a1   :  { %2351 = vmatmul.mubr.f32.gmra.mrb[38].mxu0 %v1812_v16  ;;  %3513 = vmatpush1.bf16.msra.mxu1 %v3512_v7  ;;  %v1820_v39 = vmul.f32 %v1564_v17, %v1564_v17  ;;  %v350_v7 = vld [vmem:[#allocation5 + $0x730] sm:$0xff]  ;;  %v367_v16 = vld [vmem:[#allocation5 + $0x7b8] sm:$0xff] }
 0x1a2   :  { %v1821_v55 = vmul.f32 %v1565_v54, %v1565_v54  ;;  %v568_v56 = vpop.f32.mrb[42].mxu1  ;;  %3515 = vmatprep.subr.bf16.mxu1 %v3514_v40  ;;  %v375_v17 = vld [vmem:[#allocation5 + $0x7f8] sm:$0xff]  ;;  %v3532_v19 = vpack.c.bf16 %v358_v11, %v350_v7  ;;  %v4559_v7 = vld [vmem:[#allocation2 + $0x120] sm:$0xff] }
 0x1a3   :  { %v1572_v46 = vmax.f32 %v568_v56, 0.0  ;;  %v570_v53 = vpop.f32.mrb[43].mxu1  ;;  %1015 = vmatmul.mubr.f32.gmra.mrb[148].mxu1 %v4511_v4  ;;  %v366_v56 = vld [vmem:[#allocation5 + $0x7b0] sm:$0xff] }
 0x1a4   :  { %v1573_v23 = vmax.f32 %v570_v53, 0.0  ;;  %2356 = vmatprep.mubr.f32.mxu0 %v1821_v55  ;;  %1020 = vmatprep.mubr.f32.mxu1 %v4514_v42  ;;  %v3534_v55 = vpack.c.bf16 %v375_v17, %v367_v16 }
 0x1a5   :  { %2357 = vmatmul.mubr.f32.gmra.mrb[40].mxu0 %v1820_v39  ;;  %3517 = vmatpush1.bf16.msra.mxu1 %v3516_v29  ;;  %v1828_v63 = vmul.f32 %v1572_v46, %v1572_v46  ;;  %v4535_v46 = vld [vmem:[#allocation2 + $0xe0] sm:$0xff] }
 0x1a6   :  { %v1829_v62 = vmul.f32 %v1573_v23, %v1573_v23  ;;  %v574_v49 = vpop.f32.mrb[44].mxu1  ;;  %3519 = vmatprep.subr.bf16.mxu1 %v3518_v15  ;;  %v374_v15 = vld [vmem:[#allocation5 + $0x7f0] sm:$0xff] }
 0x1a7   :  { %v1580_v26 = vmax.f32 %v574_v49, 0.0  ;;  %v576_v51 = vpop.f32.mrb[45].mxu1  ;;  %1021 = vmatmul.mubr.f32.gmra.mrb[150].mxu1 %v4517_v33  ;;  %v3536_v18 = vpack.c.bf16 %v374_v15, %v366_v56 }
 0x1a8   :  { %v1581_v35 = vmax.f32 %v576_v51, 0.0  ;;  %2362 = vmatprep.mubr.f32.mxu0 %v1829_v62  ;;  %1026 = vmatprep.mubr.f32.mxu1 %v4520_v52 }
 0x1a9   :  { %2363 = vmatmul.mubr.f32.gmra.mrb[42].mxu0 %v1828_v63  ;;  %3521 = vmatpush1.bf16.msra.mxu1 %v3520_v45  ;;  %v1836_v24 = vmul.f32 %v1580_v26, %v1580_v26  ;;  %v4544_v63 = vld [vmem:[#allocation2 + $0x108] sm:$0xff] }
 0x1aa   :  { %v1837_v57 = vmul.f32 %v1581_v35, %v1581_v35  ;;  %v580_v28 = vpop.f32.mrb[46].mxu1  ;;  %3523 = vmatprep.subr.bf16.mxu1 %v3522_v61 }
 0x1ab   :  { %v1588_v34 = vmax.f32 %v580_v28, 0.0  ;;  %v582_v1 = vpop.f32.mrb[47].mxu1  ;;  %1027 = vmatmul.mubr.f32.gmra.mrb[152].mxu1 %v4523_v30  ;;  %v4550_v28 = vld [vmem:[#allocation2 + $0x118] sm:$0xff] }
 0x1ac   :  { %v1589_v12 = vmax.f32 %v582_v1, 0.0  ;;  %2368 = vmatprep.mubr.f32.mxu0 %v1837_v57  ;;  %1032 = vmatprep.mubr.f32.mxu1 %v4526_v3  ;;  %v4553_v1 = vld [vmem:[#allocation2 + $0x110] sm:$0xff] }
 0x1ad   :  { %2369 = vmatmul.mubr.f32.gmra.mrb[44].mxu0 %v1836_v24  ;;  %3525 = vmatpush1.bf16.msra.mxu1 %v3524_v37  ;;  %v1844_v47 = vmul.f32 %v1588_v34, %v1588_v34  ;;  %v4547_v37 = vld [vmem:[#allocation2 + $0x100] sm:$0xff] }
 0x1ae   :  { %v1845_v31 = vmul.f32 %v1589_v12, %v1589_v12  ;;  %v586_v5 = vpop.f32.mrb[48].mxu1  ;;  %3527 = vmatprep.subr.bf16.mxu1 %v3526_v59 }
 0x1af   :  { %v1596_v40 = vmax.f32 %v586_v5, 0.0  ;;  %v588_v50 = vpop.f32.mrb[49].mxu1  ;;  %1033 = vmatmul.mubr.f32.gmra.mrb[154].mxu1 %v4529_v14 }
 0x1b0   :  { %v1597_v10 = vmax.f32 %v588_v50, 0.0  ;;  %2374 = vmatprep.mubr.f32.mxu0 %v1845_v31  ;;  %1038 = vmatprep.mubr.f32.mxu1 %v4532_v13 }
 0x1b1   :  { %2375 = vmatmul.mubr.f32.gmra.mrb[46].mxu0 %v1844_v47  ;;  %3529 = vmatpush1.bf16.msra.mxu1 %v3528_v48  ;;  %v1852_v21 = vmul.f32 %v1596_v40, %v1596_v40  ;;  %v4562_v47 = vld [vmem:[#allocation2 + $0x138] sm:$0xff] }
 0x1b2   :  { %v1853_v54 = vmul.f32 %v1597_v10, %v1597_v10  ;;  %v592_v29 = vpop.f32.mrb[50].mxu1  ;;  %3531 = vmatprep.subr.bf16.mxu1 %v3530_v32 }
 0x1b3   :  { %v1604_v36 = vmax.f32 %v592_v29, 0.0  ;;  %v594_v39 = vpop.f32.mrb[51].mxu1  ;;  %1039 = vmatmul.mubr.f32.gmra.mrb[156].mxu1 %v4535_v46  ;;  %v4568_v29 = vld [vmem:[#allocation2 + $0x148] sm:$0xff] }
 0x1b4   :  { %v1605_v53 = vmax.f32 %v594_v39, 0.0  ;;  %2380 = vmatprep.mubr.f32.mxu0 %v1853_v54  ;;  %1044 = vmatprep.mubr.f32.mxu1 %v4538_v6  ;;  %v4571_v39 = vld [vmem:[#allocation2 + $0x140] sm:$0xff] }
 0x1b5   :  { %2381 = vmatmul.mubr.f32.gmra.mrb[48].mxu0 %v1852_v21  ;;  %3533 = vmatpush1.bf16.msra.mxu1 %v3532_v19  ;;  %v1860_v62 = vmul.f32 %v1604_v36, %v1604_v36  ;;  %v4565_v19 = vld [vmem:[#allocation2 + $0x130] sm:$0xff] }
 0x1b6   :  { %v1861_v23 = vmul.f32 %v1605_v53, %v1605_v53  ;;  %v598_v45 = vpop.f32.mrb[52].mxu1  ;;  %3535 = vmatprep.subr.bf16.mxu1 %v3534_v55 }
 0x1b7   :  { %v1612_v49 = vmax.f32 %v598_v45, 0.0  ;;  %v600_v61 = vpop.f32.mrb[53].mxu1  ;;  %1045 = vmatmul.mubr.f32.gmra.mrb[158].mxu1 %v4541_v0 }
 0x1b8   :  { %v1613_v25 = vmax.f32 %v600_v61, 0.0  ;;  %2386 = vmatprep.mubr.f32.mxu0 %v1861_v23  ;;  %1050 = vmatprep.mubr.f32.mxu1 %v4544_v63 }
 0x1b9   :  { %2387 = vmatmul.mubr.f32.gmra.mrb[50].mxu0 %v1860_v62  ;;  %3537 = vmatpush1.bf16.msra.mxu1 %v3536_v18  ;;  %v1868_v44 = vmul.f32 %v1612_v49, %v1612_v49  ;;  %v4574_v18 = vld [vmem:[#allocation2 + $0x158] sm:$0xff] }
 0x1ba   :  { %v1869_v26 = vmul.f32 %v1613_v25, %v1613_v25  ;;  %v604_v51 = vpop.f32.mrb[54].mxu1  ;;  %v4577_v25 = vld [vmem:[#allocation2 + $0x150] sm:$0xff] }
 0x1bb   :  { %v1620_v22 = vmax.f32 %v604_v51, 0.0  ;;  %v606_v35 = vpop.f32.mrb[55].mxu1  ;;  %1051 = vmatmul.mubr.f32.gmra.mrb[160].mxu1 %v4547_v37  ;;  %v2046_v51 = vld [vmem:[#allocation7 + $0x410] sm:$0xff] }
 0x1bc   :  { %v1621_v57 = vmax.f32 %v606_v35, 0.0  ;;  %2392 = vmatprep.mubr.f32.mxu0 %v1869_v26  ;;  %1056 = vmatprep.mubr.f32.mxu1 %v4550_v28  ;;  %v2044_v26 = vld [vmem:[#allocation7 + $0x400] sm:$0xff]  ;;  %v2049_v35 = vld [vmem:[#allocation7 + $0x428] sm:$0xff] }
 0x1bd   :  { %2393 = vmatmul.mubr.f32.gmra.mrb[52].mxu0 %v1868_v44  ;;  %v1876_v20 = vmul.f32 %v1620_v22, %v1620_v22  ;;  %v4580_v22 = vld [vmem:[#allocation2 + $0x168] sm:$0xff] }
 0x1be   :  { %v1877_v59 = vmul.f32 %v1621_v57, %v1621_v57  ;;  %v610_v58 = vpop.f32.mrb[56].mxu1  ;;  %v2051_v57 = vld [vmem:[#allocation7 + $0x438] sm:$0xff] }
 0x1bf   :  { %v1628_v24 = vmax.f32 %v610_v58, 0.0  ;;  %v612_v34 = vpop.f32.mrb[57].mxu1  ;;  %1057 = vmatmul.mubr.f32.gmra.mrb[162].mxu1 %v4553_v1 }
 0x1c0   :  { %v1629_v8 = vmax.f32 %v612_v34, 0.0  ;;  %2398 = vmatprep.mubr.f32.mxu0 %v1877_v59  ;;  %1062 = vmatprep.mubr.f32.mxu1 %v4556_v38 }
 0x1c1   :  { %2399 = vmatmul.mubr.f32.gmra.mrb[54].mxu0 %v1876_v20  ;;  %v1884_v31 = vmul.f32 %v1628_v24, %v1628_v24  ;;  %v3668_v20 = vpack.c.bf16 %v2046_v51, %v2044_v26 }
 0x1c2   :  { %v1885_v12 = vmul.f32 %v1629_v8, %v1629_v8  ;;  %v616_v48 = vpop.f32.mrb[58].mxu1 }
 0x1c3   :  { %v1636_v5 = vmax.f32 %v616_v48, 0.0  ;;  %v618_v32 = vpop.f32.mrb[59].mxu1  ;;  %1063 = vmatmul.mubr.f32.gmra.mrb[164].mxu1 %v4559_v7  ;;  %v3670_v48 = vpack.c.bf16 %v2051_v57, %v2049_v35 }
 0x1c4   :  { %v1637_v11 = vmax.f32 %v618_v32, 0.0  ;;  %2404 = vmatprep.mubr.f32.mxu0 %v1885_v12  ;;  %1068 = vmatprep.mubr.f32.mxu1 %v4562_v47  ;;  %v4583_v12 = vld [vmem:[#allocation2 + $0x160] sm:$0xff] }
 0x1c5   :  { %2405 = vmatmul.mubr.f32.gmra.mrb[56].mxu0 %v1884_v31  ;;  %v1892_v16 = vmul.f32 %v1636_v5, %v1636_v5  ;;  %v2048_v31 = vld [vmem:[#allocation7 + $0x420] sm:$0xff]  ;;  %v2050_v5 = vld [vmem:[#allocation7 + $0x430] sm:$0xff] }
 0x1c6   :  { %v1893_v40 = vmul.f32 %v1637_v11, %v1637_v11  ;;  %v622_v50 = vpop.f32.mrb[60].mxu1  ;;  %v4586_v11 = vld [vmem:[#allocation2 + $0x178] sm:$0xff] }
 0x1c7   :  { %v1644_v17 = vmax.f32 %v622_v50, 0.0  ;;  %v624_v10 = vpop.f32.mrb[61].mxu1  ;;  %1069 = vmatmul.mubr.f32.gmra.mrb[166].mxu1 %v4565_v19  ;;  %v2055_v50 = vld [vmem:[#allocation7 + $0x458] sm:$0xff] }
 0x1c8   :  { %v1645_v54 = vmax.f32 %v624_v10, 0.0  ;;  %2410 = vmatprep.mubr.f32.mxu0 %v1893_v40  ;;  %1074 = vmatprep.mubr.f32.mxu1 %v4568_v29  ;;  %v2053_v40 = vld [vmem:[#allocation7 + $0x448] sm:$0xff]  ;;  %v3672_v10 = vpack.c.bf16 %v2050_v5, %v2048_v31  ;;  %v2063_v31 = vld [vmem:[#allocation7 + $0x498] sm:$0xff] }
 0x1c9   :  { %2411 = vmatmul.mubr.f32.gmra.mrb[58].mxu0 %v1892_v16  ;;  %v1900_v15 = vmul.f32 %v1644_v17, %v1644_v17 }
 0x1ca   :  { %v1901_v55 = vmul.f32 %v1645_v54, %v1645_v54  ;;  %v628_v56 = vpop.f32.mrb[62].mxu1 }
 0x1cb   :  { %v1652_v21 = vmax.f32 %v628_v56, 0.0  ;;  %v630_v36 = vpop.f32.mrb[63].mxu1  ;;  %1075 = vmatmul.mubr.f32.gmra.mrb[168].mxu1 %v4571_v39 }
 0x1cc   :  { %v1653_v53 = vmax.f32 %v630_v36, 0.0  ;;  %2416 = vmatprep.mubr.f32.mxu0 %v1901_v55  ;;  %1080 = vmatprep.mubr.f32.mxu1 %v4574_v18  ;;  %v2052_v36 = vld [vmem:[#allocation7 + $0x440] sm:$0xff] }
 0x1cd   :  { %2417 = vmatmul.mubr.f32.gmra.mrb[60].mxu0 %v1900_v15  ;;  %v1908_v62 = vmul.f32 %v1652_v21, %v1652_v21  ;;  %v4589_v15 = vld [vmem:[#allocation2 + $0x170] sm:$0xff]  ;;  %v3674_v21 = vpack.c.bf16 %v2055_v50, %v2053_v40 }
 0x1ce   :  { %v1909_v23 = vmul.f32 %v1653_v53, %v1653_v53  ;;  %v699_v45 = vpop.f32.mrb[64].mxu1  ;;  %v2054_v53 = vld [vmem:[#allocation7 + $0x450] sm:$0xff] }
 0x1cf   :  { %v1406_v49 = vmax.f32 %v699_v45, 0.0  ;;  %v701_v61 = vpop.f32.mrb[65].mxu1  ;;  %1081 = vmatmul.mubr.f32.gmra.mrb[170].mxu1 %v4577_v25  ;;  %v4592_v45 = vld [vmem:[#allocation2 + $0x188] sm:$0xff]  ;;  %v3676_v51 = vpack.c.bf16 %v2054_v53, %v2052_v36 }
 0x1d0   :  { %v1407_v44 = vmax.f32 %v701_v61, 0.0  ;;  %2422 = vmatprep.mubr.f32.mxu0 %v1909_v23  ;;  %1086 = vmatprep.mubr.f32.mxu1 %v4580_v22  ;;  %v4604_v36 = vld [vmem:[#allocation2 + $0x1a8] sm:$0xff] }
 0x1d1   :  { %2423 = vmatmul.mubr.f32.gmra.mrb[62].mxu0 %v1908_v62  ;;  %v1662_v24 = vmul.f32 %v1406_v49, %v1406_v49  ;;  %v2057_v62 = vld [vmem:[#allocation7 + $0x468] sm:$0xff]  ;;  %v2059_v49 = vld [vmem:[#allocation7 + $0x478] sm:$0xff] }
 0x1d2   :  { %v1663_v59 = vmul.f32 %v1407_v44, %v1407_v44  ;;  %v705_v58 = vpop.f32.mrb[66].mxu1  ;;  %v2065_v53 = vld [vmem:[#allocation7 + $0x4a8] sm:$0xff] }
 0x1d3   :  { %v1414_v34 = vmax.f32 %v705_v58, 0.0  ;;  %v707_v8 = vpop.f32.mrb[67].mxu1  ;;  %1087 = vmatmul.mubr.f32.gmra.mrb[172].mxu1 %v4583_v12  ;;  %v3678_v58 = vpack.c.bf16 %v2059_v49, %v2057_v62 }
 0x1d4   :  { %v1415_v32 = vmax.f32 %v707_v8, 0.0  ;;  %2493 = vmatprep.mubr.f32.mxu0 %v1663_v59  ;;  %1092 = vmatprep.mubr.f32.mxu1 %v4586_v11  ;;  %v4595_v59 = vld [vmem:[#allocation2 + $0x180] sm:$0xff]  ;;  %v4598_v8 = vld [vmem:[#allocation2 + $0x198] sm:$0xff] }
 0x1d5   :  { %2494 = vmatmul.mubr.f32.vlgmr.msra.gmra.mrb[0].mxu0 %v1662_v24  ;;  %v1670_v54 = vmul.f32 %v1414_v34, %v1414_v34  ;;  %v2058_v24 = vld [vmem:[#allocation7 + $0x470] sm:$0xff] }
 0x1d6   :  { %v1671_v16 = vmul.f32 %v1415_v32, %v1415_v32  ;;  %v711_v17 = vpop.f32.mrb[68].mxu1  ;;  %3669 = vmatpush1.bf16.msra.mxu0 %v3668_v20  ;;  %v2056_v20 = vld [vmem:[#allocation7 + $0x460] sm:$0xff] }
 0x1d7   :  { %v1422_v55 = vmax.f32 %v711_v17, 0.0  ;;  %v713_v56 = vpop.f32.mrb[69].mxu1  ;;  %1093 = vmatmul.mubr.f32.gmra.mrb[174].mxu1 %v4589_v15  ;;  %3671 = vmatprep.subr.bf16.mxu0 %v3670_v48  ;;  %v2061_v48 = vld [vmem:[#allocation7 + $0x488] sm:$0xff]  ;;  %v3680_v40 = vpack.c.bf16 %v2058_v24, %v2056_v20  ;;  %v2066_v20 = vld [vmem:[#allocation7 + $0x4b0] sm:$0xff] }
 0x1d8   :  { %v1423_v23 = vmax.f32 %v713_v56, 0.0  ;;  %2499 = vmatprep.mubr.f32.mxu0 %v1671_v16  ;;  %1098 = vmatprep.mubr.f32.mxu1 %v4592_v45  ;;  %v2062_v56 = vld [vmem:[#allocation7 + $0x490] sm:$0xff] }
 0x1d9   :  { %2500 = vmatmul.mubr.f32.gmra.mrb[2].mxu0 %v1670_v54  ;;  %v1678_v44 = vmul.f32 %v1422_v55, %v1422_v55  ;;  %v3682_v54 = vpack.c.bf16 %v2063_v31, %v2061_v48  ;;  %v2060_v55 = vld [vmem:[#allocation7 + $0x480] sm:$0xff]  ;;  %v2069_v48 = vld [vmem:[#allocation7 + $0x4c8] sm:$0xff]  ;;  %v2071_v31 = vld [vmem:[#allocation7 + $0x4d8] sm:$0xff] }
 0x1da   :  { %v1679_v61 = vmul.f32 %v1423_v23, %v1423_v23  ;;  %v717_v26 = vpop.f32.mrb[70].mxu1  ;;  %3673 = vmatpush1.bf16.msra.mxu0 %v3672_v10  ;;  %v4601_v10 = vld [vmem:[#allocation2 + $0x190] sm:$0xff]  ;;  %v2067_v23 = vld [vmem:[#allocation7 + $0x4b8] sm:$0xff] }
 0x1db   :  { %v1430_v35 = vmax.f32 %v717_v26, 0.0  ;;  %v719_v57 = vpop.f32.mrb[71].mxu1  ;;  %1099 = vmatmul.mubr.f32.gmra.mrb[176].mxu1 %v4595_v59  ;;  %3675 = vmatprep.subr.bf16.mxu0 %v3674_v21 }
 0x1dc   :  { %v1431_v34 = vmax.f32 %v719_v57, 0.0  ;;  %2505 = vmatprep.mubr.f32.mxu0 %v1679_v61  ;;  %1104 = vmatprep.mubr.f32.mxu1 %v4598_v8  ;;  %v3684_v61 = vpack.c.bf16 %v2062_v56, %v2060_v55  ;;  %v3686_v57 = vpack.c.bf16 %v2067_v23, %v2065_v53  ;;  %v3690_v55 = vpack.c.bf16 %v2071_v31, %v2069_v48  ;;  %v2068_v56 = vld [vmem:[#allocation7 + $0x4c0] sm:$0xff]  ;;  %v4616_v23 = vld [vmem:[#allocation2 + $0x1c8] sm:$0xff]  ;;  %v2074_v31 = vld [vmem:[#allocation7 + $0x4f0] sm:$0xff] }
 0x1dd   :  { %2506 = vmatmul.mubr.f32.gmra.mrb[4].mxu0 %v1678_v44  ;;  %v1686_v50 = vmul.f32 %v1430_v35, %v1430_v35  ;;  %v4607_v35 = vld [vmem:[#allocation2 + $0x1a0] sm:$0xff]  ;;  %4764 = vst [vmem:[#allocation12_spill] sm:$0xff] %v4616_v23 }
 0x1de   :  { %v1687_v5 = vmul.f32 %v1431_v34, %v1431_v34  ;;  %v723_v32 = vpop.f32.mrb[72].mxu1  ;;  %3677 = vmatpush1.bf16.msra.mxu0 %v3676_v51  ;;  %v4610_v34 = vld [vmem:[#allocation2 + $0x1b8] sm:$0xff]  ;;  %v2072_v48 = vld [vmem:[#allocation7 + $0x4e0] sm:$0xff] }
 0x1df   :  { %v1438_v16 = vmax.f32 %v723_v32, 0.0  ;;  %v725_v17 = vpop.f32.mrb[73].mxu1  ;;  %1105 = vmatmul.mubr.f32.gmra.mrb[178].mxu1 %v4601_v10  ;;  %3679 = vmatprep.subr.bf16.mxu0 %v3678_v58  ;;  %v2064_v58 = vld [vmem:[#allocation7 + $0x4a0] sm:$0xff] }
 0x1e0   :  { %v1439_v21 = vmax.f32 %v725_v17, 0.0  ;;  %2511 = vmatprep.mubr.f32.mxu0 %v1687_v5  ;;  %1110 = vmatprep.mubr.f32.mxu1 %v4604_v36 }
 0x1e1   :  { %2512 = vmatmul.mubr.f32.gmra.mrb[6].mxu0 %v1686_v50  ;;  %v1694_v26 = vmul.f32 %v1438_v16, %v1438_v16 }
 0x1e2   :  { %v1695_v62 = vmul.f32 %v1439_v21, %v1439_v21  ;;  %v729_v49 = vpop.f32.mrb[74].mxu1  ;;  %3681 = vmatpush1.bf16.msra.mxu0 %v3680_v40  ;;  %v3688_v40 = vpack.c.bf16 %v2066_v20, %v2064_v58  ;;  %v2070_v21 = vld [vmem:[#allocation7 + $0x4d0] sm:$0xff] }
 0x1e3   :  { %v1446_v51 = vmax.f32 %v729_v49, 0.0  ;;  %v731_v44 = vpop.f32.mrb[75].mxu1  ;;  %1111 = vmatmul.mubr.f32.gmra.mrb[180].mxu1 %v4607_v35  ;;  %3683 = vmatprep.subr.bf16.mxu0 %v3682_v54  ;;  %v4613_v54 = vld [vmem:[#allocation2 + $0x1b0] sm:$0xff]  ;;  %v2075_v49 = vld [vmem:[#allocation7 + $0x4f8] sm:$0xff] }
 0x1e4   :  { %v1447_v24 = vmax.f32 %v731_v44, 0.0  ;;  %2517 = vmatprep.mubr.f32.mxu0 %v1695_v62  ;;  %1116 = vmatprep.mubr.f32.mxu1 %v4610_v34  ;;  %v2073_v62 = vld [vmem:[#allocation7 + $0x4e8] sm:$0xff] }
 0x1e5   :  { %2518 = vmatmul.mubr.f32.gmra.mrb[8].mxu0 %v1694_v26  ;;  %v1702_v50 = vmul.f32 %v1446_v51, %v1446_v51  ;;  %v3692_v51 = vpack.c.bf16 %v2070_v21, %v2068_v56  ;;  %v3696_v56 = vpack.c.bf16 %v2074_v31, %v2072_v48 }
 0x1e6   :  { %v1703_v5 = vmul.f32 %v1447_v24, %v1447_v24  ;;  %v735_v32 = vpop.f32.mrb[76].mxu1  ;;  %3685 = vmatpush1.bf16.msra.mxu0 %v3684_v61  ;;  %v3694_v24 = vpack.c.bf16 %v2075_v49, %v2073_v62  ;;  %v2076_v49 = vld [vmem:[#allocation7 + $0x500] sm:$0xff] }
 0x1e7   :  { %v1454_v16 = vmax.f32 %v735_v32, 0.0  ;;  %v737_v17 = vpop.f32.mrb[77].mxu1  ;;  %1117 = vmatmul.mubr.f32.gmra.mrb[182].mxu1 %v4613_v54  ;;  %3687 = vmatprep.subr.bf16.mxu0 %v3686_v57  ;;  %v4619_v57 = vld [vmem:[#allocation2 + $0x1c0] sm:$0xff]  ;;  %v4622_v32 = vld [vmem:[#allocation2 + $0x1d8] sm:$0xff] }
 0x1e8   :  { %v1455_v53 = vmax.f32 %v737_v17, 0.0  ;;  %2523 = vmatprep.mubr.f32.mxu0 %v1703_v5  ;;  %1122 = vmatprep.mubr.f32.mxu1 %v4616_v23  ;;  %4765 = vst [vmem:[#allocation13_spill] sm:$0xff] %v4619_v57  ;;  %4766 = vst [vmem:[#allocation14_spill] sm:$0xff] %v4622_v32  ;;  %v4059_v23 = vld [vmem:[#allocation2] sm:$0xff] }
 0x1e9   :  { %2524 = vmatmul.mubr.f32.gmra.mrb[10].mxu0 %v1702_v50  ;;  %v1710_v44 = vmul.f32 %v1454_v16, %v1454_v16  ;;  %v2077_v50 = vld [vmem:[#allocation7 + $0x508] sm:$0xff] }
 0x1ea   :  { %v1711_v61 = vmul.f32 %v1455_v53, %v1455_v53  ;;  %v741_v26 = vpop.f32.mrb[78].mxu1  ;;  %3689 = vmatpush1.bf16.msra.mxu0 %v3688_v40  ;;  %v2079_v40 = vld [vmem:[#allocation7 + $0x518] sm:$0xff] }
 0x1eb   :  { %v1462_v58 = vmax.f32 %v741_v26, 0.0  ;;  %v743_v20 = vpop.f32.mrb[79].mxu1  ;;  %1123 = vmatmul.mubr.f32.gmra.mrb[184].mxu1 %v4619_v57  ;;  %3691 = vmatprep.subr.bf16.mxu0 %v3690_v55  ;;  %v4625_v55 = vld [vmem:[#allocation2 + $0x1d0] sm:$0xff]  ;;  %v3698_v62 = vpack.c.bf16 %v2079_v40, %v2077_v50  ;;  %v2080_v40 = vld [vmem:[#allocation7 + $0x520] sm:$0xff] }
 0x1ec   :  { %v1463_v5 = vmax.f32 %v743_v20, 0.0  ;;  %2529 = vmatprep.mubr.f32.mxu0 %v1711_v61  ;;  %1128 = vmatprep.mubr.f32.mxu1 %v4622_v32  ;;  %4767 = vst [vmem:[#allocation15_spill] sm:$0xff] %v4625_v55  ;;  %v2078_v61 = vld [vmem:[#allocation7 + $0x510] sm:$0xff]  ;;  %v4628_v32 = vld [vmem:[#allocation2 + $0x1e8] sm:$0xff] }
 0x1ed   :  { %2530 = vmatmul.mubr.f32.gmra.mrb[12].mxu0 %v1710_v44  ;;  %v1718_v21 = vmul.f32 %v1462_v58, %v1462_v58  ;;  %4768 = vst [vmem:[#allocation16_spill] sm:$0xff] %v4628_v32  ;;  %v2081_v44 = vld [vmem:[#allocation7 + $0x528] sm:$0xff]  ;;  %v3700_v31 = vpack.c.bf16 %v2078_v61, %v2076_v49 }
 0x1ee   :  { %v1719_v16 = vmul.f32 %v1463_v5, %v1463_v5  ;;  %v747_v17 = vpop.f32.mrb[80].mxu1  ;;  %3693 = vmatpush1.bf16.msra.mxu0 %v3692_v51  ;;  %v2083_v51 = vld [vmem:[#allocation7 + $0x538] sm:$0xff] }
 0x1ef   :  { %v1470_v53 = vmax.f32 %v747_v17, 0.0  ;;  %v749_v26 = vpop.f32.mrb[81].mxu1  ;;  %1129 = vmatmul.mubr.f32.gmra.mrb[186].mxu1 %v4625_v55  ;;  %3695 = vmatprep.subr.bf16.mxu0 %v3694_v24  ;;  %v4631_v24 = vld [vmem:[#allocation2 + $0x1e0] sm:$0xff]  ;;  %v3702_v50 = vpack.c.bf16 %v2083_v51, %v2081_v44  ;;  %v2086_v51 = vld [vmem:[#allocation7 + $0x550] sm:$0xff] }
 0x1f0   :  { %v1471_v20 = vmax.f32 %v749_v26, 0.0  ;;  %2535 = vmatprep.mubr.f32.mxu0 %v1719_v16  ;;  %1134 = vmatprep.mubr.f32.mxu1 %v4628_v32  ;;  %4769 = vst [vmem:[#allocation17_spill] sm:$0xff] %v4631_v24  ;;  %v2082_v16 = vld [vmem:[#allocation7 + $0x530] sm:$0xff]  ;;  %v4634_v32 = vld [vmem:[#allocation2 + $0x1f8] sm:$0xff]  ;;  %v2084_v44 = vld [vmem:[#allocation7 + $0x540] sm:$0xff] }
 0x1f1   :  { %2536 = vmatmul.mubr.f32.gmra.mrb[14].mxu0 %v1718_v21  ;;  %v1726_v5 = vmul.f32 %v1470_v53, %v1470_v53  ;;  %4770 = vst [vmem:[#allocation18_spill] sm:$0xff] %v4634_v32  ;;  %v2085_v21 = vld [vmem:[#allocation7 + $0x548] sm:$0xff]  ;;  %v3704_v61 = vpack.c.bf16 %v2082_v16, %v2080_v40 }
 0x1f2   :  { %v1727_v58 = vmul.f32 %v1471_v20, %v1471_v20  ;;  %v753_v48 = vpop.f32.mrb[82].mxu1  ;;  %3697 = vmatpush1.bf16.msra.mxu0 %v3696_v56  ;;  %v2087_v56 = vld [vmem:[#allocation7 + $0x558] sm:$0xff] }
 0x1f3   :  { %v1478_v17 = vmax.f32 %v753_v48, 0.0  ;;  %v755_v55 = vpop.f32.mrb[83].mxu1  ;;  %1135 = vmatmul.mubr.f32.gmra.mrb[188].mxu1 %v4631_v24  ;;  %3699 = vmatprep.subr.bf16.mxu0 %v3698_v62  ;;  %v4637_v62 = vld [vmem:[#allocation2 + $0x1f0] sm:$0xff] }
 0x1f4   :  { %v1479_v26 = vmax.f32 %v755_v55, 0.0  ;;  %2541 = vmatprep.mubr.f32.mxu0 %v1727_v58  ;;  %1140 = vmatprep.mubr.f32.mxu1 %v4634_v32  ;;  %4771 = vst [vmem:[#allocation19_spill] sm:$0xff] %v4637_v62  ;;  %v3706_v55 = vpack.c.bf16 %v2087_v56, %v2085_v21  ;;  %v4058_v32 = vld [vmem:[#allocation2 + $0x8] sm:$0xff]  ;;  %v2088_v21 = vld [vmem:[#allocation7 + $0x560] sm:$0xff]  ;;  %v2090_v56 = vld [vmem:[#allocation7 + $0x570] sm:$0xff] }
 0x1f5   :  { %2542 = vmatmul.mubr.f32.gmra.mrb[16].mxu0 %v1726_v5  ;;  %v1734_v20 = vmul.f32 %v1478_v17, %v1478_v17  ;;  %v2089_v5 = vld [vmem:[#allocation7 + $0x568] sm:$0xff]  ;;  %v3708_v17 = vpack.c.bf16 %v2086_v51, %v2084_v44 }
 0x1f6   :  { %v1735_v53 = vmul.f32 %v1479_v26, %v1479_v26  ;;  %v759_v49 = vpop.f32.mrb[84].mxu1  ;;  %3701 = vmatpush1.bf16.msra.mxu0 %v3700_v31  ;;  %v2091_v26 = vld [vmem:[#allocation7 + $0x578] sm:$0xff] }
 0x1f7   :  { %v1486_v48 = vmax.f32 %v759_v49, 0.0  ;;  %v761_v24 = vpop.f32.mrb[85].mxu1  ;;  %1141 = vmatmul.mubr.f32.gmra.mrb[190].mxu1 %v4637_v62  ;;  %3703 = vmatprep.subr.bf16.mxu0 %v3702_v50  ;;  %v3710_v50 = vpack.c.bf16 %v2091_v26, %v2089_v5  ;;  %v2095_v62 = vld [vmem:[#allocation7 + $0x598] sm:$0xff]  ;;  %v2094_v5 = vld [vmem:[#allocation7 + $0x590] sm:$0xff]  ;;  %v4062_v26 = vld [vmem:[#allocation2 + $0x28] sm:$0xff] }
 0x1f8   :  { %v1487_v58 = vmax.f32 %v761_v24, 0.0  ;;  %2547 = vmatprep.mubr.f32.mxu0 %v1735_v53  ;;  %1211 = vmatprep.mubr.f32.mxu1 %v4058_v32  ;;  %v4060_v53 = vld [vmem:[#allocation2 + $0x18] sm:$0xff]  ;;  %v2093_v32 = vld [vmem:[#allocation7 + $0x588] sm:$0xff] }
 0x1f9   :  { %2548 = vmatmul.mubr.f32.gmra.mrb[18].mxu0 %v1734_v20  ;;  %v1742_v16 = vmul.f32 %v1486_v48, %v1486_v48 }
 0x1fa   :  { %v1743_v31 = vmul.f32 %v1487_v58, %v1487_v58  ;;  %v765_v40 = vpop.f32.mrb[86].mxu1  ;;  %3705 = vmatpush1.bf16.msra.mxu0 %v3704_v61  ;;  %v3712_v61 = vpack.c.bf16 %v2090_v56, %v2088_v21 }
 0x1fb   :  { %v1494_v49 = vmax.f32 %v765_v40, 0.0  ;;  %v767_v57 = vpop.f32.mrb[87].mxu1  ;;  %1212 = vmatmul.mubr.f32.vlgmr.msra.gmra.mrb[192].mxu1 %v4059_v23  ;;  %3707 = vmatprep.subr.bf16.mxu0 %v3706_v55  ;;  %v4061_v40 = vld [vmem:[#allocation2 + $0x10] sm:$0xff]  ;;  %v3714_v23 = vpack.c.bf16 %v2095_v62, %v2093_v32  ;;  %v2092_v55 = vld [vmem:[#allocation7 + $0x580] sm:$0xff] }
 0x1fc   :  { %v1495_v24 = vmax.f32 %v767_v57, 0.0  ;;  %2553 = vmatprep.mubr.f32.mxu0 %v1743_v31  ;;  %1217 = vmatprep.mubr.f32.mxu1 %v4060_v53  ;;  %v2097_v31 = vld [vmem:[#allocation7 + $0x5a8] sm:$0xff]  ;;  %v2099_v53 = vld [vmem:[#allocation7 + $0x5b8] sm:$0xff]  ;;  %v2098_v32 = vld [vmem:[#allocation7 + $0x5b0] sm:$0xff] }
 0x1fd   :  { %2554 = vmatmul.mubr.f32.gmra.mrb[20].mxu0 %v1742_v16  ;;  %v1750_v48 = vmul.f32 %v1494_v49, %v1494_v49  ;;  %v3718_v62 = vpack.c.bf16 %v2099_v53, %v2097_v31  ;;  %v2100_v31 = vld [vmem:[#allocation7 + $0x5c0] sm:$0xff]  ;;  %v2102_v53 = vld [vmem:[#allocation7 + $0x5d0] sm:$0xff] }
 0x1fe   :  { %v1751_v20 = vmul.f32 %v1495_v24, %v1495_v24  ;;  %v771_v58 = vpop.f32.mrb[88].mxu1  ;;  %3709 = vmatpush1.bf16.msra.mxu0 %v3708_v17  ;;  %v3716_v17 = vpack.c.bf16 %v2094_v5, %v2092_v55 }
 0x1ff   :  { %v1502_v44 = vmax.f32 %v771_v58, 0.0  ;;  %v773_v51 = vpop.f32.mrb[89].mxu1  ;;  %1218 = vmatmul.mubr.f32.gmra.mrb[194].mxu1 %v4061_v40  ;;  %3711 = vmatprep.subr.bf16.mxu0 %v3710_v50  ;;  %v4063_v58 = vld [vmem:[#allocation2 + $0x20] sm:$0xff]  ;;  %v2101_v40 = vld [vmem:[#allocation7 + $0x5c8] sm:$0xff] }
 0x200   :  { %v1503_v57 = vmax.f32 %v773_v51, 0.0  ;;  %2559 = vmatprep.mubr.f32.mxu0 %v1751_v20  ;;  %1223 = vmatprep.mubr.f32.mxu1 %v4062_v26  ;;  %v2096_v50 = vld [vmem:[#allocation7 + $0x5a0] sm:$0xff]  ;;  %v4064_v20 = vld [vmem:[#allocation2 + $0x38] sm:$0xff] }
 0x201   :  { %2560 = vmatmul.mubr.f32.gmra.mrb[22].mxu0 %v1750_v48  ;;  %v1758_v49 = vmul.f32 %v1502_v44, %v1502_v44  ;;  %v2103_v26 = vld [vmem:[#allocation7 + $0x5d8] sm:$0xff] }
 0x202   :  { %v1759_v16 = vmul.f32 %v1503_v57, %v1503_v57  ;;  %v777_v24 = vpop.f32.mrb[90].mxu1  ;;  %3713 = vmatpush1.bf16.msra.mxu0 %v3712_v61  ;;  %v3720_v61 = vpack.c.bf16 %v2098_v32, %v2096_v50 }
 0x203   :  { %v1510_v21 = vmax.f32 %v777_v24, 0.0  ;;  %v779_v56 = vpop.f32.mrb[91].mxu1  ;;  %1224 = vmatmul.mubr.f32.gmra.mrb[196].mxu1 %v4063_v58  ;;  %3715 = vmatprep.subr.bf16.mxu0 %v3714_v23  ;;  %v4065_v24 = vld [vmem:[#allocation2 + $0x30] sm:$0xff]  ;;  %v3722_v23 = vpack.c.bf16 %v2103_v26, %v2101_v40  ;;  %v2105_v58 = vld [vmem:[#allocation7 + $0x5e8] sm:$0xff]  ;;  %v2104_v40 = vld [vmem:[#allocation7 + $0x5e0] sm:$0xff] }
 0x204   :  { %v1511_v51 = vmax.f32 %v779_v56, 0.0  ;;  %2565 = vmatprep.mubr.f32.mxu0 %v1759_v16  ;;  %1229 = vmatprep.mubr.f32.mxu1 %v4064_v20  ;;  %v4066_v16 = vld [vmem:[#allocation2 + $0x48] sm:$0xff]  ;;  %v2107_v20 = vld [vmem:[#allocation7 + $0x5f8] sm:$0xff]  ;;  %v2106_v26 = vld [vmem:[#allocation7 + $0x5f0] sm:$0xff] }
 0x205   :  { %2566 = vmatmul.mubr.f32.gmra.mrb[24].mxu0 %v1758_v49  ;;  %v1766_v44 = vmul.f32 %v1510_v21, %v1510_v21 }
 0x206   :  { %v1767_v48 = vmul.f32 %v1511_v51, %v1511_v51  ;;  %v783_v57 = vpop.f32.mrb[92].mxu1  ;;  %3717 = vmatpush1.bf16.msra.mxu0 %v3716_v17  ;;  %v3724_v17 = vpack.c.bf16 %v2102_v53, %v2100_v31 }
 0x207   :  { %v1518_v55 = vmax.f32 %v783_v57, 0.0  ;;  %v785_v5 = vpop.f32.mrb[93].mxu1  ;;  %1230 = vmatmul.mubr.f32.gmra.mrb[198].mxu1 %v4065_v24  ;;  %3719 = vmatprep.subr.bf16.mxu0 %v3718_v62  ;;  %v4067_v57 = vld [vmem:[#allocation2 + $0x40] sm:$0xff]  ;;  %v3726_v62 = vpack.c.bf16 %v2107_v20, %v2105_v58  ;;  %v2109_v24 = vld [vmem:[#allocation7 + $0x608] sm:$0xff] }
 0x208   :  { %v1519_v56 = vmax.f32 %v785_v5, 0.0  ;;  %2571 = vmatprep.mubr.f32.mxu0 %v1767_v48  ;;  %1235 = vmatprep.mubr.f32.mxu1 %v4066_v16  ;;  %v4068_v48 = vld [vmem:[#allocation2 + $0x58] sm:$0xff]  ;;  %v4070_v20 = vld [vmem:[#allocation2 + $0x68] sm:$0xff] }
 0x209   :  { %2572 = vmatmul.mubr.f32.gmra.mrb[26].mxu0 %v1766_v44  ;;  %v1774_v21 = vmul.f32 %v1518_v55, %v1518_v55  ;;  %v2111_v16 = vld [vmem:[#allocation7 + $0x618] sm:$0xff] }
 0x20a   :  { %v1775_v49 = vmul.f32 %v1519_v56, %v1519_v56  ;;  %v789_v51 = vpop.f32.mrb[94].mxu1  ;;  %3721 = vmatpush1.bf16.msra.mxu0 %v3720_v61  ;;  %v3728_v61 = vpack.c.bf16 %v2106_v26, %v2104_v40  ;;  %v4072_v40 = vld [vmem:[#allocation2 + $0x78] sm:$0xff] }
 0x20b   :  { %v1526_v50 = vmax.f32 %v789_v51, 0.0  ;;  %v791_v32 = vpop.f32.mrb[95].mxu1  ;;  %1236 = vmatmul.mubr.f32.gmra.mrb[200].mxu1 %v4067_v57  ;;  %3723 = vmatprep.subr.bf16.mxu0 %v3722_v23  ;;  %v4069_v51 = vld [vmem:[#allocation2 + $0x50] sm:$0xff]  ;;  %v3730_v23 = vpack.c.bf16 %v2111_v16, %v2109_v24 }
 0x20c   :  { %v1527_v5 = vmax.f32 %v791_v32, 0.0  ;;  %2577 = vmatprep.mubr.f32.mxu0 %v1775_v49  ;;  %1241 = vmatprep.mubr.f32.mxu1 %v4068_v48 }
 0x20d   :  { %2578 = vmatmul.mubr.f32.gmra.mrb[28].mxu0 %v1774_v21  ;;  %v1782_v55 = vmul.f32 %v1526_v50, %v1526_v50 }
 0x20e   :  { %v1783_v44 = vmul.f32 %v1527_v5, %v1527_v5  ;;  %v795_v56 = vpop.f32.mrb[96].mxu1  ;;  %3725 = vmatpush1.bf16.msra.mxu0 %v3724_v17  ;;  %v4071_v17 = vld [vmem:[#allocation2 + $0x60] sm:$0xff] }
 0x20f   :  { %v1534_v31 = vmax.f32 %v795_v56, 0.0  ;;  %v797_v53 = vpop.f32.mrb[97].mxu1  ;;  %1242 = vmatmul.mubr.f32.gmra.mrb[202].mxu1 %v4069_v51  ;;  %3727 = vmatprep.subr.bf16.mxu0 %v3726_v62 }
 0x210   :  { %v1535_v58 = vmax.f32 %v797_v53, 0.0  ;;  %2583 = vmatprep.mubr.f32.mxu0 %v1783_v44  ;;  %1247 = vmatprep.mubr.f32.mxu1 %v4070_v20 }
 0x211   :  { %2584 = vmatmul.mubr.f32.gmra.mrb[30].mxu0 %v1782_v55  ;;  %v1790_v21 = vmul.f32 %v1534_v31, %v1534_v31 }
 0x212   :  { %v1791_v49 = vmul.f32 %v1535_v58, %v1535_v58  ;;  %v801_v32 = vpop.f32.mrb[98].mxu1  ;;  %3729 = vmatpush1.bf16.msra.mxu0 %v3728_v61 }
 0x213   :  { %v1542_v57 = vmax.f32 %v801_v32, 0.0  ;;  %v803_v5 = vpop.f32.mrb[99].mxu1  ;;  %1248 = vmatmul.mubr.f32.gmra.mrb[204].mxu1 %v4071_v17  ;;  %3731 = vmatprep.subr.bf16.mxu0 %v3730_v23 }
 0x214   :  { %v1543_v50 = vmax.f32 %v803_v5, 0.0  ;;  %2589 = vmatprep.mubr.f32.mxu0 %v1791_v49  ;;  %1253 = vmatprep.mubr.f32.mxu1 %v4072_v40 }
 0x215   :  { %2590 = vmatmul.mubr.f32.gmra.mrb[32].mxu0 %v1790_v21  ;;  %v1798_v48 = vmul.f32 %v1542_v57, %v1542_v57 }
 0x216   :  { %v1799_v62 = vmul.f32 %v1543_v50, %v1543_v50  ;;  %v807_v26 = vpop.f32.mrb[100].mxu1 }
 0x217   :  { %v1550_v24 = vmax.f32 %v807_v26, 0.0  ;;  %v809_v16 = vpop.f32.mrb[101].mxu1  ;;  %1254 = vmatmul.mubr.f32.gmra.mrb[206].mxu1 %v4493_v2 }
 0x218   :  { %v1551_v44 = vmax.f32 %v809_v16, 0.0  ;;  %2595 = vmatprep.mubr.f32.mxu0 %v1799_v62  ;;  %1259 = vmatprep.mubr.f32.mxu1 %v4496_v60 }
 0x219   :  { %2596 = vmatmul.mubr.f32.gmra.mrb[34].mxu0 %v1798_v48  ;;  %v1806_v55 = vmul.f32 %v1550_v24, %v1550_v24 }
 0x21a   :  { %v1807_v56 = vmul.f32 %v1551_v44, %v1551_v44  ;;  %v813_v61 = vpop.f32.mrb[102].mxu1 }
 0x21b   :  { %v1558_v31 = vmax.f32 %v813_v61, 0.0  ;;  %v815_v53 = vpop.f32.mrb[103].mxu1  ;;  %1260 = vmatmul.mubr.f32.gmra.mrb[208].mxu1 %v4499_v41 }
 0x21c   :  { %v1559_v51 = vmax.f32 %v815_v53, 0.0  ;;  %2601 = vmatprep.mubr.f32.mxu0 %v1807_v56  ;;  %1265 = vmatprep.mubr.f32.mxu1 %v4502_v9 }
 0x21d   :  { %2602 = vmatmul.mubr.f32.gmra.mrb[36].mxu0 %v1806_v55  ;;  %v1814_v2 = vmul.f32 %v1558_v31, %v1558_v31 }
 0x21e   :  { %v1815_v23 = vmul.f32 %v1559_v51, %v1559_v51  ;;  %v819_v58 = vpop.f32.mrb[104].mxu1 }
 0x21f   :  { %v1566_v20 = vmax.f32 %v819_v58, 0.0  ;;  %v821_v49 = vpop.f32.mrb[105].mxu1  ;;  %1266 = vmatmul.mubr.f32.gmra.mrb[210].mxu1 %v4505_v43 }
 0x220   :  { %v1567_v60 = vmax.f32 %v821_v49, 0.0  ;;  %2607 = vmatprep.mubr.f32.mxu0 %v1815_v23  ;;  %1271 = vmatprep.mubr.f32.mxu1 %v4508_v27 }
 0x221   :  { %2608 = vmatmul.mubr.f32.gmra.mrb[38].mxu0 %v1814_v2  ;;  %v1822_v41 = vmul.f32 %v1566_v20, %v1566_v20 }
 0x222   :  { %v1823_v32 = vmul.f32 %v1567_v60, %v1567_v60  ;;  %v825_v21 = vpop.f32.mrb[106].mxu1 }
 0x223   :  { %v1574_v57 = vmax.f32 %v825_v21, 0.0  ;;  %v827_v5 = vpop.f32.mrb[107].mxu1  ;;  %1272 = vmatmul.mubr.f32.gmra.mrb[212].mxu1 %v4511_v4 }
 0x224   :  { %v1575_v9 = vmax.f32 %v827_v5, 0.0  ;;  %2613 = vmatprep.mubr.f32.mxu0 %v1823_v32  ;;  %1277 = vmatprep.mubr.f32.mxu1 %v4514_v42 }
 0x225   :  { %2614 = vmatmul.mubr.f32.gmra.mrb[40].mxu0 %v1822_v41  ;;  %v1830_v43 = vmul.f32 %v1574_v57, %v1574_v57 }
 0x226   :  { %v1831_v17 = vmul.f32 %v1575_v9, %v1575_v9  ;;  %v831_v50 = vpop.f32.mrb[108].mxu1 }
 0x227   :  { %v1582_v40 = vmax.f32 %v831_v50, 0.0  ;;  %v833_v62 = vpop.f32.mrb[109].mxu1  ;;  %1278 = vmatmul.mubr.f32.gmra.mrb[214].mxu1 %v4517_v33 }
 0x228   :  { %v1583_v27 = vmax.f32 %v833_v62, 0.0  ;;  %2619 = vmatprep.mubr.f32.mxu0 %v1831_v17  ;;  %1283 = vmatprep.mubr.f32.mxu1 %v4520_v52 }
 0x229   :  { %2620 = vmatmul.mubr.f32.gmra.mrb[42].mxu0 %v1830_v43  ;;  %v1838_v4 = vmul.f32 %v1582_v40, %v1582_v40 }
 0x22a   :  { %v1839_v26 = vmul.f32 %v1583_v27, %v1583_v27  ;;  %v837_v48 = vpop.f32.mrb[110].mxu1 }
 0x22b   :  { %v1590_v24 = vmax.f32 %v837_v48, 0.0  ;;  %v839_v16 = vpop.f32.mrb[111].mxu1  ;;  %1284 = vmatmul.mubr.f32.gmra.mrb[216].mxu1 %v4523_v30 }
 0x22c   :  { %v1591_v42 = vmax.f32 %v839_v16, 0.0  ;;  %2625 = vmatprep.mubr.f32.mxu0 %v1839_v26  ;;  %1289 = vmatprep.mubr.f32.mxu1 %v4526_v3 }
 0x22d   :  { %2626 = vmatmul.mubr.f32.gmra.mrb[44].mxu0 %v1838_v4  ;;  %v1846_v33 = vmul.f32 %v1590_v24, %v1590_v24 }
 0x22e   :  { %v1847_v44 = vmul.f32 %v1591_v42, %v1591_v42  ;;  %v843_v56 = vpop.f32.mrb[112].mxu1 }
 0x22f   :  { %v1598_v61 = vmax.f32 %v843_v56, 0.0  ;;  %v845_v55 = vpop.f32.mrb[113].mxu1  ;;  %1290 = vmatmul.mubr.f32.gmra.mrb[218].mxu1 %v4529_v14 }
 0x230   :  { %v1599_v52 = vmax.f32 %v845_v55, 0.0  ;;  %2631 = vmatprep.mubr.f32.mxu0 %v1847_v44  ;;  %1295 = vmatprep.mubr.f32.mxu1 %v4532_v13 }
 0x231   :  { %2632 = vmatmul.mubr.f32.gmra.mrb[46].mxu0 %v1846_v33  ;;  %v1854_v30 = vmul.f32 %v1598_v61, %v1598_v61 }
 0x232   :  { %v1855_v31 = vmul.f32 %v1599_v52, %v1599_v52  ;;  %v849_v53 = vpop.f32.mrb[114].mxu1  ;;  %v2110_v52 = vld [vmem:[#allocation7 + $0x610] sm:$0xff] }
 0x233   :  { %v1606_v51 = vmax.f32 %v849_v53, 0.0  ;;  %v851_v23 = vpop.f32.mrb[115].mxu1  ;;  %1296 = vmatmul.mubr.f32.gmra.mrb[220].mxu1 %v4535_v46  ;;  %v2113_v53 = vld [vmem:[#allocation7 + $0x628] sm:$0xff] }
 0x234   :  { %v1607_v3 = vmax.f32 %v851_v23, 0.0  ;;  %2637 = vmatprep.mubr.f32.mxu0 %v1855_v31  ;;  %1301 = vmatprep.mubr.f32.mxu1 %v4538_v6 }
 0x235   :  { %2638 = vmatmul.mubr.f32.gmra.mrb[48].mxu0 %v1854_v30  ;;  %v1862_v14 = vmul.f32 %v1606_v51, %v1606_v51 }
 0x236   :  { %v1863_v58 = vmul.f32 %v1607_v3, %v1607_v3  ;;  %v855_v2 = vpop.f32.mrb[116].mxu1 }
 0x237   :  { %v1614_v20 = vmax.f32 %v855_v2, 0.0  ;;  %v857_v49 = vpop.f32.mrb[117].mxu1  ;;  %1302 = vmatmul.mubr.f32.gmra.mrb[222].mxu1 %v4541_v0 }
 0x238   :  { %v1615_v13 = vmax.f32 %v857_v49, 0.0  ;;  %2643 = vmatprep.mubr.f32.mxu0 %v1863_v58  ;;  %1307 = vmatprep.mubr.f32.mxu1 %v4544_v63  ;;  %v2117_v49 = vld [vmem:[#allocation7 + $0x648] sm:$0xff] }
 0x239   :  { %2644 = vmatmul.mubr.f32.gmra.mrb[50].mxu0 %v1862_v14  ;;  %v1870_v46 = vmul.f32 %v1614_v20, %v1614_v20  ;;  %v2112_v14 = vld [vmem:[#allocation7 + $0x620] sm:$0xff] }
 0x23a   :  { %v1871_v60 = vmul.f32 %v1615_v13, %v1615_v13  ;;  %v861_v32 = vpop.f32.mrb[118].mxu1 }
 0x23b   :  { %v1622_v21 = vmax.f32 %v861_v32, 0.0  ;;  %v863_v41 = vpop.f32.mrb[119].mxu1  ;;  %1308 = vmatmul.mubr.f32.gmra.mrb[224].mxu1 %v4547_v37 }
 0x23c   :  { %v1623_v6 = vmax.f32 %v863_v41, 0.0  ;;  %2649 = vmatprep.mubr.f32.mxu0 %v1871_v60  ;;  %1313 = vmatprep.mubr.f32.mxu1 %v4550_v28 }
 0x23d   :  { %2650 = vmatmul.mubr.f32.gmra.mrb[52].mxu0 %v1870_v46  ;;  %v1878_v0 = vmul.f32 %v1622_v21, %v1622_v21 }
 0x23e   :  { %v1879_v57 = vmul.f32 %v1623_v6, %v1623_v6  ;;  %v867_v5 = vpop.f32.mrb[120].mxu1  ;;  %v2116_v6 = vld [vmem:[#allocation7 + $0x640] sm:$0xff] }
 0x23f   :  { %v1630_v9 = vmax.f32 %v867_v5, 0.0  ;;  %v869_v17 = vpop.f32.mrb[121].mxu1  ;;  %1314 = vmatmul.mubr.f32.gmra.mrb[226].mxu1 %v4553_v1 }
 0x240   :  { %v1631_v63 = vmax.f32 %v869_v17, 0.0  ;;  %2655 = vmatprep.mubr.f32.mxu0 %v1879_v57  ;;  %1319 = vmatprep.mubr.f32.mxu1 %v4556_v38  ;;  %v2118_v57 = vld [vmem:[#allocation7 + $0x650] sm:$0xff] }
 0x241   :  { %2656 = vmatmul.mubr.f32.gmra.mrb[54].mxu0 %v1878_v0  ;;  %v1886_v37 = vmul.f32 %v1630_v9, %v1630_v9  ;;  %v2123_v0 = vld [vmem:[#allocation7 + $0x678] sm:$0xff] }
 0x242   :  { %v1887_v50 = vmul.f32 %v1631_v63, %v1631_v63  ;;  %v873_v43 = vpop.f32.mrb[122].mxu1  ;;  %v3740_v63 = vpack.c.bf16 %v2118_v57, %v2116_v6  ;;  %v4774_v57 = vld [vmem:[#allocation14_spill] sm:$0xff] }
 0x243   :  { %v1638_v40 = vmax.f32 %v873_v43, 0.0  ;;  %v875_v62 = vpop.f32.mrb[123].mxu1  ;;  %1320 = vmatmul.mubr.f32.gmra.mrb[228].mxu1 %v4559_v7 }
 0x244   :  { %v1639_v28 = vmax.f32 %v875_v62, 0.0  ;;  %2661 = vmatprep.mubr.f32.mxu0 %v1887_v50  ;;  %1325 = vmatprep.mubr.f32.mxu1 %v4562_v47  ;;  %v2122_v62 = vld [vmem:[#allocation7 + $0x670] sm:$0xff] }
 0x245   :  { %2662 = vmatmul.mubr.f32.gmra.mrb[56].mxu0 %v1886_v37  ;;  %v1894_v1 = vmul.f32 %v1638_v40, %v1638_v40  ;;  %v2120_v40 = vld [vmem:[#allocation7 + $0x660] sm:$0xff] }
 0x246   :  { %v1895_v27 = vmul.f32 %v1639_v28, %v1639_v28  ;;  %v879_v26 = vpop.f32.mrb[124].mxu1 }
 0x247   :  { %v1646_v48 = vmax.f32 %v879_v26, 0.0  ;;  %v881_v4 = vpop.f32.mrb[125].mxu1  ;;  %1326 = vmatmul.mubr.f32.gmra.mrb[230].mxu1 %v4565_v19 }
 0x248   :  { %v1647_v38 = vmax.f32 %v881_v4, 0.0  ;;  %2667 = vmatprep.mubr.f32.mxu0 %v1895_v27  ;;  %1331 = vmatprep.mubr.f32.mxu1 %v4568_v29  ;;  %v2108_v29 = vld [vmem:[#allocation7 + $0x600] sm:$0xff]  ;;  %v2127_v27 = vld [vmem:[#allocation7 + $0x698] sm:$0xff] }
 0x249   :  { %2668 = vmatmul.mubr.f32.gmra.mrb[58].mxu0 %v1894_v1  ;;  %v1902_v7 = vmul.f32 %v1646_v48, %v1646_v48  ;;  %v3744_v48 = vpack.c.bf16 %v2122_v62, %v2120_v40  ;;  %v2140_v40 = vld [vmem:[#allocation7 + $0x700] sm:$0xff]  ;;  %v2142_v62 = vld [vmem:[#allocation7 + $0x710] sm:$0xff] }
 0x24a   :  { %v1903_v24 = vmul.f32 %v1647_v38, %v1647_v38  ;;  %v885_v16 = vpop.f32.mrb[126].mxu1 }
 0x24b   :  { %v1654_v42 = vmax.f32 %v885_v16, 0.0  ;;  %v887_v44 = vpop.f32.mrb[127].mxu1  ;;  %1332 = vmatmul.mubr.f32.gmra.mrb[232].mxu1 %v4571_v39  ;;  %v2115_v39 = vld [vmem:[#allocation7 + $0x638] sm:$0xff]  ;;  %v2124_v16 = vld [vmem:[#allocation7 + $0x680] sm:$0xff] }
 0x24c   :  { %v1655_v47 = vmax.f32 %v887_v44, 0.0  ;;  %2673 = vmatprep.mubr.f32.mxu0 %v1903_v24  ;;  %1337 = vmatprep.mubr.f32.mxu1 %v4574_v18  ;;  %v3732_v18 = vpack.c.bf16 %v2110_v52, %v2108_v29  ;;  %v3734_v2 = vpack.c.bf16 %v2115_v39, %v2113_v53  ;;  %v2131_v44 = vld [vmem:[#allocation7 + $0x6b8] sm:$0xff]  ;;  %v2128_v29 = vld [vmem:[#allocation7 + $0x6a0] sm:$0xff]  ;;  %v2130_v52 = vld [vmem:[#allocation7 + $0x6b0] sm:$0xff] }
 0x24d   :  { %2674 = vmatmul.mubr.f32.gmra.mrb[60].mxu0 %v1902_v7  ;;  %v1910_v19 = vmul.f32 %v1654_v42, %v1654_v42  ;;  %v2126_v7 = vld [vmem:[#allocation7 + $0x690] sm:$0xff]  ;;  %v2135_v53 = vld [vmem:[#allocation7 + $0x6d8] sm:$0xff] }
 0x24e   :  { %v1911_v56 = vmul.f32 %v1655_v47, %v1655_v47  ;;  %v956_v33 = vpop.f32.mrb[128].mxu1 }
 0x24f   :  { %v1408_v61 = vmax.f32 %v956_v33, 0.0  ;;  %v958_v55 = vpop.f32.mrb[129].mxu1  ;;  %1338 = vmatmul.mubr.f32.gmra.mrb[234].mxu1 %v4577_v25  ;;  %v2114_v25 = vld [vmem:[#allocation7 + $0x630] sm:$0xff]  ;;  %v3748_v33 = vpack.c.bf16 %v2126_v7, %v2124_v16  ;;  %v4777_v16 = vld [vmem:[#allocation17_spill] sm:$0xff] }
 0x250   :  { %v1409_v31 = vmax.f32 %v958_v55, 0.0  ;;  %2679 = vmatprep.mubr.f32.mxu0 %v1911_v56  ;;  %1343 = vmatprep.mubr.f32.mxu1 %v4580_v22  ;;  %v2119_v22 = vld [vmem:[#allocation7 + $0x658] sm:$0xff]  ;;  %v3736_v32 = vpack.c.bf16 %v2114_v25, %v2112_v14  ;;  %v4772_v25 = vld [vmem:[#allocation12_spill] sm:$0xff] }
 0x251   :  { %2680 = vmatmul.mubr.f32.gmra.mrb[62].mxu0 %v1910_v19  ;;  %v1664_v23 = vmul.f32 %v1408_v61, %v1408_v61 }
 0x252   :  { %v1665_v30 = vmul.f32 %v1409_v31, %v1409_v31  ;;  %v962_v51 = vpop.f32.mrb[130].mxu1 }
 0x253   :  { %v1416_v3 = vmax.f32 %v962_v51, 0.0  ;;  %v964_v58 = vpop.f32.mrb[131].mxu1  ;;  %1344 = vmatmul.mubr.f32.gmra.mrb[236].mxu1 %v4583_v12  ;;  %v3738_v12 = vpack.c.bf16 %v2119_v22, %v2117_v49  ;;  %v3752_v51 = vpack.c.bf16 %v2130_v52, %v2128_v29 }
 0x254   :  { %v1417_v20 = vmax.f32 %v964_v58, 0.0  ;;  %2750 = vmatprep.mubr.f32.mxu0 %v1665_v30  ;;  %1349 = vmatprep.mubr.f32.mxu1 %v4586_v11  ;;  %v2121_v11 = vld [vmem:[#allocation7 + $0x668] sm:$0xff]  ;;  %v2132_v58 = vld [vmem:[#allocation7 + $0x6c0] sm:$0xff] }
 0x255   :  { %2751 = vmatmul.mubr.f32.vlgmr.msra.gmra.mrb[0].mxu0 %v1664_v23  ;;  %v1672_v46 = vmul.f32 %v1416_v3, %v1416_v3 }
 0x256   :  { %v1673_v13 = vmul.f32 %v1417_v20, %v1417_v20  ;;  %v968_v60 = vpop.f32.mrb[132].mxu1  ;;  %3733 = vmatpush1.bf16.msra.mxu0 %v3732_v18  ;;  %v2139_v20 = vld [vmem:[#allocation7 + $0x6f8] sm:$0xff] }
 0x257   :  { %v1424_v21 = vmax.f32 %v968_v60, 0.0  ;;  %v970_v41 = vpop.f32.mrb[133].mxu1  ;;  %1350 = vmatmul.mubr.f32.gmra.mrb[238].mxu1 %v4589_v15  ;;  %3735 = vmatprep.subr.bf16.mxu0 %v3734_v2  ;;  %v3742_v15 = vpack.c.bf16 %v2123_v0, %v2121_v11  ;;  %v2134_v2 = vld [vmem:[#allocation7 + $0x6d0] sm:$0xff]  ;;  %v2143_v11 = vld [vmem:[#allocation7 + $0x718] sm:$0xff] }
 0x258   :  { %v1425_v5 = vmax.f32 %v970_v41, 0.0  ;;  %2756 = vmatprep.mubr.f32.mxu0 %v1673_v13  ;;  %1355 = vmatprep.mubr.f32.mxu1 %v4592_v45  ;;  %v2125_v45 = vld [vmem:[#allocation7 + $0x688] sm:$0xff]  ;;  %v3756_v13 = vpack.c.bf16 %v2134_v2, %v2132_v58  ;;  %v2136_v41 = vld [vmem:[#allocation7 + $0x6e0] sm:$0xff] }
 0x259   :  { %2757 = vmatmul.mubr.f32.gmra.mrb[2].mxu0 %v1672_v46  ;;  %v1680_v50 = vmul.f32 %v1424_v21, %v1424_v21  ;;  %v4773_v21 = vld [vmem:[#allocation13_spill] sm:$0xff] }
 0x25a   :  { %v1681_v9 = vmul.f32 %v1425_v5, %v1425_v5  ;;  %v974_v17 = vpop.f32.mrb[134].mxu1  ;;  %3737 = vmatpush1.bf16.msra.mxu0 %v3736_v32  ;;  %v2141_v5 = vld [vmem:[#allocation7 + $0x708] sm:$0xff] }
 0x25b   :  { %v1432_v43 = vmax.f32 %v974_v17, 0.0  ;;  %v976_v37 = vpop.f32.mrb[135].mxu1  ;;  %1356 = vmatmul.mubr.f32.gmra.mrb[240].mxu1 %v4595_v59  ;;  %3739 = vmatprep.subr.bf16.mxu0 %v3738_v12  ;;  %v3746_v59 = vpack.c.bf16 %v2127_v27, %v2125_v45  ;;  %v2138_v12 = vld [vmem:[#allocation7 + $0x6f0] sm:$0xff]  ;;  %v4776_v45 = vld [vmem:[#allocation16_spill] sm:$0xff]  ;;  %v2145_v27 = vld [vmem:[#allocation7 + $0x728] sm:$0xff] }
 0x25c   :  { %v1433_v28 = vmax.f32 %v976_v37, 0.0  ;;  %2762 = vmatprep.mubr.f32.mxu0 %v1681_v9  ;;  %1361 = vmatprep.mubr.f32.mxu1 %v4598_v8  ;;  %v2129_v8 = vld [vmem:[#allocation7 + $0x6a8] sm:$0xff]  ;;  %v3760_v17 = vpack.c.bf16 %v2138_v12, %v2136_v41  ;;  %v4775_v37 = vld [vmem:[#allocation15_spill] sm:$0xff] }
 0x25d   :  { %2763 = vmatmul.mubr.f32.gmra.mrb[4].mxu0 %v1680_v50  ;;  %v1688_v4 = vmul.f32 %v1432_v43, %v1432_v43 }
 0x25e   :  { %v1689_v26 = vmul.f32 %v1433_v28, %v1433_v28  ;;  %v980_v1 = vpop.f32.mrb[136].mxu1  ;;  %3741 = vmatpush1.bf16.msra.mxu0 %v3740_v63 }
 0x25f   :  { %v1440_v38 = vmax.f32 %v980_v1, 0.0  ;;  %v982_v24 = vpop.f32.mrb[137].mxu1  ;;  %1362 = vmatmul.mubr.f32.gmra.mrb[242].mxu1 %v4601_v10  ;;  %3743 = vmatprep.subr.bf16.mxu0 %v3742_v15  ;;  %v3750_v10 = vpack.c.bf16 %v2131_v44, %v2129_v8  ;;  %v3762_v15 = vpack.c.bf16 %v2143_v11, %v2141_v5  ;;  %v2146_v8 = vld [vmem:[#allocation7 + $0x730] sm:$0xff]  ;;  %v2161_v11 = vld [vmem:[#allocation7 + $0x7a8] sm:$0xff] }
 0x260   :  { %v1441_v42 = vmax.f32 %v982_v24, 0.0  ;;  %2768 = vmatprep.mubr.f32.mxu0 %v1689_v26  ;;  %1367 = vmatprep.mubr.f32.mxu1 %v4604_v36  ;;  %v2133_v36 = vld [vmem:[#allocation7 + $0x6c8] sm:$0xff]  ;;  %v2147_v26 = vld [vmem:[#allocation7 + $0x738] sm:$0xff] }
 0x261   :  { %2769 = vmatmul.mubr.f32.gmra.mrb[6].mxu0 %v1688_v4  ;;  %v1696_v19 = vmul.f32 %v1440_v38, %v1440_v38  ;;  %v3764_v4 = vpack.c.bf16 %v2142_v62, %v2140_v40  ;;  %v3766_v7 = vpack.c.bf16 %v2147_v26, %v2145_v27  ;;  %v2160_v40 = vld [vmem:[#allocation7 + $0x7a0] sm:$0xff]  ;;  %v2162_v62 = vld [vmem:[#allocation7 + $0x7b0] sm:$0xff]  ;;  %v2167_v27 = vld [vmem:[#allocation7 + $0x7d8] sm:$0xff] }
 0x262   :  { %v1697_v47 = vmul.f32 %v1441_v42, %v1441_v42  ;;  %v986_v56 = vpop.f32.mrb[138].mxu1  ;;  %3745 = vmatpush1.bf16.msra.mxu0 %v3744_v48  ;;  %v2144_v42 = vld [vmem:[#allocation7 + $0x720] sm:$0xff] }
 0x263   :  { %v1448_v61 = vmax.f32 %v986_v56, 0.0  ;;  %v988_v55 = vpop.f32.mrb[139].mxu1  ;;  %1368 = vmatmul.mubr.f32.gmra.mrb[244].mxu1 %v4607_v35  ;;  %3747 = vmatprep.subr.bf16.mxu0 %v3746_v59  ;;  %v3754_v35 = vpack.c.bf16 %v2135_v53, %v2133_v36  ;;  %v2149_v56 = vld [vmem:[#allocation7 + $0x748] sm:$0xff]  ;;  %v2148_v53 = vld [vmem:[#allocation7 + $0x740] sm:$0xff] }
 0x264   :  { %v1449_v31 = vmax.f32 %v988_v55, 0.0  ;;  %2774 = vmatprep.mubr.f32.mxu0 %v1697_v47  ;;  %1373 = vmatprep.mubr.f32.mxu1 %v4610_v34  ;;  %v2137_v34 = vld [vmem:[#allocation7 + $0x6e8] sm:$0xff]  ;;  %v4778_v47 = vld [vmem:[#allocation18_spill] sm:$0xff]  ;;  %v3768_v55 = vpack.c.bf16 %v2146_v8, %v2144_v42 }
 0x265   :  { %2775 = vmatmul.mubr.f32.gmra.mrb[8].mxu0 %v1696_v19  ;;  %v1704_v18 = vmul.f32 %v1448_v61, %v1448_v61  ;;  %v2169_v8 = vld [vmem:[#allocation7 + $0x7e8] sm:$0xff] }
 0x266   :  { %v1705_v39 = vmul.f32 %v1449_v31, %v1449_v31  ;;  %v992_v30 = vpop.f32.mrb[140].mxu1  ;;  %3749 = vmatpush1.bf16.msra.mxu0 %v3748_v33  ;;  %v2151_v33 = vld [vmem:[#allocation7 + $0x758] sm:$0xff] }
 0x267   :  { %v1456_v23 = vmax.f32 %v992_v30, 0.0  ;;  %v994_v3 = vpop.f32.mrb[141].mxu1  ;;  %1374 = vmatmul.mubr.f32.gmra.mrb[246].mxu1 %v4613_v54  ;;  %3751 = vmatprep.subr.bf16.mxu0 %v3750_v10  ;;  %v3758_v54 = vpack.c.bf16 %v2139_v20, %v2137_v34  ;;  %v4779_v31 = vld [vmem:[#allocation19_spill] sm:$0xff]  ;;  %v3770_v36 = vpack.c.bf16 %v2151_v33, %v2149_v56  ;;  %v2152_v34 = vld [vmem:[#allocation7 + $0x760] sm:$0xff]  ;;  %v2154_v20 = vld [vmem:[#allocation7 + $0x770] sm:$0xff] }
 0x268   :  { %v1457_v14 = vmax.f32 %v994_v3, 0.0  ;;  %2780 = vmatprep.mubr.f32.mxu0 %v1705_v39  ;;  %1379 = vmatprep.mubr.f32.mxu1 %v4772_v25  ;;  %v2150_v39 = vld [vmem:[#allocation7 + $0x750] sm:$0xff] }
 0x269   :  { %2781 = vmatmul.mubr.f32.gmra.mrb[10].mxu0 %v1704_v18  ;;  %v1712_v60 = vmul.f32 %v1456_v23, %v1456_v23  ;;  %v2155_v18 = vld [vmem:[#allocation7 + $0x778] sm:$0xff] }
 0x26a   :  { %v1713_v49 = vmul.f32 %v1457_v14, %v1457_v14  ;;  %v998_v22 = vpop.f32.mrb[142].mxu1  ;;  %3753 = vmatpush1.bf16.msra.mxu0 %v3752_v51  ;;  %v2153_v51 = vld [vmem:[#allocation7 + $0x768] sm:$0xff] }
 0x26b   :  { %v1464_v32 = vmax.f32 %v998_v22, 0.0  ;;  %v1000_v46 = vpop.f32.mrb[143].mxu1  ;;  %1380 = vmatmul.mubr.f32.gmra.mrb[248].mxu1 %v4773_v21  ;;  %3755 = vmatprep.subr.bf16.mxu0 %v3754_v35  ;;  %v3772_v35 = vpack.c.bf16 %v2150_v39, %v2148_v53  ;;  %v3774_v25 = vpack.c.bf16 %v2155_v18, %v2153_v51  ;;  %v2157_v22 = vld [vmem:[#allocation7 + $0x788] sm:$0xff] }
 0x26c   :  { %v1465_v6 = vmax.f32 %v1000_v46, 0.0  ;;  %2786 = vmatprep.mubr.f32.mxu0 %v1713_v49  ;;  %1385 = vmatprep.mubr.f32.mxu1 %v4774_v57  ;;  %v3776_v46 = vpack.c.bf16 %v2154_v20, %v2152_v34  ;;  %v2158_v57 = vld [vmem:[#allocation7 + $0x790] sm:$0xff] }
 0x26d   :  { %2787 = vmatmul.mubr.f32.gmra.mrb[12].mxu0 %v1712_v60  ;;  %v1720_v63 = vmul.f32 %v1464_v32, %v1464_v32 }
 0x26e   :  { %v1721_v0 = vmul.f32 %v1465_v6, %v1465_v6  ;;  %v1004_v9 = vpop.f32.mrb[144].mxu1  ;;  %3757 = vmatpush1.bf16.msra.mxu0 %v3756_v13  ;;  %v2159_v13 = vld [vmem:[#allocation7 + $0x798] sm:$0xff]  ;;  %v2156_v6 = vld [vmem:[#allocation7 + $0x780] sm:$0xff] }
 0x26f   :  { %v1472_v50 = vmax.f32 %v1004_v9, 0.0  ;;  %v1006_v43 = vpop.f32.mrb[145].mxu1  ;;  %1386 = vmatmul.mubr.f32.gmra.mrb[250].mxu1 %v4775_v37  ;;  %3759 = vmatprep.subr.bf16.mxu0 %v3758_v54  ;;  %v3778_v12 = vpack.c.bf16 %v2159_v13, %v2157_v22 }
 0x270   :  { %v1473_v28 = vmax.f32 %v1006_v43, 0.0  ;;  %2792 = vmatprep.mubr.f32.mxu0 %v1721_v0  ;;  %1391 = vmatprep.mubr.f32.mxu1 %v4776_v45  ;;  %v2163_v0 = vld [vmem:[#allocation7 + $0x7b8] sm:$0xff]  ;;  %v2165_v45 = vld [vmem:[#allocation7 + $0x7c8] sm:$0xff] }
 0x271   :  { %2793 = vmatmul.mubr.f32.gmra.mrb[14].mxu0 %v1720_v63  ;;  %v1728_v38 = vmul.f32 %v1472_v50, %v1472_v50  ;;  %v3780_v63 = vpack.c.bf16 %v2158_v57, %v2156_v6 }
 0x272   :  { %v1729_v1 = vmul.f32 %v1473_v28, %v1473_v28  ;;  %v1010_v48 = vpop.f32.mrb[146].mxu1  ;;  %3761 = vmatpush1.bf16.msra.mxu0 %v3760_v17 }
 0x273   :  { %v1480_v24 = vmax.f32 %v1010_v48, 0.0  ;;  %v1012_v59 = vpop.f32.mrb[147].mxu1  ;;  %1392 = vmatmul.mubr.f32.gmra.mrb[252].mxu1 %v4777_v16  ;;  %3763 = vmatprep.subr.bf16.mxu0 %v3762_v15  ;;  %v3782_v15 = vpack.c.bf16 %v2163_v0, %v2161_v11  ;;  %v3784_v48 = vpack.c.bf16 %v2162_v62, %v2160_v40  ;;  %v2164_v16 = vld [vmem:[#allocation7 + $0x7c0] sm:$0xff] }
 0x274   :  { %v1481_v44 = vmax.f32 %v1012_v59, 0.0  ;;  %2798 = vmatprep.mubr.f32.mxu0 %v1729_v1  ;;  %1397 = vmatprep.mubr.f32.mxu1 %v4778_v47  ;;  %v3786_v59 = vpack.c.bf16 %v2167_v27, %v2165_v45 }
 0x275   :  { %2799 = vmatmul.mubr.f32.gmra.mrb[16].mxu0 %v1728_v38  ;;  %v1736_v10 = vmul.f32 %v1480_v24, %v1480_v24 }
 0x276   :  { %v1737_v19 = vmul.f32 %v1481_v44, %v1481_v44  ;;  %v1016_v61 = vpop.f32.mrb[148].mxu1  ;;  %3765 = vmatpush1.bf16.msra.mxu0 %v3764_v4  ;;  %v2171_v44 = vld [vmem:[#allocation7 + $0x7f8] sm:$0xff] }
 0x277   :  { %v1488_v29 = vmax.f32 %v1016_v61, 0.0  ;;  %v1018_v52 = vpop.f32.mrb[149].mxu1  ;;  %1398 = vmatmul.mubr.f32.gmra.mrb[254].mxu1 %v4779_v31  ;;  %3767 = vmatprep.subr.bf16.mxu0 %v3766_v7  ;;  %v2166_v7 = vld [vmem:[#allocation7 + $0x7d0] sm:$0xff] }
 0x278   :  { %v1489_v30 = vmax.f32 %v1018_v52, 0.0  ;;  %2804 = vmatprep.mubr.f32.mxu0 %v1737_v19  ;;  %v3788_v33 = vpack.c.bf16 %v2166_v7, %v2164_v16  ;;  %v2170_v52 = vld [vmem:[#allocation7 + $0x7f0] sm:$0xff] }
 0x279   :  { %2805 = vmatmul.mubr.f32.gmra.mrb[18].mxu0 %v1736_v10  ;;  %v1744_v58 = vmul.f32 %v1488_v29, %v1488_v29  ;;  %v3790_v10 = vpack.c.bf16 %v2171_v44, %v2169_v8  ;;  %v2168_v29 = vld [vmem:[#allocation7 + $0x7e0] sm:$0xff] }
 0x27a   :  { %v1745_v23 = vmul.f32 %v1489_v30, %v1489_v30  ;;  %v1022_v3 = vpop.f32.mrb[150].mxu1  ;;  %3769 = vmatpush1.bf16.msra.mxu0 %v3768_v55  ;;  %v3792_v39 = vpack.c.bf16 %v2170_v52, %v2168_v29 }
 0x27b   :  { %v1496_v2 = vmax.f32 %v1022_v3, 0.0  ;;  %v1024_v14 = vpop.f32.mrb[151].mxu1  ;;  %3771 = vmatprep.subr.bf16.mxu0 %v3770_v36 }
 0x27c   :  { %v1497_v49 = vmax.f32 %v1024_v14, 0.0  ;;  %2810 = vmatprep.mubr.f32.mxu0 %v1745_v23 }
 0x27d   :  { %2811 = vmatmul.mubr.f32.gmra.mrb[20].mxu0 %v1744_v58  ;;  %v1752_v21 = vmul.f32 %v1496_v2, %v1496_v2 }
 0x27e   :  { %v1753_v60 = vmul.f32 %v1497_v49, %v1497_v49  ;;  %v1028_v32 = vpop.f32.mrb[152].mxu1  ;;  %3773 = vmatpush1.bf16.msra.mxu0 %v3772_v35 }
 0x27f   :  { %v1504_v54 = vmax.f32 %v1028_v32, 0.0  ;;  %v1030_v41 = vpop.f32.mrb[153].mxu1  ;;  %3775 = vmatprep.subr.bf16.mxu0 %v3774_v25 }
 0x280   :  { %v1505_v5 = vmax.f32 %v1030_v41, 0.0  ;;  %2816 = vmatprep.mubr.f32.mxu0 %v1753_v60 }
 0x281   :  { %2817 = vmatmul.mubr.f32.gmra.mrb[22].mxu0 %v1752_v21  ;;  %v1760_v50 = vmul.f32 %v1504_v54, %v1504_v54 }
 0x282   :  { %v1761_v9 = vmul.f32 %v1505_v5, %v1505_v5  ;;  %v1034_v17 = vpop.f32.mrb[154].mxu1  ;;  %3777 = vmatpush1.bf16.msra.mxu0 %v3776_v46 }
 0x283   :  { %v1512_v43 = vmax.f32 %v1034_v17, 0.0  ;;  %v1036_v37 = vpop.f32.mrb[155].mxu1  ;;  %3779 = vmatprep.subr.bf16.mxu0 %v3778_v12 }
 0x284   :  { %v1513_v28 = vmax.f32 %v1036_v37, 0.0  ;;  %2822 = vmatprep.mubr.f32.mxu0 %v1761_v9 }
 0x285   :  { %2823 = vmatmul.mubr.f32.gmra.mrb[24].mxu0 %v1760_v50  ;;  %v1768_v4 = vmul.f32 %v1512_v43, %v1512_v43 }
 0x286   :  { %v1769_v26 = vmul.f32 %v1513_v28, %v1513_v28  ;;  %v1040_v1 = vpop.f32.mrb[156].mxu1  ;;  %3781 = vmatpush1.bf16.msra.mxu0 %v3780_v63 }
 0x287   :  { %v1520_v38 = vmax.f32 %v1040_v1, 0.0  ;;  %v1042_v24 = vpop.f32.mrb[157].mxu1  ;;  %3783 = vmatprep.subr.bf16.mxu0 %v3782_v15 }
 0x288   :  { %v1521_v42 = vmax.f32 %v1042_v24, 0.0  ;;  %2828 = vmatprep.mubr.f32.mxu0 %v1769_v26 }
 0x289   :  { %2829 = vmatmul.mubr.f32.gmra.mrb[26].mxu0 %v1768_v4  ;;  %v1776_v19 = vmul.f32 %v1520_v38, %v1520_v38 }
 0x28a   :  { %v1777_v47 = vmul.f32 %v1521_v42, %v1521_v42  ;;  %v1046_v56 = vpop.f32.mrb[158].mxu1  ;;  %3785 = vmatpush1.bf16.msra.mxu0 %v3784_v48 }
 0x28b   :  { %v1528_v61 = vmax.f32 %v1046_v56, 0.0  ;;  %v1048_v55 = vpop.f32.mrb[159].mxu1  ;;  %3787 = vmatprep.subr.bf16.mxu0 %v3786_v59 }
 0x28c   :  { %v1529_v31 = vmax.f32 %v1048_v55, 0.0  ;;  %2834 = vmatprep.mubr.f32.mxu0 %v1777_v47 }
 0x28d   :  { %2835 = vmatmul.mubr.f32.gmra.mrb[28].mxu0 %v1776_v19  ;;  %v1784_v30 = vmul.f32 %v1528_v61, %v1528_v61 }
 0x28e   :  { %v1785_v36 = vmul.f32 %v1529_v31, %v1529_v31  ;;  %v1052_v53 = vpop.f32.mrb[160].mxu1  ;;  %3789 = vmatpush1.bf16.msra.mxu0 %v3788_v33 }
 0x28f   :  { %v1536_v51 = vmax.f32 %v1052_v53, 0.0  ;;  %v1054_v18 = vpop.f32.mrb[161].mxu1  ;;  %3791 = vmatprep.subr.bf16.mxu0 %v3790_v10 }
 0x290   :  { %v1537_v23 = vmax.f32 %v1054_v18, 0.0  ;;  %2840 = vmatprep.mubr.f32.mxu0 %v1785_v36 }
 0x291   :  { %2841 = vmatmul.mubr.f32.gmra.mrb[30].mxu0 %v1784_v30  ;;  %v1792_v58 = vmul.f32 %v1536_v51, %v1536_v51 }
 0x292   :  { %v1793_v3 = vmul.f32 %v1537_v23, %v1537_v23  ;;  %v1058_v35 = vpop.f32.mrb[162].mxu1  ;;  %3793 = vmatpush1.bf16.msra.mxu0 %v3792_v39 }
 0x293   :  { %v1544_v2 = vmax.f32 %v1058_v35, 0.0  ;;  %v1060_v14 = vpop.f32.mrb[163].mxu1 }
 0x294   :  { %v1545_v25 = vmax.f32 %v1060_v14, 0.0  ;;  %2846 = vmatprep.mubr.f32.mxu0 %v1793_v3 }
 0x295   :  { %2847 = vmatmul.mubr.f32.gmra.mrb[32].mxu0 %v1792_v58  ;;  %v1800_v49 = vmul.f32 %v1544_v2, %v1544_v2 }
 0x296   :  { %v1801_v34 = vmul.f32 %v1545_v25, %v1545_v25  ;;  %v1064_v20 = vpop.f32.mrb[164].mxu1 }
 0x297   :  { %v1552_v22 = vmax.f32 %v1064_v20, 0.0  ;;  %v1066_v13 = vpop.f32.mrb[165].mxu1 }
 0x298   :  { %v1553_v60 = vmax.f32 %v1066_v13, 0.0  ;;  %2852 = vmatprep.mubr.f32.mxu0 %v1801_v34 }
 0x299   :  { %2853 = vmatmul.mubr.f32.gmra.mrb[34].mxu0 %v1800_v49  ;;  %v1808_v21 = vmul.f32 %v1552_v22, %v1552_v22 }
 0x29a   :  { %v1809_v32 = vmul.f32 %v1553_v60, %v1553_v60  ;;  %v1070_v46 = vpop.f32.mrb[166].mxu1 }
 0x29b   :  { %v1560_v54 = vmax.f32 %v1070_v46, 0.0  ;;  %v1072_v41 = vpop.f32.mrb[167].mxu1 }
 0x29c   :  { %v1561_v12 = vmax.f32 %v1072_v41, 0.0  ;;  %2858 = vmatprep.mubr.f32.mxu0 %v1809_v32 }
 0x29d   :  { %2859 = vmatmul.mubr.f32.gmra.mrb[36].mxu0 %v1808_v21  ;;  %v1816_v5 = vmul.f32 %v1560_v54, %v1560_v54 }
 0x29e   :  { %v1817_v6 = vmul.f32 %v1561_v12, %v1561_v12  ;;  %v1076_v57 = vpop.f32.mrb[168].mxu1 }
 0x29f   :  { %v1568_v11 = vmax.f32 %v1076_v57, 0.0  ;;  %v1078_v0 = vpop.f32.mrb[169].mxu1 }
 0x2a0   :  { %v1569_v9 = vmax.f32 %v1078_v0, 0.0  ;;  %2864 = vmatprep.mubr.f32.mxu0 %v1817_v6 }
 0x2a1   :  { %2865 = vmatmul.mubr.f32.gmra.mrb[38].mxu0 %v1816_v5  ;;  %v1824_v50 = vmul.f32 %v1568_v11, %v1568_v11 }
 0x2a2   :  { %v1825_v17 = vmul.f32 %v1569_v9, %v1569_v9  ;;  %v1082_v63 = vpop.f32.mrb[170].mxu1 }
 0x2a3   :  { %v1576_v43 = vmax.f32 %v1082_v63, 0.0  ;;  %v1084_v37 = vpop.f32.mrb[171].mxu1 }
 0x2a4   :  { %v1577_v15 = vmax.f32 %v1084_v37, 0.0  ;;  %2870 = vmatprep.mubr.f32.mxu0 %v1825_v17 }
 0x2a5   :  { %2871 = vmatmul.mubr.f32.gmra.mrb[40].mxu0 %v1824_v50  ;;  %v1832_v28 = vmul.f32 %v1576_v43, %v1576_v43 }
 0x2a6   :  { %v1833_v40 = vmul.f32 %v1577_v15, %v1577_v15  ;;  %v1088_v62 = vpop.f32.mrb[172].mxu1 }
 0x2a7   :  { %v1584_v45 = vmax.f32 %v1088_v62, 0.0  ;;  %v1090_v27 = vpop.f32.mrb[173].mxu1 }
 0x2a8   :  { %v1585_v26 = vmax.f32 %v1090_v27, 0.0  ;;  %2876 = vmatprep.mubr.f32.mxu0 %v1833_v40 }
 0x2a9   :  { %2877 = vmatmul.mubr.f32.gmra.mrb[42].mxu0 %v1832_v28  ;;  %v1840_v4 = vmul.f32 %v1584_v45, %v1584_v45 }
 0x2aa   :  { %v1841_v1 = vmul.f32 %v1585_v26, %v1585_v26  ;;  %v1094_v48 = vpop.f32.mrb[174].mxu1 }
 0x2ab   :  { %v1592_v38 = vmax.f32 %v1094_v48, 0.0  ;;  %v1096_v24 = vpop.f32.mrb[175].mxu1 }
 0x2ac   :  { %v1593_v59 = vmax.f32 %v1096_v24, 0.0  ;;  %2882 = vmatprep.mubr.f32.mxu0 %v1841_v1 }
 0x2ad   :  { %2883 = vmatmul.mubr.f32.gmra.mrb[44].mxu0 %v1840_v4  ;;  %v1848_v42 = vmul.f32 %v1592_v38, %v1592_v38 }
 0x2ae   :  { %v1849_v16 = vmul.f32 %v1593_v59, %v1593_v59  ;;  %v1100_v7 = vpop.f32.mrb[176].mxu1 }
 0x2af   :  { %v1600_v8 = vmax.f32 %v1100_v7, 0.0  ;;  %v1102_v44 = vpop.f32.mrb[177].mxu1 }
 0x2b0   :  { %v1601_v47 = vmax.f32 %v1102_v44, 0.0  ;;  %2888 = vmatprep.mubr.f32.mxu0 %v1849_v16 }
 0x2b1   :  { %2889 = vmatmul.mubr.f32.gmra.mrb[46].mxu0 %v1848_v42  ;;  %v1856_v19 = vmul.f32 %v1600_v8, %v1600_v8 }
 0x2b2   :  { %v1857_v56 = vmul.f32 %v1601_v47, %v1601_v47  ;;  %v1106_v33 = vpop.f32.mrb[178].mxu1 }
 0x2b3   :  { %v1608_v61 = vmax.f32 %v1106_v33, 0.0  ;;  %v1108_v55 = vpop.f32.mrb[179].mxu1 }
 0x2b4   :  { %v1609_v10 = vmax.f32 %v1108_v55, 0.0  ;;  %2894 = vmatprep.mubr.f32.mxu0 %v1857_v56 }
 0x2b5   :  { %2895 = vmatmul.mubr.f32.gmra.mrb[48].mxu0 %v1856_v19  ;;  %v1864_v31 = vmul.f32 %v1608_v61, %v1608_v61 }
 0x2b6   :  { %v1865_v29 = vmul.f32 %v1609_v10, %v1609_v10  ;;  %v1112_v52 = vpop.f32.mrb[180].mxu1 }
 0x2b7   :  { %v1616_v36 = vmax.f32 %v1112_v52, 0.0  ;;  %v1114_v53 = vpop.f32.mrb[181].mxu1 }
 0x2b8   :  { %v1617_v39 = vmax.f32 %v1114_v53, 0.0  ;;  %2900 = vmatprep.mubr.f32.mxu0 %v1865_v29 }
 0x2b9   :  { %2901 = vmatmul.mubr.f32.gmra.mrb[50].mxu0 %v1864_v31  ;;  %v1872_v18 = vmul.f32 %v1616_v36, %v1616_v36 }
 0x2ba   :  { %v1873_v30 = vmul.f32 %v1617_v39, %v1617_v39  ;;  %v1118_v51 = vpop.f32.mrb[182].mxu1 }
 0x2bb   :  { %v1624_v23 = vmax.f32 %v1118_v51, 0.0  ;;  %v1120_v3 = vpop.f32.mrb[183].mxu1 }
 0x2bc   :  { %v1625_v35 = vmax.f32 %v1120_v3, 0.0  ;;  %2906 = vmatprep.mubr.f32.mxu0 %v1873_v30 }
 0x2bd   :  { %2907 = vmatmul.mubr.f32.gmra.mrb[52].mxu0 %v1872_v18  ;;  %v1880_v14 = vmul.f32 %v1624_v23, %v1624_v23 }
 0x2be   :  { %v1881_v58 = vmul.f32 %v1625_v35, %v1625_v35  ;;  %v1124_v2 = vpop.f32.mrb[184].mxu1 }
 0x2bf   :  { %v1632_v25 = vmax.f32 %v1124_v2, 0.0  ;;  %v1126_v34 = vpop.f32.mrb[185].mxu1 }
 0x2c0   :  { %v1633_v20 = vmax.f32 %v1126_v34, 0.0  ;;  %2912 = vmatprep.mubr.f32.mxu0 %v1881_v58 }
 0x2c1   :  { %2913 = vmatmul.mubr.f32.gmra.mrb[54].mxu0 %v1880_v14  ;;  %v1888_v13 = vmul.f32 %v1632_v25, %v1632_v25 }
 0x2c2   :  { %v1889_v49 = vmul.f32 %v1633_v20, %v1633_v20  ;;  %v1130_v22 = vpop.f32.mrb[186].mxu1 }
 0x2c3   :  { %v1640_v60 = vmax.f32 %v1130_v22, 0.0  ;;  %v1132_v32 = vpop.f32.mrb[187].mxu1 }
 0x2c4   :  { %v1641_v46 = vmax.f32 %v1132_v32, 0.0  ;;  %2918 = vmatprep.mubr.f32.mxu0 %v1889_v49 }
 0x2c5   :  { %2919 = vmatmul.mubr.f32.gmra.mrb[56].mxu0 %v1888_v13  ;;  %v1896_v41 = vmul.f32 %v1640_v60, %v1640_v60 }
 0x2c6   :  { %v1897_v21 = vmul.f32 %v1641_v46, %v1641_v46  ;;  %v1136_v54 = vpop.f32.mrb[188].mxu1 }
 0x2c7   :  { %v1648_v12 = vmax.f32 %v1136_v54, 0.0  ;;  %v1138_v6 = vpop.f32.mrb[189].mxu1 }
 0x2c8   :  { %v1649_v57 = vmax.f32 %v1138_v6, 0.0  ;;  %2924 = vmatprep.mubr.f32.mxu0 %v1897_v21 }
 0x2c9   :  { %2925 = vmatmul.mubr.f32.gmra.mrb[58].mxu0 %v1896_v41  ;;  %v1904_v0 = vmul.f32 %v1648_v12, %v1648_v12 }
 0x2ca   :  { %v1905_v5 = vmul.f32 %v1649_v57, %v1649_v57  ;;  %v1142_v11 = vpop.f32.mrb[190].mxu1 }
 0x2cb   :  { %v1656_v9 = vmax.f32 %v1142_v11, 0.0  ;;  %v1144_v17 = vpop.f32.mrb[191].mxu1 }
 0x2cc   :  { %v1657_v63 = vmax.f32 %v1144_v17, 0.0  ;;  %2930 = vmatprep.mubr.f32.mxu0 %v1905_v5 }
 0x2cd   :  { %2931 = vmatmul.mubr.f32.gmra.mrb[60].mxu0 %v1904_v0  ;;  %v1912_v37 = vmul.f32 %v1656_v9, %v1656_v9 }
 0x2ce   :  { %v1913_v50 = vmul.f32 %v1657_v63, %v1657_v63  ;;  %v1213_v43 = vpop.f32.mrb[192].mxu1 }
 0x2cf   :  { %v1410_v15 = vmax.f32 %v1213_v43, 0.0  ;;  %v1215_v40 = vpop.f32.mrb[193].mxu1 }
 0x2d0   :  { %v1411_v62 = vmax.f32 %v1215_v40, 0.0  ;;  %2936 = vmatprep.mubr.f32.mxu0 %v1913_v50 }
 0x2d1   :  { %2937 = vmatmul.mubr.f32.gmra.mrb[62].mxu0 %v1912_v37  ;;  %v1666_v27 = vmul.f32 %v1410_v15, %v1410_v15 }
 0x2d2   :  { %v1667_v28 = vmul.f32 %v1411_v62, %v1411_v62  ;;  %v1219_v45 = vpop.f32.mrb[194].mxu1 }
 0x2d3   :  { %v1418_v26 = vmax.f32 %v1219_v45, 0.0  ;;  %v1221_v1 = vpop.f32.mrb[195].mxu1 }
 0x2d4   :  { %v1419_v48 = vmax.f32 %v1221_v1, 0.0  ;;  %3007 = vmatprep.mubr.f32.mxu0 %v1667_v28 }
 0x2d5   :  { %3008 = vmatmul.mubr.f32.vlgmr.msra.gmra.mrb[0].mxu0 %v1666_v27  ;;  %v1674_v24 = vmul.f32 %v1418_v26, %v1418_v26 }
 0x2d6   :  { %v1675_v4 = vmul.f32 %v1419_v48, %v1419_v48  ;;  %v1225_v38 = vpop.f32.mrb[196].mxu1 }
 0x2d7   :  { %v1426_v59 = vmax.f32 %v1225_v38, 0.0  ;;  %v1227_v16 = vpop.f32.mrb[197].mxu1 }
 0x2d8   :  { %v1427_v7 = vmax.f32 %v1227_v16, 0.0  ;;  %3013 = vmatprep.mubr.f32.mxu0 %v1675_v4 }
 0x2d9   :  { %3014 = vmatmul.mubr.f32.gmra.mrb[2].mxu0 %v1674_v24  ;;  %v1682_v44 = vmul.f32 %v1426_v59, %v1426_v59 }
 0x2da   :  { %v1683_v42 = vmul.f32 %v1427_v7, %v1427_v7  ;;  %v1231_v8 = vpop.f32.mrb[198].mxu1 }
 0x2db   :  { %v1434_v47 = vmax.f32 %v1231_v8, 0.0  ;;  %v1233_v56 = vpop.f32.mrb[199].mxu1 }
 0x2dc   :  { %v1435_v33 = vmax.f32 %v1233_v56, 0.0  ;;  %3019 = vmatprep.mubr.f32.mxu0 %v1683_v42 }
 0x2dd   :  { %3020 = vmatmul.mubr.f32.gmra.mrb[4].mxu0 %v1682_v44  ;;  %v1690_v55 = vmul.f32 %v1434_v47, %v1434_v47 }
 0x2de   :  { %v1691_v19 = vmul.f32 %v1435_v33, %v1435_v33  ;;  %v1237_v61 = vpop.f32.mrb[200].mxu1 }
 0x2df   :  { %v1442_v10 = vmax.f32 %v1237_v61, 0.0  ;;  %v1239_v29 = vpop.f32.mrb[201].mxu1 }
 0x2e0   :  { %v1443_v52 = vmax.f32 %v1239_v29, 0.0  ;;  %3025 = vmatprep.mubr.f32.mxu0 %v1691_v19 }
 0x2e1   :  { %3026 = vmatmul.mubr.f32.gmra.mrb[6].mxu0 %v1690_v55  ;;  %v1698_v53 = vmul.f32 %v1442_v10, %v1442_v10 }
 0x2e2   :  { %v1699_v31 = vmul.f32 %v1443_v52, %v1443_v52  ;;  %v1243_v36 = vpop.f32.mrb[202].mxu1 }
 0x2e3   :  { %v1450_v39 = vmax.f32 %v1243_v36, 0.0  ;;  %v1245_v30 = vpop.f32.mrb[203].mxu1 }
 0x2e4   :  { %v1451_v51 = vmax.f32 %v1245_v30, 0.0  ;;  %3031 = vmatprep.mubr.f32.mxu0 %v1699_v31 }
 0x2e5   :  { %3032 = vmatmul.mubr.f32.gmra.mrb[8].mxu0 %v1698_v53  ;;  %v1706_v3 = vmul.f32 %v1450_v39, %v1450_v39 }
 0x2e6   :  { %v1707_v18 = vmul.f32 %v1451_v51, %v1451_v51  ;;  %v1249_v23 = vpop.f32.mrb[204].mxu1 }
 0x2e7   :  { %v1458_v35 = vmax.f32 %v1249_v23, 0.0  ;;  %v1251_v58 = vpop.f32.mrb[205].mxu1 }
 0x2e8   :  { %v1459_v2 = vmax.f32 %v1251_v58, 0.0  ;;  %3037 = vmatprep.mubr.f32.mxu0 %v1707_v18 }
 0x2e9   :  { %3038 = vmatmul.mubr.f32.gmra.mrb[10].mxu0 %v1706_v3  ;;  %v1714_v34 = vmul.f32 %v1458_v35, %v1458_v35 }
 0x2ea   :  { %v1715_v14 = vmul.f32 %v1459_v2, %v1459_v2  ;;  %v1255_v25 = vpop.f32.mrb[206].mxu1 }
 0x2eb   :  { %v1466_v20 = vmax.f32 %v1255_v25, 0.0  ;;  %v1257_v49 = vpop.f32.mrb[207].mxu1 }
 0x2ec   :  { %v1467_v22 = vmax.f32 %v1257_v49, 0.0  ;;  %3043 = vmatprep.mubr.f32.mxu0 %v1715_v14 }
 0x2ed   :  { %3044 = vmatmul.mubr.f32.gmra.mrb[12].mxu0 %v1714_v34  ;;  %v1722_v32 = vmul.f32 %v1466_v20, %v1466_v20 }
 0x2ee   :  { %v1723_v13 = vmul.f32 %v1467_v22, %v1467_v22  ;;  %v1261_v60 = vpop.f32.mrb[208].mxu1 }
 0x2ef   :  { %v1474_v46 = vmax.f32 %v1261_v60, 0.0  ;;  %v1263_v21 = vpop.f32.mrb[209].mxu1 }
 0x2f0   :  { %v1475_v54 = vmax.f32 %v1263_v21, 0.0  ;;  %3049 = vmatprep.mubr.f32.mxu0 %v1723_v13 }
 0x2f1   :  { %3050 = vmatmul.mubr.f32.gmra.mrb[14].mxu0 %v1722_v32  ;;  %v1730_v6 = vmul.f32 %v1474_v46, %v1474_v46 }
 0x2f2   :  { %v1731_v41 = vmul.f32 %v1475_v54, %v1475_v54  ;;  %v1267_v12 = vpop.f32.mrb[210].mxu1 }
 0x2f3   :  { %v1482_v57 = vmax.f32 %v1267_v12, 0.0  ;;  %v1269_v5 = vpop.f32.mrb[211].mxu1 }
 0x2f4   :  { %v1483_v11 = vmax.f32 %v1269_v5, 0.0  ;;  %3055 = vmatprep.mubr.f32.mxu0 %v1731_v41 }
 0x2f5   :  { %3056 = vmatmul.mubr.f32.gmra.mrb[16].mxu0 %v1730_v6  ;;  %v1738_v17 = vmul.f32 %v1482_v57, %v1482_v57 }
 0x2f6   :  { %v1739_v0 = vmul.f32 %v1483_v11, %v1483_v11  ;;  %v1273_v9 = vpop.f32.mrb[212].mxu1 }
 0x2f7   :  { %v1490_v63 = vmax.f32 %v1273_v9, 0.0  ;;  %v1275_v50 = vpop.f32.mrb[213].mxu1 }
 0x2f8   :  { %v1491_v43 = vmax.f32 %v1275_v50, 0.0  ;;  %3061 = vmatprep.mubr.f32.mxu0 %v1739_v0 }
 0x2f9   :  { %3062 = vmatmul.mubr.f32.gmra.mrb[18].mxu0 %v1738_v17  ;;  %v1746_v40 = vmul.f32 %v1490_v63, %v1490_v63 }
 0x2fa   :  { %v1747_v37 = vmul.f32 %v1491_v43, %v1491_v43  ;;  %v1279_v15 = vpop.f32.mrb[214].mxu1 }
 0x2fb   :  { %v1498_v62 = vmax.f32 %v1279_v15, 0.0  ;;  %v1281_v28 = vpop.f32.mrb[215].mxu1 }
 0x2fc   :  { %v1499_v45 = vmax.f32 %v1281_v28, 0.0  ;;  %3067 = vmatprep.mubr.f32.mxu0 %v1747_v37 }
 0x2fd   :  { %3068 = vmatmul.mubr.f32.gmra.mrb[20].mxu0 %v1746_v40  ;;  %v1754_v1 = vmul.f32 %v1498_v62, %v1498_v62 }
 0x2fe   :  { %v1755_v27 = vmul.f32 %v1499_v45, %v1499_v45  ;;  %v1285_v26 = vpop.f32.mrb[216].mxu1 }
 0x2ff   :  { %v1506_v48 = vmax.f32 %v1285_v26, 0.0  ;;  %v1287_v4 = vpop.f32.mrb[217].mxu1 }
 0x300   :  { %v1507_v38 = vmax.f32 %v1287_v4, 0.0  ;;  %3073 = vmatprep.mubr.f32.mxu0 %v1755_v27 }
 0x301   :  { %3074 = vmatmul.mubr.f32.gmra.mrb[22].mxu0 %v1754_v1  ;;  %v1762_v16 = vmul.f32 %v1506_v48, %v1506_v48 }
 0x302   :  { %v1763_v24 = vmul.f32 %v1507_v38, %v1507_v38  ;;  %v1291_v59 = vpop.f32.mrb[218].mxu1 }
 0x303   :  { %v1514_v7 = vmax.f32 %v1291_v59, 0.0  ;;  %v1293_v42 = vpop.f32.mrb[219].mxu1 }
 0x304   :  { %v1515_v8 = vmax.f32 %v1293_v42, 0.0  ;;  %3079 = vmatprep.mubr.f32.mxu0 %v1763_v24 }
 0x305   :  { %3080 = vmatmul.mubr.f32.gmra.mrb[24].mxu0 %v1762_v16  ;;  %v1770_v56 = vmul.f32 %v1514_v7, %v1514_v7 }
 0x306   :  { %v1771_v44 = vmul.f32 %v1515_v8, %v1515_v8  ;;  %v1297_v47 = vpop.f32.mrb[220].mxu1 }
 0x307   :  { %v1522_v33 = vmax.f32 %v1297_v47, 0.0  ;;  %v1299_v19 = vpop.f32.mrb[221].mxu1 }
 0x308   :  { %v1523_v61 = vmax.f32 %v1299_v19, 0.0  ;;  %3085 = vmatprep.mubr.f32.mxu0 %v1771_v44 }
 0x309   :  { %3086 = vmatmul.mubr.f32.gmra.mrb[26].mxu0 %v1770_v56  ;;  %v1778_v29 = vmul.f32 %v1522_v33, %v1522_v33 }
 0x30a   :  { %v1779_v55 = vmul.f32 %v1523_v61, %v1523_v61  ;;  %v1303_v10 = vpop.f32.mrb[222].mxu1 }
 0x30b   :  { %v1530_v52 = vmax.f32 %v1303_v10, 0.0  ;;  %v1305_v31 = vpop.f32.mrb[223].mxu1 }
 0x30c   :  { %v1531_v36 = vmax.f32 %v1305_v31, 0.0  ;;  %3091 = vmatprep.mubr.f32.mxu0 %v1779_v55 }
 0x30d   :  { %3092 = vmatmul.mubr.f32.gmra.mrb[28].mxu0 %v1778_v29  ;;  %v1786_v30 = vmul.f32 %v1530_v52, %v1530_v52 }
 0x30e   :  { %v1787_v53 = vmul.f32 %v1531_v36, %v1531_v36  ;;  %v1309_v39 = vpop.f32.mrb[224].mxu1 }
 0x30f   :  { %v1538_v51 = vmax.f32 %v1309_v39, 0.0  ;;  %v1311_v18 = vpop.f32.mrb[225].mxu1 }
 0x310   :  { %v1539_v23 = vmax.f32 %v1311_v18, 0.0  ;;  %3097 = vmatprep.mubr.f32.mxu0 %v1787_v53 }
 0x311   :  { %3098 = vmatmul.mubr.f32.gmra.mrb[30].mxu0 %v1786_v30  ;;  %v1794_v58 = vmul.f32 %v1538_v51, %v1538_v51 }
 0x312   :  { %v1795_v3 = vmul.f32 %v1539_v23, %v1539_v23  ;;  %v1315_v35 = vpop.f32.mrb[226].mxu1 }
 0x313   :  { %v1546_v2 = vmax.f32 %v1315_v35, 0.0  ;;  %v1317_v14 = vpop.f32.mrb[227].mxu1 }
 0x314   :  { %v1547_v25 = vmax.f32 %v1317_v14, 0.0  ;;  %3103 = vmatprep.mubr.f32.mxu0 %v1795_v3 }
 0x315   :  { %3104 = vmatmul.mubr.f32.gmra.mrb[32].mxu0 %v1794_v58  ;;  %v1802_v49 = vmul.f32 %v1546_v2, %v1546_v2 }
 0x316   :  { %v1803_v34 = vmul.f32 %v1547_v25, %v1547_v25  ;;  %v1321_v20 = vpop.f32.mrb[228].mxu1 }
 0x317   :  { %v1554_v22 = vmax.f32 %v1321_v20, 0.0  ;;  %v1323_v13 = vpop.f32.mrb[229].mxu1 }
 0x318   :  { %v1555_v60 = vmax.f32 %v1323_v13, 0.0  ;;  %3109 = vmatprep.mubr.f32.mxu0 %v1803_v34 }
 0x319   :  { %3110 = vmatmul.mubr.f32.gmra.mrb[34].mxu0 %v1802_v49  ;;  %v1810_v21 = vmul.f32 %v1554_v22, %v1554_v22 }
 0x31a   :  { %v1811_v32 = vmul.f32 %v1555_v60, %v1555_v60  ;;  %v1327_v46 = vpop.f32.mrb[230].mxu1 }
 0x31b   :  { %v1562_v54 = vmax.f32 %v1327_v46, 0.0  ;;  %v1329_v41 = vpop.f32.mrb[231].mxu1 }
 0x31c   :  { %v1563_v12 = vmax.f32 %v1329_v41, 0.0  ;;  %3115 = vmatprep.mubr.f32.mxu0 %v1811_v32 }
 0x31d   :  { %3116 = vmatmul.mubr.f32.gmra.mrb[36].mxu0 %v1810_v21  ;;  %v1818_v5 = vmul.f32 %v1562_v54, %v1562_v54 }
 0x31e   :  { %v1819_v6 = vmul.f32 %v1563_v12, %v1563_v12  ;;  %v1333_v57 = vpop.f32.mrb[232].mxu1 }
 0x31f   :  { %v1570_v11 = vmax.f32 %v1333_v57, 0.0  ;;  %v1335_v0 = vpop.f32.mrb[233].mxu1 }
 0x320   :  { %v1571_v9 = vmax.f32 %v1335_v0, 0.0  ;;  %3121 = vmatprep.mubr.f32.mxu0 %v1819_v6 }
 0x321   :  { %3122 = vmatmul.mubr.f32.gmra.mrb[38].mxu0 %v1818_v5  ;;  %v1826_v50 = vmul.f32 %v1570_v11, %v1570_v11 }
 0x322   :  { %v1827_v17 = vmul.f32 %v1571_v9, %v1571_v9  ;;  %v1339_v63 = vpop.f32.mrb[234].mxu1 }
 0x323   :  { %v1578_v43 = vmax.f32 %v1339_v63, 0.0  ;;  %v1341_v37 = vpop.f32.mrb[235].mxu1 }
 0x324   :  { %v1579_v15 = vmax.f32 %v1341_v37, 0.0  ;;  %3127 = vmatprep.mubr.f32.mxu0 %v1827_v17 }
 0x325   :  { %3128 = vmatmul.mubr.f32.gmra.mrb[40].mxu0 %v1826_v50  ;;  %v1834_v28 = vmul.f32 %v1578_v43, %v1578_v43 }
 0x326   :  { %v1835_v40 = vmul.f32 %v1579_v15, %v1579_v15  ;;  %v1345_v62 = vpop.f32.mrb[236].mxu1 }
 0x327   :  { %v1586_v45 = vmax.f32 %v1345_v62, 0.0  ;;  %v1347_v27 = vpop.f32.mrb[237].mxu1 }
 0x328   :  { %v1587_v26 = vmax.f32 %v1347_v27, 0.0  ;;  %3133 = vmatprep.mubr.f32.mxu0 %v1835_v40 }
 0x329   :  { %3134 = vmatmul.mubr.f32.gmra.mrb[42].mxu0 %v1834_v28  ;;  %v1842_v4 = vmul.f32 %v1586_v45, %v1586_v45 }
 0x32a   :  { %v1843_v1 = vmul.f32 %v1587_v26, %v1587_v26  ;;  %v1351_v48 = vpop.f32.mrb[238].mxu1 }
 0x32b   :  { %v1594_v38 = vmax.f32 %v1351_v48, 0.0  ;;  %v1353_v24 = vpop.f32.mrb[239].mxu1 }
 0x32c   :  { %v1595_v59 = vmax.f32 %v1353_v24, 0.0  ;;  %3139 = vmatprep.mubr.f32.mxu0 %v1843_v1 }
 0x32d   :  { %3140 = vmatmul.mubr.f32.gmra.mrb[44].mxu0 %v1842_v4  ;;  %v1850_v42 = vmul.f32 %v1594_v38, %v1594_v38 }
 0x32e   :  { %v1851_v16 = vmul.f32 %v1595_v59, %v1595_v59  ;;  %v1357_v7 = vpop.f32.mrb[240].mxu1 }
 0x32f   :  { %v1602_v8 = vmax.f32 %v1357_v7, 0.0  ;;  %v1359_v44 = vpop.f32.mrb[241].mxu1 }
 0x330   :  { %v1603_v47 = vmax.f32 %v1359_v44, 0.0  ;;  %3145 = vmatprep.mubr.f32.mxu0 %v1851_v16 }
 0x331   :  { %3146 = vmatmul.mubr.f32.gmra.mrb[46].mxu0 %v1850_v42  ;;  %v1858_v19 = vmul.f32 %v1602_v8, %v1602_v8 }
 0x332   :  { %v1859_v56 = vmul.f32 %v1603_v47, %v1603_v47  ;;  %v1363_v33 = vpop.f32.mrb[242].mxu1 }
 0x333   :  { %v1610_v61 = vmax.f32 %v1363_v33, 0.0  ;;  %v1365_v55 = vpop.f32.mrb[243].mxu1 }
 0x334   :  { %v1611_v10 = vmax.f32 %v1365_v55, 0.0  ;;  %3151 = vmatprep.mubr.f32.mxu0 %v1859_v56 }
 0x335   :  { %3152 = vmatmul.mubr.f32.gmra.mrb[48].mxu0 %v1858_v19  ;;  %v1866_v31 = vmul.f32 %v1610_v61, %v1610_v61 }
 0x336   :  { %v1867_v29 = vmul.f32 %v1611_v10, %v1611_v10  ;;  %v1369_v52 = vpop.f32.mrb[244].mxu1 }
 0x337   :  { %v1618_v36 = vmax.f32 %v1369_v52, 0.0  ;;  %v1371_v53 = vpop.f32.mrb[245].mxu1 }
 0x338   :  { %v1619_v39 = vmax.f32 %v1371_v53, 0.0  ;;  %3157 = vmatprep.mubr.f32.mxu0 %v1867_v29 }
 0x339   :  { %3158 = vmatmul.mubr.f32.gmra.mrb[50].mxu0 %v1866_v31  ;;  %v1874_v18 = vmul.f32 %v1618_v36, %v1618_v36 }
 0x33a   :  { %v1875_v30 = vmul.f32 %v1619_v39, %v1619_v39  ;;  %v1375_v51 = vpop.f32.mrb[246].mxu1 }
 0x33b   :  { %v1626_v23 = vmax.f32 %v1375_v51, 0.0  ;;  %v1377_v3 = vpop.f32.mrb[247].mxu1 }
 0x33c   :  { %v1627_v35 = vmax.f32 %v1377_v3, 0.0  ;;  %3163 = vmatprep.mubr.f32.mxu0 %v1875_v30 }
 0x33d   :  { %3164 = vmatmul.mubr.f32.gmra.mrb[52].mxu0 %v1874_v18  ;;  %v1882_v14 = vmul.f32 %v1626_v23, %v1626_v23 }
 0x33e   :  { %v1883_v58 = vmul.f32 %v1627_v35, %v1627_v35  ;;  %v1381_v2 = vpop.f32.mrb[248].mxu1 }
 0x33f   :  { %v1634_v25 = vmax.f32 %v1381_v2, 0.0  ;;  %v1383_v34 = vpop.f32.mrb[249].mxu1 }
 0x340   :  { %v1635_v20 = vmax.f32 %v1383_v34, 0.0  ;;  %3169 = vmatprep.mubr.f32.mxu0 %v1883_v58 }
 0x341   :  { %3170 = vmatmul.mubr.f32.gmra.mrb[54].mxu0 %v1882_v14  ;;  %v1890_v13 = vmul.f32 %v1634_v25, %v1634_v25 }
 0x342   :  { %v1891_v49 = vmul.f32 %v1635_v20, %v1635_v20  ;;  %v1387_v22 = vpop.f32.mrb[250].mxu1 }
 0x343   :  { %v1642_v60 = vmax.f32 %v1387_v22, 0.0  ;;  %v1389_v32 = vpop.f32.mrb[251].mxu1 }
 0x344   :  { %v1643_v46 = vmax.f32 %v1389_v32, 0.0  ;;  %3175 = vmatprep.mubr.f32.mxu0 %v1891_v49 }
 0x345   :  { %3176 = vmatmul.mubr.f32.gmra.mrb[56].mxu0 %v1890_v13  ;;  %v1898_v41 = vmul.f32 %v1642_v60, %v1642_v60 }
 0x346   :  { %v1899_v21 = vmul.f32 %v1643_v46, %v1643_v46  ;;  %v1393_v54 = vpop.f32.mrb[252].mxu1 }
 0x347   :  { %v1650_v12 = vmax.f32 %v1393_v54, 0.0  ;;  %v1395_v6 = vpop.f32.mrb[253].mxu1 }
 0x348   :  { %v1651_v57 = vmax.f32 %v1395_v6, 0.0  ;;  %3181 = vmatprep.mubr.f32.mxu0 %v1899_v21 }
 0x349   :  { %3182 = vmatmul.mubr.f32.gmra.mrb[58].mxu0 %v1898_v41  ;;  %v1906_v0 = vmul.f32 %v1650_v12, %v1650_v12 }
 0x34a   :  { %v1907_v5 = vmul.f32 %v1651_v57, %v1651_v57  ;;  %v1399_v11 = vpop.f32.mrb[254].mxu1 }
 0x34b   :  { %v1658_v9 = vmax.f32 %v1399_v11, 0.0  ;;  %v1401_v17 = vpop.f32.mrb[255].mxu1 }
 0x34c   :  { %v1659_v63 = vmax.f32 %v1401_v17, 0.0  ;;  %3187 = vmatprep.mubr.f32.mxu0 %v1907_v5 }
 0x34d   :  { %3188 = vmatmul.mubr.f32.gmra.mrb[60].mxu0 %v1906_v0  ;;  %v1914_v43 = vmul.f32 %v1658_v9, %v1658_v9 }
 0x34e   :  { %v1915_v50 = vmul.f32 %v1659_v63, %v1659_v63 }
 0x350   :  { %3193 = vmatprep.mubr.f32.mxu0 %v1915_v50 }
 0x351   :  { %3194 = vmatmul.mubr.f32.gmra.mrb[62].mxu0 %v1914_v43 }
 0x3a8   :  { %v3009_v37 = vpop.f32.mrb[0].mxu0 }
 0x3a9   :  { %3200 = vst [vmem:[#allocation8] sm:$0xff] %v3009_v37  ;;  %v3011_v15 = vpop.f32.mrb[1].mxu0 }
 0x3aa   :  { %3201 = vst [vmem:[#allocation8 + $0x8] sm:$0xff] %v3011_v15 }
 0x3ac   :  { %v3015_v40 = vpop.f32.mrb[2].mxu0 }
 0x3ad   :  { %3202 = vst [vmem:[#allocation8 + $0x10] sm:$0xff] %v3015_v40  ;;  %v3017_v62 = vpop.f32.mrb[3].mxu0 }
 0x3ae   :  { %3203 = vst [vmem:[#allocation8 + $0x18] sm:$0xff] %v3017_v62 }
 0x3b0   :  { %v3021_v28 = vpop.f32.mrb[4].mxu0 }
 0x3b1   :  { %3204 = vst [vmem:[#allocation8 + $0x20] sm:$0xff] %v3021_v28  ;;  %v3023_v45 = vpop.f32.mrb[5].mxu0 }
 0x3b2   :  { %3205 = vst [vmem:[#allocation8 + $0x28] sm:$0xff] %v3023_v45 }
 0x3b4   :  { %v3027_v27 = vpop.f32.mrb[6].mxu0 }
 0x3b5   :  { %3206 = vst [vmem:[#allocation8 + $0x30] sm:$0xff] %v3027_v27  ;;  %v3029_v26 = vpop.f32.mrb[7].mxu0 }
 0x3b6   :  { %3207 = vst [vmem:[#allocation8 + $0x38] sm:$0xff] %v3029_v26 }
 0x3b8   :  { %v3033_v1 = vpop.f32.mrb[8].mxu0 }
 0x3b9   :  { %3208 = vst [vmem:[#allocation8 + $0x40] sm:$0xff] %v3033_v1  ;;  %v3035_v48 = vpop.f32.mrb[9].mxu0 }
 0x3ba   :  { %3209 = vst [vmem:[#allocation8 + $0x48] sm:$0xff] %v3035_v48 }
 0x3bc   :  { %v3039_v4 = vpop.f32.mrb[10].mxu0 }
 0x3bd   :  { %3210 = vst [vmem:[#allocation8 + $0x50] sm:$0xff] %v3039_v4  ;;  %v3041_v38 = vpop.f32.mrb[11].mxu0 }
 0x3be   :  { %3211 = vst [vmem:[#allocation8 + $0x58] sm:$0xff] %v3041_v38 }
 0x3c0   :  { %v3045_v24 = vpop.f32.mrb[12].mxu0 }
 0x3c1   :  { %3212 = vst [vmem:[#allocation8 + $0x60] sm:$0xff] %v3045_v24  ;;  %v3047_v59 = vpop.f32.mrb[13].mxu0 }
 0x3c2   :  { %3213 = vst [vmem:[#allocation8 + $0x68] sm:$0xff] %v3047_v59 }
 0x3c4   :  { %v3051_v16 = vpop.f32.mrb[14].mxu0 }
 0x3c5   :  { %3214 = vst [vmem:[#allocation8 + $0x70] sm:$0xff] %v3051_v16  ;;  %v3053_v7 = vpop.f32.mrb[15].mxu0 }
 0x3c6   :  { %3215 = vst [vmem:[#allocation8 + $0x78] sm:$0xff] %v3053_v7 }
 0x3c8   :  { %v3057_v42 = vpop.f32.mrb[16].mxu0 }
 0x3c9   :  { %3216 = vst [vmem:[#allocation8 + $0x80] sm:$0xff] %v3057_v42  ;;  %v3059_v8 = vpop.f32.mrb[17].mxu0 }
 0x3ca   :  { %3217 = vst [vmem:[#allocation8 + $0x88] sm:$0xff] %v3059_v8 }
 0x3cc   :  { %v3063_v44 = vpop.f32.mrb[18].mxu0 }
 0x3cd   :  { %3218 = vst [vmem:[#allocation8 + $0x90] sm:$0xff] %v3063_v44  ;;  %v3065_v47 = vpop.f32.mrb[19].mxu0 }
 0x3ce   :  { %3219 = vst [vmem:[#allocation8 + $0x98] sm:$0xff] %v3065_v47 }
 0x3d0   :  { %v3069_v56 = vpop.f32.mrb[20].mxu0 }
 0x3d1   :  { %3220 = vst [vmem:[#allocation8 + $0xa0] sm:$0xff] %v3069_v56  ;;  %v3071_v33 = vpop.f32.mrb[21].mxu0 }
 0x3d2   :  { %3221 = vst [vmem:[#allocation8 + $0xa8] sm:$0xff] %v3071_v33 }
 0x3d4   :  { %v3075_v19 = vpop.f32.mrb[22].mxu0 }
 0x3d5   :  { %3222 = vst [vmem:[#allocation8 + $0xb0] sm:$0xff] %v3075_v19  ;;  %v3077_v61 = vpop.f32.mrb[23].mxu0 }
 0x3d6   :  { %3223 = vst [vmem:[#allocation8 + $0xb8] sm:$0xff] %v3077_v61 }
 0x3d8   :  { %v3081_v55 = vpop.f32.mrb[24].mxu0 }
 0x3d9   :  { %3224 = vst [vmem:[#allocation8 + $0xc0] sm:$0xff] %v3081_v55  ;;  %v3083_v10 = vpop.f32.mrb[25].mxu0 }
 0x3da   :  { %3225 = vst [vmem:[#allocation8 + $0xc8] sm:$0xff] %v3083_v10 }
 0x3dc   :  { %v3087_v29 = vpop.f32.mrb[26].mxu0 }
 0x3dd   :  { %3226 = vst [vmem:[#allocation8 + $0xd0] sm:$0xff] %v3087_v29  ;;  %v3089_v52 = vpop.f32.mrb[27].mxu0 }
 0x3de   :  { %3227 = vst [vmem:[#allocation8 + $0xd8] sm:$0xff] %v3089_v52 }
 0x3e0   :  { %v3093_v31 = vpop.f32.mrb[28].mxu0 }
 0x3e1   :  { %3228 = vst [vmem:[#allocation8 + $0xe0] sm:$0xff] %v3093_v31  ;;  %v3095_v36 = vpop.f32.mrb[29].mxu0 }
 0x3e2   :  { %3229 = vst [vmem:[#allocation8 + $0xe8] sm:$0xff] %v3095_v36 }
 0x3e4   :  { %v3099_v53 = vpop.f32.mrb[30].mxu0 }
 0x3e5   :  { %3230 = vst [vmem:[#allocation8 + $0xf0] sm:$0xff] %v3099_v53  ;;  %v3101_v39 = vpop.f32.mrb[31].mxu0 }
 0x3e6   :  { %3231 = vst [vmem:[#allocation8 + $0xf8] sm:$0xff] %v3101_v39 }
 0x3e8   :  { %v3105_v30 = vpop.f32.mrb[32].mxu0 }
 0x3e9   :  { %3232 = vst [vmem:[#allocation8 + $0x100] sm:$0xff] %v3105_v30  ;;  %v3107_v51 = vpop.f32.mrb[33].mxu0 }
 0x3ea   :  { %3233 = vst [vmem:[#allocation8 + $0x108] sm:$0xff] %v3107_v51 }
 0x3ec   :  { %v3111_v18 = vpop.f32.mrb[34].mxu0 }
 0x3ed   :  { %3234 = vst [vmem:[#allocation8 + $0x110] sm:$0xff] %v3111_v18  ;;  %v3113_v23 = vpop.f32.mrb[35].mxu0 }
 0x3ee   :  { %3235 = vst [vmem:[#allocation8 + $0x118] sm:$0xff] %v3113_v23 }
 0x3f0   :  { %v3117_v3 = vpop.f32.mrb[36].mxu0 }
 0x3f1   :  { %3236 = vst [vmem:[#allocation8 + $0x120] sm:$0xff] %v3117_v3  ;;  %v3119_v35 = vpop.f32.mrb[37].mxu0 }
 0x3f2   :  { %3237 = vst [vmem:[#allocation8 + $0x128] sm:$0xff] %v3119_v35 }
 0x3f4   :  { %v3123_v58 = vpop.f32.mrb[38].mxu0 }
 0x3f5   :  { %3238 = vst [vmem:[#allocation8 + $0x130] sm:$0xff] %v3123_v58  ;;  %v3125_v2 = vpop.f32.mrb[39].mxu0 }
 0x3f6   :  { %3239 = vst [vmem:[#allocation8 + $0x138] sm:$0xff] %v3125_v2 }
 0x3f8   :  { %v3129_v14 = vpop.f32.mrb[40].mxu0 }
 0x3f9   :  { %3240 = vst [vmem:[#allocation8 + $0x140] sm:$0xff] %v3129_v14  ;;  %v3131_v25 = vpop.f32.mrb[41].mxu0 }
 0x3fa   :  { %3241 = vst [vmem:[#allocation8 + $0x148] sm:$0xff] %v3131_v25 }
 0x3fc   :  { %v3135_v34 = vpop.f32.mrb[42].mxu0 }
 0x3fd   :  { %3242 = vst [vmem:[#allocation8 + $0x150] sm:$0xff] %v3135_v34  ;;  %v3137_v20 = vpop.f32.mrb[43].mxu0 }
 0x3fe   :  { %3243 = vst [vmem:[#allocation8 + $0x158] sm:$0xff] %v3137_v20 }
 0x400   :  { %v3141_v49 = vpop.f32.mrb[44].mxu0 }
 0x401   :  { %3244 = vst [vmem:[#allocation8 + $0x160] sm:$0xff] %v3141_v49  ;;  %v3143_v22 = vpop.f32.mrb[45].mxu0 }
 0x402   :  { %3245 = vst [vmem:[#allocation8 + $0x168] sm:$0xff] %v3143_v22 }
 0x404   :  { %v3147_v13 = vpop.f32.mrb[46].mxu0 }
 0x405   :  { %3246 = vst [vmem:[#allocation8 + $0x170] sm:$0xff] %v3147_v13  ;;  %v3149_v60 = vpop.f32.mrb[47].mxu0 }
 0x406   :  { %3247 = vst [vmem:[#allocation8 + $0x178] sm:$0xff] %v3149_v60 }
 0x408   :  { %v3153_v32 = vpop.f32.mrb[48].mxu0 }
 0x409   :  { %3248 = vst [vmem:[#allocation8 + $0x180] sm:$0xff] %v3153_v32  ;;  %v3155_v46 = vpop.f32.mrb[49].mxu0 }
 0x40a   :  { %3249 = vst [vmem:[#allocation8 + $0x188] sm:$0xff] %v3155_v46 }
 0x40c   :  { %v3159_v21 = vpop.f32.mrb[50].mxu0 }
 0x40d   :  { %3250 = vst [vmem:[#allocation8 + $0x190] sm:$0xff] %v3159_v21  ;;  %v3161_v54 = vpop.f32.mrb[51].mxu0 }
 0x40e   :  { %3251 = vst [vmem:[#allocation8 + $0x198] sm:$0xff] %v3161_v54 }
 0x410   :  { %v3165_v41 = vpop.f32.mrb[52].mxu0 }
 0x411   :  { %3252 = vst [vmem:[#allocation8 + $0x1a0] sm:$0xff] %v3165_v41  ;;  %v3167_v12 = vpop.f32.mrb[53].mxu0 }
 0x412   :  { %3253 = vst [vmem:[#allocation8 + $0x1a8] sm:$0xff] %v3167_v12 }
 0x414   :  { %v3171_v6 = vpop.f32.mrb[54].mxu0 }
 0x415   :  { %3254 = vst [vmem:[#allocation8 + $0x1b0] sm:$0xff] %v3171_v6  ;;  %v3173_v57 = vpop.f32.mrb[55].mxu0 }
 0x416   :  { %3255 = vst [vmem:[#allocation8 + $0x1b8] sm:$0xff] %v3173_v57 }
 0x418   :  { %v3177_v5 = vpop.f32.mrb[56].mxu0 }
 0x419   :  { %3256 = vst [vmem:[#allocation8 + $0x1c0] sm:$0xff] %v3177_v5  ;;  %v3179_v11 = vpop.f32.mrb[57].mxu0 }
 0x41a   :  { %3257 = vst [vmem:[#allocation8 + $0x1c8] sm:$0xff] %v3179_v11 }
 0x41c   :  { %v3183_v0 = vpop.f32.mrb[58].mxu0 }
 0x41d   :  { %3258 = vst [vmem:[#allocation8 + $0x1d0] sm:$0xff] %v3183_v0  ;;  %v3185_v9 = vpop.f32.mrb[59].mxu0 }
 0x41e   :  { %3259 = vst [vmem:[#allocation8 + $0x1d8] sm:$0xff] %v3185_v9 }
 0x420   :  { %v3189_v17 = vpop.f32.mrb[60].mxu0 }
 0x421   :  { %3260 = vst [vmem:[#allocation8 + $0x1e0] sm:$0xff] %v3189_v17  ;;  %v3191_v63 = vpop.f32.mrb[61].mxu0 }
 0x422   :  { %3261 = vst [vmem:[#allocation8 + $0x1e8] sm:$0xff] %v3191_v63 }
 0x424   :  { %v3195_v50 = vpop.f32.mrb[62].mxu0 }
 0x425   :  { %3262 = vst [vmem:[#allocation8 + $0x1f0] sm:$0xff] %v3195_v50  ;;  %v3197_v43 = vpop.f32.mrb[63].mxu0 }
 0x426   :  { %3263 = vst [vmem:[#allocation8 + $0x1f8] sm:$0xff] %v3197_v43 }
 0x427   :  { %4150 = shalt.err (!%p4147_p0)
}
 0x428   :  { %s4151_s27 = scalar_lea.hbm %s4707_s3, 8192 }
 0x429   :  { %p4152_p1 = scmp.ne.s32.totalorder %s4707_s3, %s4151_s27  ;;  %p4155_p2 = scmp.lt.u32.totalorder %s4151_s27, %s4707_s3 }
 0x42b   :  { %p4157_p3 = pnand %p4155_p2, %p4152_p1 }
 0x42d   :  { %4160 = shalt.err (!%p4157_p3)
}
 0x42e   :  { %3275 = dma.vmem_to_hbm [thread:$0]  %s3270_s23, 8192, %s4707_s3, [#allocation4], %s4171_s1, %s4171_s1, %s4172_s9  }
 0x42f   :  { %4165 = dma.done.wait [#allocation4], 8192  }
 0x430   :  { %4166 = vsyncadd [#allocation4], 4294959104 }
 0x431   :  { %3279 = vsyncpa [#allocation3], 1 }
 0x432   :  { %3280 = vsyncpa [#allocation6], 1 }
 0x433   :  { %3281 = vsyncpa [#allocation4], 1 }

</bundles_post_ra>
